<compile_context>
chip_gen: v7x
topology: tpu7x:2x2x1
jax: 0.10.0
libtpu: 0.0.40
codegen_flags: <defaults>
</compile_context>

<pallas_src>
import functools

import jax
import jax.numpy as jnp
from jax import lax
from jax.experimental import pallas as pl
from jax.experimental.pallas import tpu as pltpu


_VMEM_LIMIT = 48 * 1024 * 1024   # headroom over the 32 MiB scoped default,
                                 # still under v7x's 64 MiB physical VMEM.


@functools.lru_cache(maxsize=1)
def _default_tile_m():
    # v5e/v6e (128 MiB VMEM): bigger blocks buy a small roofline bump;
    # v7x (64 MiB): stay at 512 so double-buffered blocks leave headroom.
    try:
        info = pltpu.get_tpu_info()
        vmem = getattr(info, "vmem_capacity_bytes", 0) or 0
        if vmem >= 100 * 1024 * 1024:
            return 1024
    except Exception:
        pass
    return 512


# ----------------------------------------------------------------------------
# Pallas kernel 1: tiled 1x1 conv (matmul) + folded BN + optional activation
# ----------------------------------------------------------------------------
def _pw_kernel(x_ref, w_ref, s_ref, b_ref, o_ref, *, act):
    y = jnp.dot(x_ref[...], w_ref[...], preferred_element_type=jnp.float32)
    y = y * s_ref[...] + b_ref[...]
    if act == 'swish':
        y = y * jax.nn.sigmoid(y)
    elif act == 'sigmoid':
        y = jax.nn.sigmoid(y)
    o_ref[...] = y.astype(o_ref.dtype)


def pointwise_conv_bn(x_nhwc, w, scale, bias, act=None, tile_m=None):
    """x: [B,H,W,Cin] (bf16), w: [Cin,Cout], scale/bias: [Cout] -> bf16 [B,H,W,Cout]."""
    B, H, W, Cin = x_nhwc.shape
    Cout = w.shape[1]
    M = B * H * W
    x2 = x_nhwc.reshape(M, Cin)

    # Lane-dense output packing: row-major (M, Cout) == (M//f, f*Cout); apply a
    # block-diagonal weight so the kernel stores full 128-lane rows.
    f = 1
    if Cout < 128 and 128 % Cout == 0 and M % (128 // Cout) == 0:
        f = 128 // Cout
    if f > 1:
        x2 = x2.reshape(M // f, f * Cin)
        w_big = jnp.kron(jnp.eye(f, dtype=w.dtype), w)     # [f*Cin, f*Cout]
        s_big = jnp.tile(scale, f)
        b_big = jnp.tile(bias, f)
    else:
        w_big, s_big, b_big = w, scale, bias

    Mr, Kr = x2.shape
    Nr = w_big.shape[1]

    if tile_m is None:
        tile_m = _default_tile_m()
    tm = min(tile_m, Mr)
    if tm >= 8:
        tm -= tm % 8            # keep sublane-aligned blocks
    else:
        tm = Mr                 # tiny map: one block == full extent
    Mp = -(-Mr // tm) * tm
    if Mp != Mr:
        # Pad M up to a tile multiple (hardened fallback: never a single
        # whole-array block for awkward M).
        x2 = jnp.pad(x2, ((0, Mp - Mr), (0, 0)))

    out = pl.pallas_call(
        functools.partial(_pw_kernel, act=act),
        out_shape=jax.ShapeDtypeStruct((Mp, Nr), jnp.bfloat16),
        grid=(Mp // tm,),
        in_specs=[
            pl.BlockSpec((tm, Kr), lambda i: (i, 0)),
            pl.BlockSpec((Kr, Nr), lambda i: (0, 0)),   # weights stay resident
            pl.BlockSpec((1, Nr), lambda i: (0, 0)),
            pl.BlockSpec((1, Nr), lambda i: (0, 0)),
        ],
        out_specs=pl.BlockSpec((tm, Nr), lambda i: (i, 0)),
        compiler_params=pltpu.CompilerParams(dimension_semantics=("parallel",)),
    )(x2.astype(jnp.bfloat16), w_big.astype(jnp.bfloat16),
      s_big.reshape(1, Nr).astype(jnp.float32),
      b_big.reshape(1, Nr).astype(jnp.float32))
    if Mp != Mr:
        out = out[:Mr]
    return out.reshape(B, H, W, Cout)


# ----------------------------------------------------------------------------
# Shared in-kernel helper: depthwise3x3 (zero "SAME" pad) folded with a 1x1
# conv, evaluated as 9 accumulated MXU matmuls (no [HW, 9C] im2col buffer).
# ----------------------------------------------------------------------------
def _dw_pw_accum(x_f32, w_of, H, W, C, Cout):
    """x_f32: [H*W, C] f32.  w_of(k) -> bf16 [C, Cout] weight slab for tap k.
    Flat row m is pixel (m//W, m%W); tap (dy,dx) of pixel m lives at flat row
    m + dy*W + dx.  Pad W+1 zero rows on both ends (covers dy out of range) and
    mask columns that wrapped across a row boundary (dx out of range)."""
    HW = H * W
    x16 = x_f32.astype(jnp.bfloat16)
    zpad = jnp.zeros((W + 1, C), jnp.bfloat16)
    xp = jnp.concatenate([zpad, x16, zpad], axis=0)          # [HW + 2W + 2, C]
    col = lax.broadcasted_iota(jnp.int32, (HW, 1), 0) % W
    zero = jnp.zeros((), jnp.bfloat16)

    y = jnp.zeros((HW, Cout), jnp.float32)
    k = 0
    for dy in (-1, 0, 1):
        for dx in (-1, 0, 1):
            start = (W + 1) + dy * W + dx
            t = xp[start:start + HW, :]
            if dx == -1:
                t = jnp.where(col >= 1, t, zero)
            elif dx == 1:
                t = jnp.where(col < W - 1, t, zero)
            y = y + jnp.dot(t, w_of(k), preferred_element_type=jnp.float32)
            k += 1
    return y


def _fold_dw_pw(dw, pw):
    """Fold depthwise (3,3,C) and pointwise (C,Cout) into one [9*C, Cout] weight.
    Exact because SeparableConvBlock has no norm/activation between the two."""
    C = dw.shape[-1]
    Cout = pw.shape[1]
    return (dw.reshape(9, C, 1) * pw.reshape(1, C, Cout)).reshape(9 * C, Cout)


# ----------------------------------------------------------------------------
# Pallas kernel 2: fused BiFPN node
#   (attention weighted-sum -> pre-swish -> depthwise3x3∘pointwise -> BN)
# ----------------------------------------------------------------------------
def _sepconv_kernel(*refs, H, W, C, Cout, n_in, has_att, pre_swish, act):
    i0 = 1 if has_att else 0
    att_ref = refs[0] if has_att else None
    x_refs = refs[i0:i0 + n_in]
    w3_ref, s_ref, b_ref, o_ref = refs[i0 + n_in:i0 + n_in + 4]

    if has_att:
        x = att_ref[0] * x_refs[0][0].astype(jnp.float32)
        for i in range(1, n_in):
            x = x + att_ref[i] * x_refs[i][0].astype(jnp.float32)
    else:
        x = x_refs[0][0].astype(jnp.float32)

    if pre_swish:
        # swish(0) == 0, so the zero halo stays zero (matches zero-padding).
        x = x * jax.nn.sigmoid(x)

    y = _dw_pw_accum(x, lambda k: w3_ref[pl.ds(k * C, C), :], H, W, C, Cout)
    y = y * s_ref[...] + b_ref[...]
    if act == 'swish':
        y = y * jax.nn.sigmoid(y)
    elif act == 'sigmoid':
        y = jax.nn.sigmoid(y)
    o_ref[0] = y.astype(o_ref.dtype)


def sepconv_fused(xs, att, dw, pw, scale, bias, *, pre_swish, act,
                  out_dtype=jnp.bfloat16):
    """Fused SeparableConvBlock (+ optional fast-attention fusion / swish)."""
    B, H, W, C = xs[0].shape
    Cout = pw.shape[1]
    HW = H * W
    has_att = att is not None
    n_in = len(xs)

    w3 = _fold_dw_pw(dw, pw).astype(jnp.bfloat16)

    args, in_specs = [], []
    if has_att:
        args.append(att.astype(jnp.float32))
        in_specs.append(pl.BlockSpec(memory_space=pltpu.MemorySpace.SMEM))
    for x in xs:
        args.append(x.reshape(B, HW, C).astype(jnp.bfloat16))
        in_specs.append(pl.BlockSpec((1, HW, C), lambda b: (b, 0, 0)))
    args += [w3, scale.reshape(1, Cout).astype(jnp.float32),
             bias.reshape(1, Cout).astype(jnp.float32)]
    in_specs += [
        pl.BlockSpec((9 * C, Cout), lambda b: (0, 0)),
        pl.BlockSpec((1, Cout), lambda b: (0, 0)),
        pl.BlockSpec((1, Cout), lambda b: (0, 0)),
    ]

    # TODO(synk): at production resolutions tile the grid as (B, H//band) with a
    # band+2-row halo (overlapping Element-indexed blocks or manual DMA) so VMEM
    # stays resolution-independent and the pipeline gets >B steps per TC.
    # TODO(synk): pack 2 pixels per matmul row (block-diagonal [2*9C, 2*Cout]
    # weight) so Cout=64 stores become 128-lane dense; skipped here because the
    # in-kernel row pairing is a sublane->lane relayout of comparable cost.
    out = pl.pallas_call(
        functools.partial(_sepconv_kernel, H=H, W=W, C=C, Cout=Cout, n_in=n_in,
                          has_att=has_att, pre_swish=pre_swish, act=act),
        out_shape=jax.ShapeDtypeStruct((B, HW, Cout), out_dtype),
        grid=(B,),
        in_specs=in_specs,
        out_specs=pl.BlockSpec((1, HW, Cout), lambda b: (b, 0, 0)),
        compiler_params=pltpu.CompilerParams(
            dimension_semantics=("parallel",),
            vmem_limit_bytes=_VMEM_LIMIT),
    )(*args)
    return out.reshape(B, H, W, Cout)


# ----------------------------------------------------------------------------
# Pallas kernel 3: full regressor + classifier towers for one pyramid level
#   (3 shared sepconv+BN+swish layers + header [+ sigmoid], both heads, one call)
# ----------------------------------------------------------------------------
def _heads_kernel(x_ref,
                  rcw_ref, rcs_ref, rcb_ref, rhw_ref, rhs_ref, rhb_ref,
                  ccw_ref, ccs_ref, ccb_ref, chw_ref, chs_ref, chb_ref,
                  reg_ref, cls_ref, *, H, W, C, n_layers):
    x0 = x_ref[0].astype(jnp.float32)                        # [HW, C]

    def chain(cw_ref, cs_ref, cb_ref, hw_ref, hs_ref, hb_ref, out_ref,
              sigmoid_out):
        x = x0
        for i in range(n_layers):
            w_i = cw_ref[i]                                  # [9C, C] bf16
            y = _dw_pw_accum(x, lambda k, w_i=w_i: w_i[k * C:(k + 1) * C, :],
                             H, W, C, C)
            y = y * cs_ref[pl.ds(i, 1), :] + cb_ref[pl.ds(i, 1), :]
            x = y * jax.nn.sigmoid(y)                        # swish
        co = out_ref.shape[-1]
        y = _dw_pw_accum(x, lambda k: hw_ref[pl.ds(k * C, C), :], H, W, C, co)
        y = y * hs_ref[...] + hb_ref[...]
        if sigmoid_out:
            y = jax.nn.sigmoid(y)                            # fused classifier sigmoid
        out_ref[0] = y.astype(out_ref.dtype)

    chain(rcw_ref, rcs_ref, rcb_ref, rhw_ref, rhs_ref, rhb_ref, reg_ref, False)
    chain(ccw_ref, ccs_ref, ccb_ref, chw_ref, chs_ref, chb_ref, cls_ref, True)


def run_heads(feats, reg_p, cls_p, num_anchors=9, num_classes=80):
    """One pallas_call per pyramid level runs BOTH heads end to end."""
    L = len(reg_p['conv'])
    C = reg_p['conv'][0]['pw'].shape[0]

    rcw = jnp.stack([_fold_dw_pw(c['dw'], c['pw'])
                     for c in reg_p['conv']]).astype(jnp.bfloat16)   # [L,9C,C]
    ccw = jnp.stack([_fold_dw_pw(c['dw'], c['pw'])
                     for c in cls_p['conv']]).astype(jnp.bfloat16)
    rhw = _fold_dw_pw(reg_p['head']['dw'], reg_p['head']['pw']).astype(jnp.bfloat16)
    chw = _fold_dw_pw(cls_p['head']['dw'], cls_p['head']['pw']).astype(jnp.bfloat16)
    r4 = rhw.shape[1]                       # num_anchors * 4
    c4 = chw.shape[1]                       # num_anchors * num_classes
    rhs = reg_p['head']['scale'].reshape(1, r4).astype(jnp.float32)
    rhb = reg_p['head']['bias'].reshape(1, r4).astype(jnp.float32)
    chs = cls_p['head']['scale'].reshape(1, c4).astype(jnp.float32)
    chb = cls_p['head']['bias'].reshape(1, c4).astype(jnp.float32)

    reg_outs, cls_outs = [], []
    for lvl, feat in enumerate(feats):
        B, H, W, _ = feat.shape
        HW = H * W
        rcs = jnp.stack([reg_p['bn'][lvl][i]['scale'] for i in range(L)]).astype(jnp.float32)
        rcb = jnp.stack([reg_p['bn'][lvl][i]['bias'] for i in range(L)]).astype(jnp.float32)
        ccs = jnp.stack([cls_p['bn'][lvl][i]['scale'] for i in range(L)]).astype(jnp.float32)
        ccb = jnp.stack([cls_p['bn'][lvl][i]['bias'] for i in range(L)]).astype(jnp.float32)

        reg, cls = pl.pallas_call(
            functools.partial(_heads_kernel, H=H, W=W, C=C, n_layers=L),
            out_shape=(jax.ShapeDtypeStruct((B, HW, r4), jnp.float32),
                       jax.ShapeDtypeStruct((B, HW, c4), jnp.float32)),
            grid=(B,),
            in_specs=[
                pl.BlockSpec((1, HW, C), lambda b: (b, 0, 0)),
                pl.BlockSpec((L, 9 * C, C), lambda b: (0, 0, 0)),
                pl.BlockSpec((L, C), lambda b: (0, 0)),
                pl.BlockSpec((L, C), lambda b: (0, 0)),
                pl.BlockSpec((9 * C, r4), lambda b: (0, 0)),
                pl.BlockSpec((1, r4), lambda b: (0, 0)),
                pl.BlockSpec((1, r4), lambda b: (0, 0)),
                pl.BlockSpec((L, 9 * C, C), lambda b: (0, 0, 0)),
                pl.BlockSpec((L, C), lambda b: (0, 0)),
                pl.BlockSpec((L, C), lambda b: (0, 0)),
                pl.BlockSpec((9 * C, c4), lambda b: (0, 0)),
                pl.BlockSpec((1, c4), lambda b: (0, 0)),
                pl.BlockSpec((1, c4), lambda b: (0, 0)),
            ],
            out_specs=(
                pl.BlockSpec((1, HW, r4), lambda b: (b, 0, 0)),
                pl.BlockSpec((1, HW, c4), lambda b: (b, 0, 0)),
            ),
            compiler_params=pltpu.CompilerParams(
                dimension_semantics=("parallel",),
                vmem_limit_bytes=_VMEM_LIMIT),
        )(feat.reshape(B, HW, C).astype(jnp.bfloat16),
          rcw, rcs, rcb, rhw, rhs, rhb,
          ccw, ccs, ccb, chw, chs, chb)

        reg_outs.append(reg.reshape(B, HW * num_anchors, 4))
        cls_outs.append(cls.reshape(B, HW * num_anchors, num_classes))

    return jnp.concatenate(reg_outs, axis=1), jnp.concatenate(cls_outs, axis=1)


# ----------------------------------------------------------------------------
# Plain-JAX glue
# ----------------------------------------------------------------------------
def maxpool_same(x, kernel=3, stride=2):
    """MaxPool2dStaticSamePadding(3, 2) equivalent, NHWC."""
    _, H, W, _ = x.shape

    def pads(size):
        out = -(-size // stride)
        pad = max((out - 1) * stride + kernel - size, 0)
        return pad // 2, pad - pad // 2

    ph, pw_ = pads(H), pads(W)
    init = jnp.array(-jnp.inf, dtype=x.dtype)
    return lax.reduce_window(
        x, init, lax.max,
        (1, kernel, kernel, 1), (1, stride, stride, 1),
        ((0, 0), ph, pw_, (0, 0)))


def upsample2x(x):
    # TODO(synk): fuse this nearest-neighbor 2x into the consuming sepconv
    # kernel (in-kernel 2x2 broadcast) to avoid materializing the 4x tensor.
    return jnp.repeat(jnp.repeat(x, 2, axis=1), 2, axis=2)


def space_to_depth(x):
    B, H, W, C = x.shape
    x = x.reshape(B, H // 2, 2, W // 2, 2, C)
    x = x.transpose(0, 1, 3, 2, 4, 5)
    return x.reshape(B, H // 2, W // 2, 4 * C)


def _fuse_weights(raw):
    w = jax.nn.relu(raw)
    return w / (jnp.sum(w) + 1e-4)


def fused_node(xs, att_raw, blk):
    return sepconv_fused(xs, _fuse_weights(att_raw), blk['dw'], blk['pw'],
                         blk['scale'], blk['bias'], pre_swish=True, act=None)


# ----------------------------------------------------------------------------
# Model pieces
# ----------------------------------------------------------------------------
def backbone_net(x_nhwc, p):
    # TODO(synk): real EfficientNet-B0 MBConv blocks are replaced by simplified
    # space-to-depth + fused pointwise-conv-BN-swish stages with the correct
    # strides (8/16/32) and channel counts (40/112/320) for p3/p4/p5.
    feats = []
    y = x_nhwc
    for stage in p:
        y = space_to_depth(y)
        y = pointwise_conv_bn(y, stage['w'], stage['scale'], stage['bias'],
                              act='swish')
        feats.append(y)
    return feats[2], feats[3], feats[4]


def bifpn_cell(feats, p, first_time):
    if first_time:
        p3, p4, p5 = feats
        p6_in = maxpool_same(pointwise_conv_bn(
            p5, p['p5_to_p6_w'], p['p5_to_p6_s'], p['p5_to_p6_b']))
        p7_in = maxpool_same(p6_in)
        p3_in = pointwise_conv_bn(p3, p['p3_dc_w'], p['p3_dc_s'], p['p3_dc_b'])
        p4_in = pointwise_conv_bn(p4, p['p4_dc_w'], p['p4_dc_s'], p['p4_dc_b'])
        p5_in = pointwise_conv_bn(p5, p['p5_dc_w'], p['p5_dc_s'], p['p5_dc_b'])
    else:
        p3_in, p4_in, p5_in, p6_in, p7_in = feats

    # top-down path: attention fuse + swish + sep-conv all fused in one kernel
    p6_up = fused_node([p6_in, upsample2x(p7_in)], p['p6_w1'], p['conv6_up'])
    p5_up = fused_node([p5_in, upsample2x(p6_up)], p['p5_w1'], p['conv5_up'])
    p4_up = fused_node([p4_in, upsample2x(p5_up)], p['p4_w1'], p['conv4_up'])
    p3_out = fused_node([p3_in, upsample2x(p4_up)], p['p3_w1'], p['conv3_up'])

    if first_time:
        p4_in = pointwise_conv_bn(feats[1], p['p4_dc2_w'], p['p4_dc2_s'], p['p4_dc2_b'])
        p5_in = pointwise_conv_bn(feats[2], p['p5_dc2_w'], p['p5_dc2_s'], p['p5_dc2_b'])

    # bottom-up path
    p4_out = fused_node([p4_in, p4_up, maxpool_same(p3_out)], p['p4_w2'], p['conv4_down'])
    p5_out = fused_node([p5_in, p5_up, maxpool_same(p4_out)], p['p5_w2'], p['conv5_down'])
    p6_out = fused_node([p6_in, p6_up, maxpool_same(p5_out)], p['p6_w2'], p['conv6_down'])
    p7_out = fused_node([p7_in, maxpool_same(p6_out)], p['p7_w2'], p['conv7_down'])

    return p3_out, p4_out, p5_out, p6_out, p7_out


def generate_anchors(img_h, img_w, dtype):
    """Anchors module (anchor_scale=4.0, default ratios/scales, levels 3..7)."""
    anchor_scale = 4.0
    scales = [2 ** 0, 2 ** (1.0 / 3.0), 2 ** (2.0 / 3.0)]
    ratios = [(1.0, 1.0), (1.4, 0.7), (0.7, 1.4)]
    all_boxes = []
    for level in range(3, 8):
        stride = 2 ** level
        boxes_level = []
        for scale in scales:
            for ratio in ratios:
                base = anchor_scale * stride * scale
                ax2 = base * ratio[0] / 2.0
                ay2 = base * ratio[1] / 2.0
                x = jnp.arange(stride / 2.0, img_w, stride, dtype=jnp.float32)
                y = jnp.arange(stride / 2.0, img_h, stride, dtype=jnp.float32)
                xv, yv = jnp.meshgrid(x, y)
                xv, yv = xv.reshape(-1), yv.reshape(-1)
                boxes = jnp.stack([yv - ay2, xv - ax2, yv + ay2, xv + ax2], axis=1)
                boxes_level.append(boxes[:, None, :])
        boxes_level = jnp.concatenate(boxes_level, axis=1)   # [N_loc, 9, 4]
        all_boxes.append(boxes_level.reshape(-1, 4))
    return jnp.concatenate(all_boxes, axis=0)[None].astype(dtype)


def efficientdet_forward(x_nchw, params, num_classes=80):
    x = jnp.transpose(x_nchw, (0, 2, 3, 1)).astype(jnp.bfloat16)   # NCHW -> NHWC, bf16
    p3, p4, p5 = backbone_net(x, params['backbone'])
    feats = (p3, p4, p5)
    for ci, cell in enumerate(params['bifpn']):
        feats = bifpn_cell(feats, cell, first_time=(ci == 0))
    regression, classification = run_heads(
        feats, params['regressor'], params['classifier'],
        num_anchors=9, num_classes=num_classes)
    anchors = generate_anchors(x_nchw.shape[2], x_nchw.shape[3], x_nchw.dtype)
    feats_out = tuple(f.astype(x_nchw.dtype) for f in feats)   # match PyTorch dtype
    return feats_out, regression, classification, anchors


# ----------------------------------------------------------------------------
# Pure-JAX f32 references (tolerance checks for the bf16 Pallas kernels)
# ----------------------------------------------------------------------------
def _sepconv_ref(xs, att_raw, dw, pw, scale, bias, pre_swish, act):
    if att_raw is not None:
        wts = jax.nn.relu(att_raw)
        wts = wts / (jnp.sum(wts) + 1e-4)
        x = sum(wts[i] * xs[i].astype(jnp.float32) for i in range(len(xs)))
    else:
        x = xs[0].astype(jnp.float32)
    if pre_swish:
        x = x * jax.nn.sigmoid(x)
    B, H, W, C = x.shape
    xpad = jnp.pad(x, ((0, 0), (1, 1), (1, 1), (0, 0)))
    y = jnp.zeros_like(x)
    for dy in range(3):
        for dx in range(3):
            y = y + xpad[:, dy:dy + H, dx:dx + W, :] * dw[dy, dx]
    y = jnp.einsum('bhwc,cd->bhwd', y, pw)
    y = y * scale + bias
    if act == 'swish':
        y = y * jax.nn.sigmoid(y)
    elif act == 'sigmoid':
        y = jax.nn.sigmoid(y)
    return y


def _pointwise_ref(x, w, scale, bias, act):
    y = jnp.einsum('bhwc,cd->bhwd', x.astype(jnp.float32), w) * scale + bias
    if act == 'swish':
        y = y * jax.nn.sigmoid(y)
    elif act == 'sigmoid':
        y = jax.nn.sigmoid(y)
    return y


# ----------------------------------------------------------------------------
# Deterministic synthetic parameter init (compound_coef = 0)
# ----------------------------------------------------------------------------
class ParamGen:
    def __init__(self, key):
        self.key = key

    def take(self, shape, scale=0.05):
        self.key, sub = jax.random.split(self.key)
        return jax.random.normal(sub, shape, jnp.float32) * scale


def init_params(key, num_classes=80):
    pg = ParamGen(key)
    W = 64                      # fpn_num_filters[0]
    num_anchors = 9             # 3 ratios * 3 scales

    # simplified backbone stages (space-to-depth factor 4 on channels each step)
    stems = [(12, 16), (64, 24), (96, 40), (160, 112), (448, 320)]
    backbone = [dict(w=pg.take((ci, co)),
                     scale=jnp.ones((co,), jnp.float32),
                     bias=pg.take((co,), 0.01)) for ci, co in stems]

    def sep_block(cin, cout):
        return dict(dw=pg.take((3, 3, cin)), pw=pg.take((cin, cout)),
                    scale=jnp.ones((cout,), jnp.float32), bias=pg.take((cout,), 0.01))

    bifpn = []
    for cell_idx in range(3):   # fpn_cell_repeats[0] = 3
        cell = {}
        if cell_idx == 0:
            for name, cin in [('p3_dc', 40), ('p4_dc', 112), ('p5_dc', 320),
                              ('p4_dc2', 112), ('p5_dc2', 320), ('p5_to_p6', 320)]:
                cell[name + '_w'] = pg.take((cin, W))
                cell[name + '_s'] = jnp.ones((W,), jnp.float32)
                cell[name + '_b'] = pg.take((W,), 0.01)
        for name in ['conv6_up', 'conv5_up', 'conv4_up', 'conv3_up',
                     'conv4_down', 'conv5_down', 'conv6_down', 'conv7_down']:
            cell[name] = sep_block(W, W)
        for name, n in [('p6_w1', 2), ('p5_w1', 2), ('p4_w1', 2), ('p3_w1', 2),
                        ('p4_w2', 3), ('p5_w2', 3), ('p6_w2', 3), ('p7_w2', 2)]:
            cell[name] = jnp.ones((n,), jnp.float32)     # attention init = ones
        bifpn.append(cell)

    def head_params(out_ch, num_layers=3, num_levels=5):
        conv = [dict(dw=pg.take((3, 3, W)), pw=pg.take((W, W)))
                for _ in range(num_layers)]
        bn = [[dict(scale=jnp.ones((W,), jnp.float32), bias=pg.take((W,), 0.01))
               for _ in range(num_layers)] for _ in range(num_levels)]
        head = dict(dw=pg.take((3, 3, W)), pw=pg.take((W, out_ch)),
                    scale=jnp.ones((out_ch,), jnp.float32), bias=pg.take((out_ch,), 0.01))
        return dict(conv=conv, bn=bn, head=head)

    return dict(backbone=backbone, bifpn=bifpn,
                regressor=head_params(num_anchors * 4),
                classifier=head_params(num_anchors * num_classes))


# ----------------------------------------------------------------------------
if __name__ == "__main__":
    num_classes = 80
    B, C_IN, S = 2, 3, 128                   # smallest size that supports P3..P7
    x = jax.random.normal(jax.random.PRNGKey(0), (B, C_IN, S, S), jnp.float32)  # NCHW
    params = init_params(jax.random.PRNGKey(42), num_classes)

    # --- lightweight tolerance checks of the Pallas kernels vs pure-JAX f32 ---
    kx = jax.random.normal(jax.random.PRNGKey(1), (2, 16, 16, 64),
                           jnp.float32).astype(jnp.bfloat16)
    ky = jax.random.normal(jax.random.PRNGKey(2), (2, 16, 16, 64),
                           jnp.float32).astype(jnp.bfloat16)
    blk = params['bifpn'][0]['conv4_up']
    att_raw = params['bifpn'][0]['p4_w1']
    got_sc = sepconv_fused([kx, ky], _fuse_weights(att_raw), blk['dw'], blk['pw'],
                           blk['scale'], blk['bias'], pre_swish=True, act=None)
    want_sc = _sepconv_ref([kx, ky], att_raw, blk['dw'], blk['pw'],
                           blk['scale'], blk['bias'], pre_swish=True, act=None)
    err_sc = float(jnp.max(jnp.abs(got_sc.astype(jnp.float32) - want_sc)))
    assert err_sc < 5e-2, f"sepconv_fused mismatch vs f32 reference: {err_sc}"

    wpw = jax.random.normal(jax.random.PRNGKey(3), (64, 64), jnp.float32) * 0.05
    bpw = jax.random.normal(jax.random.PRNGKey(4), (64,), jnp.float32) * 0.01
    spw = jnp.ones((64,), jnp.float32)
    got_pw = pointwise_conv_bn(kx, wpw, spw, bpw, act='swish')
    want_pw = _pointwise_ref(kx, wpw, spw, bpw, act='swish')
    err_pw = float(jnp.max(jnp.abs(got_pw.astype(jnp.float32) - want_pw)))
    assert err_pw < 5e-2, f"pointwise_conv_bn mismatch vs f32 reference: {err_pw}"

    # --- full forward pass ---
    fwd = jax.jit(functools.partial(efficientdet_forward, num_classes=num_classes))
    feats, regression, classification, anchors = fwd(x, params)
    jax.block_until_ready((feats, regression, classification, anchors))

    total_anchors = sum((S // 2 ** l) ** 2 * 9 for l in range(3, 8))  # 3069
    assert len(feats) == 5
    assert feats[0].shape == (B, S // 8, S // 8, 64)
    assert regression.shape == (B, total_anchors, 4)
    assert classification.shape == (B, total_anchors, num_classes)
    assert anchors.shape == (1, total_anchors, 4)
    print("KERNEL_OK")
</pallas_src>

<mosaic_0001>
module attributes {stable_mosaic.version = 11 : i64} {
  func.func @_sepconv_kernel(%arg0: i32, %arg1: memref<2xf32, #tpu.memory_space<smem>>, %arg2: memref<1x256x64xbf16, #tpu.memory_space<vmem>>, %arg3: memref<1x256x64xbf16, #tpu.memory_space<vmem>>, %arg4: memref<576x64xbf16, #tpu.memory_space<vmem>>, %arg5: memref<1x64xf32, #tpu.memory_space<vmem>>, %arg6: memref<1x64xf32, #tpu.memory_space<vmem>>, %arg7: memref<1x256x64xbf16, #tpu.memory_space<vmem>>) attributes {dimension_semantics = [#tpu.dimension_semantics<parallel>], iteration_bounds = array<i64: 2>, scalar_prefetch = 0 : i64, scratch_operands = 0 : i64, tpu.core_type = #tpu.core_type<tc>, window_params = [{transform_indices = @transform_0, window_bounds = array<i64: 2>}, {transform_indices = @transform_1, window_bounds = array<i64: 1, 256, 64>}, {transform_indices = @transform_2, window_bounds = array<i64: 1, 256, 64>}, {pipeline_mode = #tpu.pipeline_mode<synchronous>, transform_indices = @transform_3, window_bounds = array<i64: 576, 64>}, {pipeline_mode = #tpu.pipeline_mode<synchronous>, transform_indices = @transform_4, window_bounds = array<i64: 1, 64>}, {pipeline_mode = #tpu.pipeline_mode<synchronous>, transform_indices = @transform_5, window_bounds = array<i64: 1, 64>}, {transform_indices = @transform_6, window_bounds = array<i64: 1, 256, 64>}]} {
    %c0 = arith.constant 0 : index
    %0 = memref.load %arg1[%c0] : memref<2xf32, #tpu.memory_space<smem>>
    %c0_0 = arith.constant 0 : index
    %c0_1 = arith.constant 0 : index
    %c0_2 = arith.constant 0 : index
    %1 = vector.load %arg2[%c0_0, %c0_1, %c0_2] : memref<1x256x64xbf16, #tpu.memory_space<vmem>>, vector<1x256x64xbf16>
    %2 = vector.shape_cast %1 : vector<1x256x64xbf16> to vector<256x64xbf16>
    %3 = arith.extf %2 : vector<256x64xbf16> to vector<256x64xf32>
    %4 = vector.broadcast %0 : f32 to vector<256x64xf32>
    %5 = arith.mulf %4, %3 : vector<256x64xf32>
    %c1 = arith.constant 1 : index
    %6 = memref.load %arg1[%c1] : memref<2xf32, #tpu.memory_space<smem>>
    %c0_3 = arith.constant 0 : index
    %c0_4 = arith.constant 0 : index
    %c0_5 = arith.constant 0 : index
    %7 = vector.load %arg3[%c0_3, %c0_4, %c0_5] : memref<1x256x64xbf16, #tpu.memory_space<vmem>>, vector<1x256x64xbf16>
    %8 = vector.shape_cast %7 : vector<1x256x64xbf16> to vector<256x64xbf16>
    %9 = arith.extf %8 : vector<256x64xbf16> to vector<256x64xf32>
    %10 = vector.broadcast %6 : f32 to vector<256x64xf32>
    %11 = arith.mulf %10, %9 : vector<256x64xf32>
    %12 = arith.addf %5, %11 : vector<256x64xf32>
    %13 = arith.negf %12 : vector<256x64xf32>
    %14 = math.exp %13 : vector<256x64xf32>
    %cst = arith.constant 1.000000e+00 : f32
    %15 = vector.broadcast %cst : f32 to vector<256x64xf32>
    %16 = arith.addf %15, %14 : vector<256x64xf32>
    %17 = arith.divf %15, %16 : vector<256x64xf32>
    %18 = arith.mulf %12, %17 : vector<256x64xf32>
    %19 = arith.truncf %18 : vector<256x64xf32> to vector<256x64xbf16>
    %cst_6 = arith.constant 0.000000e+00 : bf16
    %20 = vector.broadcast %cst_6 : bf16 to vector<17x64xbf16>
    %21 = tpu.concatenate %20, %19, %20 in 0 : vector<17x64xbf16>, vector<256x64xbf16>, vector<17x64xbf16> -> vector<290x64xbf16>
    %22 = tpu.iota {dimensions = array<i32: 0>} : vector<256x1xi32>
    %c16_i32 = arith.constant 16 : i32
    %c0_i32 = arith.constant 0 : i32
    %23 = arith.cmpi eq, %c16_i32, %c0_i32 : i32
    %c1_i32 = arith.constant 1 : i32
    %24 = arith.select %23, %c1_i32, %c16_i32 : i32
    %25 = vector.broadcast %24 : i32 to vector<256x1xi32>
    %26 = arith.remsi %22, %25 : vector<256x1xi32>
    %c0_i32_7 = arith.constant 0 : i32
    %27 = vector.broadcast %c0_i32_7 : i32 to vector<256x1xi32>
    %28 = arith.cmpi ne, %26, %27 : vector<256x1xi32>
    %c0_i32_8 = arith.constant 0 : i32
    %29 = vector.broadcast %c0_i32_8 : i32 to vector<256x1xi32>
    %30 = arith.cmpi slt, %26, %29 : vector<256x1xi32>
    %c0_i32_9 = arith.constant 0 : i32
    %31 = arith.cmpi slt, %24, %c0_i32_9 : i32
    %32 = vector.broadcast %31 : i1 to vector<256x1xi1>
    %33 = vector.broadcast %32 : vector<256x1xi1> to vector<256x1xi1>
    %34 = arith.xori %30, %33 : vector<256x1xi1>
    %35 = arith.andi %34, %28 : vector<256x1xi1>
    %36 = vector.broadcast %24 : i32 to vector<256x1xi32>
    %37 = arith.addi %26, %36 : vector<256x1xi32>
    %38 = arith.select %35, %37, %26 : vector<256x1xi1>, vector<256x1xi32>
    %cst_10 = arith.constant 0.000000e+00 : f32
    %39 = vector.broadcast %cst_10 : f32 to vector<256x64xf32>
    %40 = vector.extract_strided_slice %21 {offsets = [0, 0], sizes = [256, 64], strides = [1, 1]} : vector<290x64xbf16> to vector<256x64xbf16>
    %c1_i32_11 = arith.constant 1 : i32
    %41 = vector.broadcast %c1_i32_11 : i32 to vector<256x1xi32>
    %42 = arith.cmpi sge, %38, %41 : vector<256x1xi32>
    %cst_12 = arith.constant 0.000000e+00 : bf16
    %43 = vector.shape_cast %42 : vector<256x1xi1> to vector<256x1xi1>
    %44 = vector.broadcast %43 : vector<256x1xi1> to vector<256x64xi1>
    %45 = vector.broadcast %cst_12 : bf16 to vector<256x64xbf16>
    %46 = arith.select %44, %40, %45 : vector<256x64xi1>, vector<256x64xbf16>
    %c0_13 = arith.constant 0 : index
    %c0_14 = arith.constant 0 : index
    %47 = vector.load %arg4[%c0_13, %c0_14] : memref<576x64xbf16, #tpu.memory_space<vmem>>, vector<64x64xbf16>
    %cst_15 = arith.constant dense<0.000000e+00> : vector<256x64xf32>
    %48 = tpu.matmul %46, %47, %cst_15 {dimension_numbers = #tpu.dot_dimension_numbers<[1], [0], [0], [1], [0, 0, 1, 1], [], []>} : vector<256x64xbf16>, vector<64x64xbf16>, vector<256x64xf32> -> vector<256x64xf32>
    %49 = arith.addf %39, %48 : vector<256x64xf32>
    %50 = vector.extract_strided_slice %21 {offsets = [1, 0], sizes = [256, 64], strides = [1, 1]} : vector<290x64xbf16> to vector<256x64xbf16>
    %c64 = arith.constant 64 : index
    %c0_16 = arith.constant 0 : index
    %51 = vector.load %arg4[%c64, %c0_16] : memref<576x64xbf16, #tpu.memory_space<vmem>>, vector<64x64xbf16>
    %cst_17 = arith.constant dense<0.000000e+00> : vector<256x64xf32>
    %52 = tpu.matmul %50, %51, %cst_17 {dimension_numbers = #tpu.dot_dimension_numbers<[1], [0], [0], [1], [0, 0, 1, 1], [], []>} : vector<256x64xbf16>, vector<64x64xbf16>, vector<256x64xf32> -> vector<256x64xf32>
    %53 = arith.addf %49, %52 : vector<256x64xf32>
    %54 = vector.extract_strided_slice %21 {offsets = [2, 0], sizes = [256, 64], strides = [1, 1]} : vector<290x64xbf16> to vector<256x64xbf16>
    %c15_i32 = arith.constant 15 : i32
    %55 = vector.broadcast %c15_i32 : i32 to vector<256x1xi32>
    %56 = arith.cmpi slt, %38, %55 : vector<256x1xi32>
    %cst_18 = arith.constant 0.000000e+00 : bf16
    %57 = vector.shape_cast %56 : vector<256x1xi1> to vector<256x1xi1>
    %58 = vector.broadcast %57 : vector<256x1xi1> to vector<256x64xi1>
    %59 = vector.broadcast %cst_18 : bf16 to vector<256x64xbf16>
    %60 = arith.select %58, %54, %59 : vector<256x64xi1>, vector<256x64xbf16>
    %c128 = arith.constant 128 : index
    %c0_19 = arith.constant 0 : index
    %61 = vector.load %arg4[%c128, %c0_19] : memref<576x64xbf16, #tpu.memory_space<vmem>>, vector<64x64xbf16>
    %cst_20 = arith.constant dense<0.000000e+00> : vector<256x64xf32>
    %62 = tpu.matmul %60, %61, %cst_20 {dimension_numbers = #tpu.dot_dimension_numbers<[1], [0], [0], [1], [0, 0, 1, 1], [], []>} : vector<256x64xbf16>, vector<64x64xbf16>, vector<256x64xf32> -> vector<256x64xf32>
    %63 = arith.addf %53, %62 : vector<256x64xf32>
    %64 = vector.extract_strided_slice %21 {offsets = [16, 0], sizes = [256, 64], strides = [1, 1]} : vector<290x64xbf16> to vector<256x64xbf16>
    %c1_i32_21 = arith.constant 1 : i32
    %65 = vector.broadcast %c1_i32_21 : i32 to vector<256x1xi32>
    %66 = arith.cmpi sge, %38, %65 : vector<256x1xi32>
    %cst_22 = arith.constant 0.000000e+00 : bf16
    %67 = vector.shape_cast %66 : vector<256x1xi1> to vector<256x1xi1>
    %68 = vector.broadcast %67 : vector<256x1xi1> to vector<256x64xi1>
    %69 = vector.broadcast %cst_22 : bf16 to vector<256x64xbf16>
    %70 = arith.select %68, %64, %69 : vector<256x64xi1>, vector<256x64xbf16>
    %c192 = arith.constant 192 : index
    %c0_23 = arith.constant 0 : index
    %71 = vector.load %arg4[%c192, %c0_23] : memref<576x64xbf16, #tpu.memory_space<vmem>>, vector<64x64xbf16>
    %cst_24 = arith.constant dense<0.000000e+00> : vector<256x64xf32>
    %72 = tpu.matmul %70, %71, %cst_24 {dimension_numbers = #tpu.dot_dimension_numbers<[1], [0], [0], [1], [0, 0, 1, 1], [], []>} : vector<256x64xbf16>, vector<64x64xbf16>, vector<256x64xf32> -> vector<256x64xf32>
    %73 = arith.addf %63, %72 : vector<256x64xf32>
    %74 = vector.extract_strided_slice %21 {offsets = [17, 0], sizes = [256, 64], strides = [1, 1]} : vector<290x64xbf16> to vector<256x64xbf16>
    %c256 = arith.constant 256 : index
    %c0_25 = arith.constant 0 : index
    %75 = vector.load %arg4[%c256, %c0_25] : memref<576x64xbf16, #tpu.memory_space<vmem>>, vector<64x64xbf16>
    %cst_26 = arith.constant dense<0.000000e+00> : vector<256x64xf32>
    %76 = tpu.matmul %74, %75, %cst_26 {dimension_numbers = #tpu.dot_dimension_numbers<[1], [0], [0], [1], [0, 0, 1, 1], [], []>} : vector<256x64xbf16>, vector<64x64xbf16>, vector<256x64xf32> -> vector<256x64xf32>
    %77 = arith.addf %73, %76 : vector<256x64xf32>
    %78 = vector.extract_strided_slice %21 {offsets = [18, 0], sizes = [256, 64], strides = [1, 1]} : vector<290x64xbf16> to vector<256x64xbf16>
    %c15_i32_27 = arith.constant 15 : i32
    %79 = vector.broadcast %c15_i32_27 : i32 to vector<256x1xi32>
    %80 = arith.cmpi slt, %38, %79 : vector<256x1xi32>
    %cst_28 = arith.constant 0.000000e+00 : bf16
    %81 = vector.shape_cast %80 : vector<256x1xi1> to vector<256x1xi1>
    %82 = vector.broadcast %81 : vector<256x1xi1> to vector<256x64xi1>
    %83 = vector.broadcast %cst_28 : bf16 to vector<256x64xbf16>
    %84 = arith.select %82, %78, %83 : vector<256x64xi1>, vector<256x64xbf16>
    %c320 = arith.constant 320 : index
    %c0_29 = arith.constant 0 : index
    %85 = vector.load %arg4[%c320, %c0_29] : memref<576x64xbf16, #tpu.memory_space<vmem>>, vector<64x64xbf16>
    %cst_30 = arith.constant dense<0.000000e+00> : vector<256x64xf32>
    %86 = tpu.matmul %84, %85, %cst_30 {dimension_numbers = #tpu.dot_dimension_numbers<[1], [0], [0], [1], [0, 0, 1, 1], [], []>} : vector<256x64xbf16>, vector<64x64xbf16>, vector<256x64xf32> -> vector<256x64xf32>
    %87 = arith.addf %77, %86 : vector<256x64xf32>
    %88 = vector.extract_strided_slice %21 {offsets = [32, 0], sizes = [256, 64], strides = [1, 1]} : vector<290x64xbf16> to vector<256x64xbf16>
    %c1_i32_31 = arith.constant 1 : i32
    %89 = vector.broadcast %c1_i32_31 : i32 to vector<256x1xi32>
    %90 = arith.cmpi sge, %38, %89 : vector<256x1xi32>
    %cst_32 = arith.constant 0.000000e+00 : bf16
    %91 = vector.shape_cast %90 : vector<256x1xi1> to vector<256x1xi1>
    %92 = vector.broadcast %91 : vector<256x1xi1> to vector<256x64xi1>
    %93 = vector.broadcast %cst_32 : bf16 to vector<256x64xbf16>
    %94 = arith.select %92, %88, %93 : vector<256x64xi1>, vector<256x64xbf16>
    %c384 = arith.constant 384 : index
    %c0_33 = arith.constant 0 : index
    %95 = vector.load %arg4[%c384, %c0_33] : memref<576x64xbf16, #tpu.memory_space<vmem>>, vector<64x64xbf16>
    %cst_34 = arith.constant dense<0.000000e+00> : vector<256x64xf32>
    %96 = tpu.matmul %94, %95, %cst_34 {dimension_numbers = #tpu.dot_dimension_numbers<[1], [0], [0], [1], [0, 0, 1, 1], [], []>} : vector<256x64xbf16>, vector<64x64xbf16>, vector<256x64xf32> -> vector<256x64xf32>
    %97 = arith.addf %87, %96 : vector<256x64xf32>
    %98 = vector.extract_strided_slice %21 {offsets = [33, 0], sizes = [256, 64], strides = [1, 1]} : vector<290x64xbf16> to vector<256x64xbf16>
    %c448 = arith.constant 448 : index
    %c0_35 = arith.constant 0 : index
    %99 = vector.load %arg4[%c448, %c0_35] : memref<576x64xbf16, #tpu.memory_space<vmem>>, vector<64x64xbf16>
    %cst_36 = arith.constant dense<0.000000e+00> : vector<256x64xf32>
    %100 = tpu.matmul %98, %99, %cst_36 {dimension_numbers = #tpu.dot_dimension_numbers<[1], [0], [0], [1], [0, 0, 1, 1], [], []>} : vector<256x64xbf16>, vector<64x64xbf16>, vector<256x64xf32> -> vector<256x64xf32>
    %101 = arith.addf %97, %100 : vector<256x64xf32>
    %102 = vector.extract_strided_slice %21 {offsets = [34, 0], sizes = [256, 64], strides = [1, 1]} : vector<290x64xbf16> to vector<256x64xbf16>
    %c15_i32_37 = arith.constant 15 : i32
    %103 = vector.broadcast %c15_i32_37 : i32 to vector<256x1xi32>
    %104 = arith.cmpi slt, %38, %103 : vector<256x1xi32>
    %cst_38 = arith.constant 0.000000e+00 : bf16
    %105 = vector.shape_cast %104 : vector<256x1xi1> to vector<256x1xi1>
    %106 = vector.broadcast %105 : vector<256x1xi1> to vector<256x64xi1>
    %107 = vector.broadcast %cst_38 : bf16 to vector<256x64xbf16>
    %108 = arith.select %106, %102, %107 : vector<256x64xi1>, vector<256x64xbf16>
    %c512 = arith.constant 512 : index
    %c0_39 = arith.constant 0 : index
    %109 = vector.load %arg4[%c512, %c0_39] : memref<576x64xbf16, #tpu.memory_space<vmem>>, vector<64x64xbf16>
    %cst_40 = arith.constant dense<0.000000e+00> : vector<256x64xf32>
    %110 = tpu.matmul %108, %109, %cst_40 {dimension_numbers = #tpu.dot_dimension_numbers<[1], [0], [0], [1], [0, 0, 1, 1], [], []>} : vector<256x64xbf16>, vector<64x64xbf16>, vector<256x64xf32> -> vector<256x64xf32>
    %111 = arith.addf %101, %110 : vector<256x64xf32>
    %c0_41 = arith.constant 0 : index
    %c0_42 = arith.constant 0 : index
    %112 = vector.load %arg5[%c0_41, %c0_42] : memref<1x64xf32, #tpu.memory_space<vmem>>, vector<1x64xf32>
    %113 = vector.broadcast %112 : vector<1x64xf32> to vector<256x64xf32>
    %114 = arith.mulf %111, %113 : vector<256x64xf32>
    %c0_43 = arith.constant 0 : index
    %c0_44 = arith.constant 0 : index
    %115 = vector.load %arg6[%c0_43, %c0_44] : memref<1x64xf32, #tpu.memory_space<vmem>>, vector<1x64xf32>
    %116 = vector.broadcast %115 : vector<1x64xf32> to vector<256x64xf32>
    %117 = arith.addf %114, %116 : vector<256x64xf32>
    %118 = arith.truncf %117 : vector<256x64xf32> to vector<256x64xbf16>
    %c0_45 = arith.constant 0 : index
    %c0_46 = arith.constant 0 : index
    %c0_47 = arith.constant 0 : index
    %119 = vector.load %arg7[%c0_45, %c0_46, %c0_47] : memref<1x256x64xbf16, #tpu.memory_space<vmem>>, vector<1x256x64xbf16>
    %120 = vector.shape_cast %119 : vector<1x256x64xbf16> to vector<256x64xbf16>
    %121 = vector.shape_cast %118 : vector<256x64xbf16> to vector<1x256x64xbf16>
    tpu.vector_store %arg7[%c0_45, %c0_46, %c0_47], %121 {strides = array<i32>} : memref<1x256x64xbf16, #tpu.memory_space<vmem>>, vector<1x256x64xbf16>,
    return
  }
  func.func @transform_0(%arg0: i32) -> i32 {
    %c0_i32 = arith.constant 0 : i32
    %c0_i32_0 = arith.constant 0 : i32
    return %c0_i32 : i32
  }
  func.func @transform_1(%arg0: i32) -> (i32, i32, i32) {
    %c0_i32 = arith.constant 0 : i32
    %c0_i32_0 = arith.constant 0 : i32
    %c0_i32_1 = arith.constant 0 : i32
    return %arg0, %c0_i32, %c0_i32_0 : i32, i32, i32
  }
  func.func @transform_2(%arg0: i32) -> (i32, i32, i32) {
    %c0_i32 = arith.constant 0 : i32
    %c0_i32_0 = arith.constant 0 : i32
    %c0_i32_1 = arith.constant 0 : i32
    return %arg0, %c0_i32, %c0_i32_0 : i32, i32, i32
  }
  func.func @transform_3(%arg0: i32) -> (i32, i32) {
    %c0_i32 = arith.constant 0 : i32
    %c0_i32_0 = arith.constant 0 : i32
    %c0_i32_1 = arith.constant 0 : i32
    return %c0_i32, %c0_i32_0 : i32, i32
  }
  func.func @transform_4(%arg0: i32) -> (i32, i32) {
    %c0_i32 = arith.constant 0 : i32
    %c0_i32_0 = arith.constant 0 : i32
    %c0_i32_1 = arith.constant 0 : i32
    return %c0_i32, %c0_i32_0 : i32, i32
  }
  func.func @transform_5(%arg0: i32) -> (i32, i32) {
    %c0_i32 = arith.constant 0 : i32
    %c0_i32_0 = arith.constant 0 : i32
    %c0_i32_1 = arith.constant 0 : i32
    return %c0_i32, %c0_i32_0 : i32, i32
  }
  func.func @transform_6(%arg0: i32) -> (i32, i32, i32) {
    %c0_i32 = arith.constant 0 : i32
    %c0_i32_0 = arith.constant 0 : i32
    %c0_i32_1 = arith.constant 0 : i32
    return %arg0, %c0_i32, %c0_i32_0 : i32, i32, i32
  }
}

</mosaic_0001>

<bundles_post_ra>
// kernel: tpu_custom_call.1
= control target key start
LH: loop header
LB: loop body
LE: loop exit
PB: predicated region body
PF: predicated region fallthrough
CT: control target
= control target key end

     0   :  { %11 = vsyncpa [#allocation3], 0  ;;  %s6359_s21 = smov 0   ;;  %s8114_s0 = inlined_call_operand.vmem [shape: f32[2], index: 0, kind: input, shape index: {}]   ;;  %s8115_s1 = inlined_call_operand.vmem [shape: bf16[2,256,64], index: 1, kind: input, shape index: {}]   ;;  %s8116_s2 = inlined_call_operand.vmem [shape: bf16[2,256,64], index: 2, kind: input, shape index: {}]   ;;  %s8117_s3 = inlined_call_operand.vmem [shape: bf16[576,64], index: 3, kind: input, shape index: {}]   ;;  %s8118_s4 = inlined_call_operand.vmem [shape: f32[1,64], index: 4, kind: input, shape index: {}]   ;;  %s8119_s5 = inlined_call_operand.vmem [shape: f32[1,64], index: 5, kind: input, shape index: {}]   ;;  %s8120_s6 = inlined_call_operand.vmem [shape: bf16[2,256,64], index: 6, kind: output, shape index: {}]  }
   0x1 LB: > { %s6365_s22 = sadd.s32 4294967295, %s6319_s21   ;;  %p4816_p0 = scmp.ge.s32.totalorder %s6319_s21, 1  ;;  %s6319_s21 = sphi %s6359_s21, %s17_s21  }
   0x2   : > { %p184_p1 = scmp.lt.s32.totalorder %s6319_s21, 3  ;;  %s197_s25 = sshll.u32 %s8114_s0, 4  ;;  %s198_s25 = int_to_ptr.vmem [resolvable:$true] %s197_s25 }
   0x3   : > { %p6112_p3 = scmp.eq.s32.totalorder %s6365_s22, 0  ;;  %s6294_s27 = scalar_lea.vmem %s198_s25, 16 }
   0x4   : > { %p6372_p2 = pnand %p4816_p0, %p184_p1  ;;  %p6295_p6 = scmp.ne.s32.totalorder %s198_s25, %s6294_s27 }
   0x5   : > { %p6302_p10 = scmp.lt.s32.totalorder %s198_s25, %s198_s25  ;;  %p6303_p11 = scmp.lt.s32.totalorder %s6294_s27, %s6294_s27 }
   0x6   : > { %p6108_p4 = pneg %p6372_p2 }
   0x7   : > { %p6304_p12 = por %p6303_p11, %p6302_p10 }
   0x8   : > { %p6109_p5 = pnand %p6112_p3, %p6108_p4 }
   0xa   : > { %p6296_p7 = pneg %p6109_p5 }
   0xc   : > { %p6297_p8 = pnand %p6296_p7, %p6295_p6 }
   0xe   : > { %p6298_p9 = pneg %p6297_p8 }
  0x10   : > { %p6305_p13 = pnand %p6304_p12, %p6298_p9 }
  0x12   : > { %6308 = shalt.err (!%p6305_p13)
}
  0x13   : > { %s6321_s28 = smov [#allocation2]   ;;  %235 = sbr.rel (%p6372_p2) target bundleno = 653 (0x28d), region = 44 }
  0x14   : > { %6111 = dma.vmem_to_smem (!%p6109_p5), %s198_s25, 16, %s6321_s28, [#allocation3]  }
  0x1a   : > { %6314 = dma.done.wait (%p6112_p3), [#allocation3], 16  }
  0x1b   : > { %6316 = vsyncadd (%p6112_p3), [#allocation3], 4294967280 }
  0x1c   : > { %241 = sfence }
  0x1d   : > { %v6125_v0 = vld [vmem:[%s8117_s3 + $0x20] sm:$0xff]   ;;  %p271_p0 = scmp.lt.s32.totalorder %s6365_s22, 1  ;;  %v6127_v2 = vld [vmem:[%s8117_s3 + $0x28] sm:$0xff]   ;;  %v906_v4 = vlaneseq  ;;  %v6129_v5 = vld [vmem:[%s8117_s3 + $0x30] sm:$0xff]   ;;  %s6429_s29 = sld [smem:[#allocation2]]  ;;  %v8121_v15 = vmov 0  }
  0x1e   : > { %v6126_v1 = vld [vmem:[%s8117_s3 + $0x80] sm:$0xff]   ;;  %5480 = vmatprep.subr.bf16.mxu1 %v6125_v0  ;;  %v6128_v3 = vld [vmem:[%s8117_s3 + $0x88] sm:$0xff]   ;;  %v6130_v6 = vld [vmem:[%s8117_s3 + $0x90] sm:$0xff]   ;;  %s4827_s30 = sld [smem:[#allocation2 + $0x1]]  ;;  %v6436_v16 = vrot.slane %v8121_v15, 1  ;;  %vm902_vm1 = vcmask 1040384  }
  0x1f   : > { %s8343_s22 = smov (!%p271_p0, %s6365_s22), 1  ;;  %5640 = vmatprep.subr.bf16.mxu0 %v6126_v1  ;;  %5481 = vmatpush3.bf16.msra.mxu1 %v6125_v0  ;;  %v6131_v7 = vld [vmem:[%s8117_s3 + $0x38] sm:$0xff]   ;;  %v6427_v9 = vshrl.u32 %v906_v4, 7  ;;  %v6441_v24 = vld [vmem:[%s8117_s3] sm:$0xff]   ;;  %vm757_vm0 = vsmask.f32 256 }
  0x20   : > { %5641 = vmatpush3.bf16.msra.mxu0 %v6126_v1  ;;  %5482 = vmatprep.subr.bf16.mxu1 %v6127_v2  ;;  %s6404_s15 = sshll.u32 %s8343_s22, 7  ;;  %v6132_v8 = vld [vmem:[%s8117_s3 + $0x98] sm:$0xff]   ;;  %v6450_v27 = vld [vmem:[%s8117_s3 + $0xa0] sm:$0xff]   ;;  %vm8146_vm2 = vsmask.f32 7424  ;;  %vm1727_vm3 = vcmask 523264   ;;  %vm6587_vm4 = vmand %vm902_vm1, %vm757_vm0 }
  0x21   : > { %5642 = vmatprep.subr.bf16.mxu0 %v6128_v3  ;;  %s6413_s20 = scalar_lea.vmem %s8115_s1, %s6404_s15  ;;  %s6422_s26 = scalar_lea.vmem %s8116_s2, %s6404_s15  ;;  %v6445_v26 = vadd.s32 8, %v6427_v9  ;;  %v6455_v32 = vadd.s32 24, %v6427_v9  ;;  %v6458_v33 = vadd.s32 40, %v6427_v9  ;;  %vm6323_vm5 = vmmov 1  }
  0x22   : > { %v5143_v10 = vld [vmem:[%s6413_s20] sm:$0xff]   ;;  %v5270_v11 = vld [vmem:[%s6413_s20 + $0x8] sm:$0xff]   ;;  %v5271_v25 = vld [vmem:[%s6413_s20 + $0x10] sm:$0xff]   ;;  %vm8164_vm15 = vcmask 1046528  }
  0x23   : > { %5483 = vmatpush3.bf16.msra.mxu1 %v6127_v2  ;;  %v5207_v12 = vld [vmem:[%s6422_s26] sm:$0xff]   ;;  %v5285_v13 = vld [vmem:[%s6422_s26 + $0x8] sm:$0xff]   ;;  %v5144_v14 = vunpack.c.l.bf16 %v5143_v10  ;;  %v5145_v17 = vunpack.c.h.bf16 %v5143_v10  ;;  %v5148_v18 = vunpack.c.l.bf16 %v5270_v11  ;;  %v5149_v19 = vunpack.c.h.bf16 %v5270_v11  ;;  %v5286_v30 = vld [vmem:[%s6422_s26 + $0x10] sm:$0xff]  }
  0x24   : > { %5643 = vmatpush3.bf16.msra.mxu0 %v6128_v3  ;;  %5484 = vmatprep.subr.bf16.mxu1 %v6129_v5  ;;  %v5208_v20 = vunpack.c.l.bf16 %v5207_v12  ;;  %v5209_v21 = vunpack.c.h.bf16 %v5207_v12  ;;  %v5212_v22 = vunpack.c.l.bf16 %v5285_v13  ;;  %v5213_v23 = vunpack.c.h.bf16 %v5285_v13  ;;  %v5272_v31 = vld [vmem:[%s6413_s20 + $0x18] sm:$0xff]   ;;  %v5273_v59 = vld [vmem:[%s6413_s20 + $0x20] sm:$0xff]   ;;  %v5274_v12 = vld [vmem:[%s6413_s20 + $0x28] sm:$0xff]  }
  0x25   : > { %5644 = vmatprep.subr.bf16.mxu0 %v6130_v6  ;;  %v5152_v28 = vunpack.c.l.bf16 %v5271_v25  ;;  %v5153_v29 = vunpack.c.h.bf16 %v5271_v25  ;;  %v6461_v34 = vstv %s6429_s29  ;;  %v6463_v35 = vstv %s4827_s30  ;;  %v5287_v50 = vld [vmem:[%s6422_s26 + $0x18] sm:$0xff]   ;;  %v5288_v60 = vld [vmem:[%s6422_s26 + $0x20] sm:$0xff]   ;;  %vm6664_vm6 = vmpackc.low %vm6323_vm5, %vm6323_vm5 }
  0x26   : > { %v5216_v36 = vunpack.c.l.bf16 %v5286_v30  ;;  %v5217_v37 = vunpack.c.h.bf16 %v5286_v30  ;;  %v355_v38 = vmul.f32 %v5144_v14, %v6461_v34  ;;  %v356_v39 = vmul.f32 %v5145_v17, %v6461_v34 }
  0x27   : > { %5485 = vmatpush3.bf16.msra.mxu1 %v6129_v5  ;;  %v357_v40 = vmul.f32 %v5148_v18, %v6461_v34  ;;  %v358_v41 = vmul.f32 %v5149_v19, %v6461_v34  ;;  %v453_v42 = vmul.f32 %v5208_v20, %v6463_v35  ;;  %v454_v43 = vmul.f32 %v5209_v21, %v6463_v35  ;;  %v5289_v21 = vld [vmem:[%s6422_s26 + $0x28] sm:$0xff]  }
  0x28   : > { %5645 = vmatpush3.bf16.msra.mxu0 %v6130_v6  ;;  %5486 = vmatprep.subr.bf16.mxu1 %v6131_v7  ;;  %v455_v44 = vmul.f32 %v5212_v22, %v6463_v35  ;;  %v456_v45 = vmul.f32 %v5213_v23, %v6463_v35  ;;  %v359_v46 = vmul.f32 %v5152_v28, %v6461_v34  ;;  %v5156_v49 = vunpack.c.l.bf16 %v5272_v31 }
  0x29   : > { %5646 = vmatprep.subr.bf16.mxu0 %v6132_v8  ;;  %v360_v47 = vmul.f32 %v5153_v29, %v6461_v34  ;;  %v457_v48 = vmul.f32 %v5216_v36, %v6463_v35  ;;  %v6479_v51 = vadd.f32 %v453_v42, %v355_v38  ;;  %v6481_v52 = vadd.f32 %v454_v43, %v356_v39  ;;  %v5290_v39 = vld [vmem:[%s6422_s26 + $0x30] sm:$0xff]  }
  0x2a   : > { %v6483_v53 = vadd.f32 %v455_v44, %v357_v40  ;;  %v6485_v54 = vadd.f32 %v456_v45, %v358_v41  ;;  %v458_v55 = vmul.f32 %v5217_v37, %v6463_v35  ;;  %v5157_v57 = vunpack.c.h.bf16 %v5272_v31  ;;  %v5275_v31 = vld [vmem:[%s6413_s20 + $0x30] sm:$0xff]  }
  0x2b   : > { %5487 = vmatpush3.bf16.msra.mxu1 %v6131_v7  ;;  %v6488_v56 = vadd.f32 %v457_v48, %v359_v46  ;;  %v361_v58 = vmul.f32 %v5156_v49, %v6461_v34  ;;  %v4828_v61 = vmul.f32 -1.442695, %v6479_v51  ;;  %v4829_v62 = vmul.f32 -1.442695, %v6481_v52 }
  0x2c   : > { %5647 = vmatpush3.bf16.msra.mxu0 %v6132_v8  ;;  %5520 = vmatprep.subr.bf16.mxu1 %v6441_v24  ;;  %v4830_v63 = vmul.f32 -1.442695, %v6483_v53  ;;  %v5220_v0 = vunpack.c.l.bf16 %v5287_v50  ;;  %v4831_v1 = vmul.f32 -1.442695, %v6485_v54  ;;  %v6497_v2 = vadd.f32 %v458_v55, %v360_v47 }
  0x2d   : > { %5680 = vmatprep.subr.bf16.mxu0 %v6450_v27  ;;  %v4832_v3 = vmul.f32 -1.442695, %v6488_v56  ;;  %v362_v4 = vmul.f32 %v5157_v57, %v6461_v34  ;;  %6161 = vpow2.f32 %v4828_v61  ;;  %v5221_v5 = vunpack.c.h.bf16 %v5287_v50  ;;  %v5276_v50 = vld [vmem:[%s6413_s20 + $0x38] sm:$0xff]  }
  0x2e   : > { %v459_v6 = vmul.f32 %v5220_v0, %v6463_v35  ;;  %v5160_v7 = vunpack.c.l.bf16 %v5273_v59  ;;  %6163 = vpow2.f32 %v4829_v62  ;;  %v4833_v8 = vmul.f32 -1.442695, %v6497_v2 }
  0x2f   : > { %v5161_v10 = vunpack.c.h.bf16 %v5273_v59  ;;  %v5224_v11 = vunpack.c.l.bf16 %v5288_v60  ;;  %6165 = vpow2.f32 %v4830_v63  ;;  %v460_v13 = vmul.f32 %v5221_v5, %v6463_v35 }
  0x30   : > { %v6505_v14 = vadd.f32 %v459_v6, %v361_v58  ;;  %v363_v17 = vmul.f32 %v5160_v7, %v6461_v34  ;;  %6167 = vpow2.f32 %v4831_v1  ;;  %v5225_v19 = vunpack.c.h.bf16 %v5288_v60 }
  0x31   : > { %v364_v18 = vmul.f32 %v5161_v10, %v6461_v34  ;;  %v461_v20 = vmul.f32 %v5224_v11, %v6463_v35  ;;  %6169 = vpow2.f32 %v4832_v3  ;;  %v6511_v22 = vadd.f32 %v460_v13, %v362_v4 }
  0x32   : > { %v4834_v23 = vmul.f32 -1.442695, %v6505_v14  ;;  %v5164_v25 = vunpack.c.l.bf16 %v5274_v12  ;;  %6171 = vpow2.f32 %v4833_v8  ;;  %v462_v28 = vmul.f32 %v5225_v19, %v6463_v35 }
  0x33   : > { %v6515_v29 = vadd.f32 %v461_v20, %v363_v17  ;;  %v5165_v30 = vunpack.c.h.bf16 %v5274_v12  ;;  %v4835_v36 = vmul.f32 -1.442695, %v6511_v22  ;;  %v5228_v38 = vunpack.c.l.bf16 %v5289_v21  ;;  %v5291_v12 = vld [vmem:[%s6422_s26 + $0x38] sm:$0xff]   ;;  %v5277_v20 = vld [vmem:[%s6413_s20 + $0x40] sm:$0xff]  }
  0x34   : > { %6173 = vpow2.f32 %v4834_v23  ;;  %v365_v37 = vmul.f32 %v5164_v25, %v6461_v34  ;;  %v6521_v40 = vadd.f32 %v462_v28, %v364_v18  ;;  %v5229_v43 = vunpack.c.h.bf16 %v5289_v21 }
  0x35   : > { %v4836_v41 = vmul.f32 -1.442695, %v6515_v29  ;;  %v366_v42 = vmul.f32 %v5165_v30, %v6461_v34  ;;  %6175 = vpow2.f32 %v4835_v36  ;;  %v463_v44 = vmul.f32 %v5228_v38, %v6463_v35  ;;  %v5292_v30 = vld [vmem:[%s6422_s26 + $0x40] sm:$0xff]  }
  0x36   : > { %v5168_v45 = vunpack.c.l.bf16 %v5275_v31  ;;  %v5169_v46 = vunpack.c.h.bf16 %v5275_v31  ;;  %v4837_v47 = vmul.f32 -1.442695, %v6521_v40  ;;  %v464_v48 = vmul.f32 %v5229_v43, %v6463_v35 }
  0x37   : > { %6177 = vpow2.f32 %v4836_v41  ;;  %v5232_v49 = vunpack.c.l.bf16 %v5290_v39  ;;  %v6162_v55 = vpop.eup %6161  ;;  %v6529_v57 = vadd.f32 %v463_v44, %v365_v37  ;;  %v5233_v60 = vunpack.c.h.bf16 %v5290_v39 }
  0x38   : > { %v367_v58 = vmul.f32 %v5168_v45, %v6461_v34  ;;  %v368_v59 = vmul.f32 %v5169_v46, %v6461_v34  ;;  %v6164_v61 = vpop.eup %6163  ;;  %v613_v62 = vadd.f32 1.0, %v6162_v55  ;;  %6179 = vpow2.f32 %v4837_v47  ;;  %v5278_v55 = vld [vmem:[%s6413_s20 + $0x48] sm:$0xff]  }
  0x39   : > { %v6533_v63 = vadd.f32 %v464_v48, %v366_v42  ;;  %v465_v0 = vmul.f32 %v5232_v49, %v6463_v35  ;;  %v6166_v1 = vpop.eup %6165  ;;  %v614_v3 = vadd.f32 1.0, %v6164_v61  ;;  %v4838_v4 = vmul.f32 -1.442695, %v6529_v57 }
  0x3a   : > { %v466_v5 = vmul.f32 %v5233_v60, %v6463_v35  ;;  %v5172_v6 = vunpack.c.l.bf16 %v5276_v50  ;;  %v6168_v7 = vpop.eup %6167  ;;  %v615_v8 = vadd.f32 1.0, %v6166_v1  ;;  %6181 = vrcp.f32 %v613_v62 }
  0x3b   : > { %v4839_v10 = vmul.f32 -1.442695, %v6533_v63  ;;  %v6539_v11 = vadd.f32 %v465_v0, %v367_v58  ;;  %v6170_v13 = vpop.eup %6169  ;;  %v616_v17 = vadd.f32 1.0, %v6168_v7  ;;  %6183 = vrcp.f32 %v614_v3 }
  0x3c   : > { %v6542_v18 = vadd.f32 %v466_v5, %v368_v59  ;;  %v5173_v19 = vunpack.c.h.bf16 %v5276_v50  ;;  %v6172_v21 = vpop.eup %6171  ;;  %6185 = vrcp.f32 %v615_v8  ;;  %v617_v23 = vadd.f32 1.0, %v6170_v13  ;;  %v5293_v13 = vld [vmem:[%s6422_s26 + $0x48] sm:$0xff]  }
  0x3d   : > { %v4840_v25 = vmul.f32 -1.442695, %v6539_v11  ;;  %v369_v28 = vmul.f32 %v5172_v6, %v6461_v34  ;;  %6187 = vrcp.f32 %v616_v17  ;;  %v618_v36 = vadd.f32 1.0, %v6172_v21 }
  0x3e   : > { %v6174_v31 = vpop.eup %6173  ;;  %v4841_v37 = vmul.f32 -1.442695, %v6542_v18  ;;  %v370_v38 = vmul.f32 %v5173_v19, %v6461_v34  ;;  %6189 = vrcp.f32 %v617_v23  ;;  %v5236_v41 = vunpack.c.l.bf16 %v5291_v12 }
  0x3f   : > { %v619_v39 = vadd.f32 1.0, %v6174_v31  ;;  %v5237_v42 = vunpack.c.h.bf16 %v5291_v12  ;;  %v6176_v43 = vpop.eup %6175  ;;  %6191 = vrcp.f32 %v618_v36  ;;  %v5176_v44 = vunpack.c.l.bf16 %v5277_v20 }
  0x40   : > { %v5177_v45 = vunpack.c.h.bf16 %v5277_v20  ;;  %v5240_v46 = vunpack.c.l.bf16 %v5292_v30  ;;  %v620_v48 = vadd.f32 1.0, %v6176_v43  ;;  %v467_v49 = vmul.f32 %v5236_v41, %v6463_v35 }
  0x41   : > { %v6178_v47 = vpop.eup %6177  ;;  %6193 = vrcp.f32 %v619_v39  ;;  %v468_v50 = vmul.f32 %v5237_v42, %v6463_v35  ;;  %v371_v59 = vmul.f32 %v5176_v44, %v6461_v34  ;;  %v5241_v1 = vunpack.c.h.bf16 %v5292_v30 }
  0x42   : > { %v621_v58 = vadd.f32 1.0, %v6178_v47  ;;  %6195 = vpow2.f32 %v4838_v4  ;;  %v372_v60 = vmul.f32 %v5177_v45, %v6461_v34  ;;  %v6180_v61 = vpop.eup %6179  ;;  %v6555_v62 = vadd.f32 %v467_v49, %v369_v28 }
  0x43   : > { %6197 = vrcp.f32 %v620_v48  ;;  %v6557_v0 = vadd.f32 %v468_v50, %v370_v38  ;;  %v622_v3 = vadd.f32 1.0, %v6180_v61  ;;  %v469_v5 = vmul.f32 %v5240_v46, %v6463_v35 }
  0x44   : > { %6199 = vrcp.f32 %v621_v58  ;;  %v5180_v6 = vunpack.c.l.bf16 %v5278_v55  ;;  %v6182_v4 = vpop.eup %6181  ;;  %v4842_v7 = vmul.f32 -1.442695, %v6555_v62  ;;  %v470_v12 = vmul.f32 %v5241_v1, %v6463_v35 }
  0x45   : > { %6201 = vpow2.f32 %v4839_v10  ;;  %v4843_v8 = vmul.f32 -1.442695, %v6557_v0  ;;  %v6184_v17 = vpop.eup %6183  ;;  %v709_v19 = vmul.f32 %v6182_v4, %v6479_v51  ;;  %v6565_v20 = vadd.f32 %v469_v5, %v371_v59 }
  0x46   : > { %6203 = vrcp.f32 %v622_v3  ;;  %v5181_v21 = vunpack.c.h.bf16 %v5278_v55  ;;  %v6186_v23 = vpop.eup %6185  ;;  %v710_v28 = vmul.f32 %v6184_v17, %v6481_v52  ;;  %v6568_v30 = vadd.f32 %v470_v12, %v372_v60 }
  0x47   : > { %6205 = vpow2.f32 %v4840_v25  ;;  %v373_v10 = vmul.f32 %v5180_v6, %v6461_v34  ;;  %v6188_v31 = vpop.eup %6187  ;;  %v711_v36 = vmul.f32 %v6186_v23, %v6483_v53  ;;  %v4844_v38 = vmul.f32 -1.442695, %v6565_v20 }
  0x48   : > { %6207 = vpow2.f32 %v4841_v37  ;;  %v6574_v51 = vmul.f32 %v5181_v21, %v6461_v34  ;;  %v6190_v39 = vpop.eup %6189  ;;  %v712_v41 = vmul.f32 %v6188_v31, %v6485_v54  ;;  %v741_v42 = vpack.c.bf16 %v710_v28, %v709_v19 }
  0x49   : > { %6209 = vpow2.f32 %v4842_v7  ;;  %v4845_v52 = vmul.f32 -1.442695, %v6568_v30  ;;  %v6192_v25 = vpop.eup %6191  ;;  %v713_v43 = vmul.f32 %v6190_v39, %v6488_v56  ;;  %v5244_v44 = vunpack.c.l.bf16 %v5293_v13 }
  0x4a   : > { %6211 = vpow2.f32 %v4843_v8  ;;  %v5245_v45 = vunpack.c.h.bf16 %v5293_v13  ;;  %v742_v37 = vpack.c.bf16 %v712_v41, %v711_v36  ;;  %v759_v46 = vshrl.u32 %v741_v42, 16 }
  0x4b   : > { %v6194_v53 = vpop.eup %6193  ;;  %v762_v47 = vshll.u32 %v741_v42, 16  ;;  %v714_v48 = vmul.f32 %v6192_v25, %v6497_v2  ;;  %6213 = vpow2.f32 %v4844_v38  ;;  %v471_v50 = vmul.f32 %v5244_v44, %v6463_v35 }
  0x4c   : > { %v6196_v49 = vpop.eup %6195  ;;  %v715_v54 = vmul.f32 %v6194_v53, %v6505_v14  ;;  %v6583_v55 = vmul.f32 %v5245_v45, %v6463_v35  ;;  %v761_v58 = vrot.slane %v759_v46, 7  ;;  %v766_v59 = vshrl.u32 %v742_v37, 16 }
  0x4d   : > { %v6198_v56 = vpop.eup %6197  ;;  %v769_v60 = vshll.u32 %v742_v37, 16  ;;  %v743_v61 = vpack.c.bf16 %v714_v48, %v713_v43  ;;  %v623_v3 = vadd.f32 1.0, %v6196_v49  ;;  %6215 = vpow2.f32 %v4845_v52 }
  0x4e   : > { %v6200_v1 = vpop.eup %6199  ;;  %v716_v14 = vmul.f32 %v6198_v56, %v6511_v22  ;;  %v6592_v5 = vadd.f32 %v471_v50, %v373_v10  ;;  %v764_v4 = vor.u32 %v762_v47, %v761_v58  ;;  %v768_v7 = vrot.slane %v766_v59, 7 }
  0x4f   : > { %v6202_v6 = vpop.eup %6201  ;;  %v774_v8 = vshrl.u32 %v743_v61, 16  ;;  %v777_v12 = vshll.u32 %v743_v61, 16  ;;  %v717_v19 = vmul.f32 %v6200_v1, %v6515_v29  ;;  %6217 = vrcp.f32 %v623_v3 }
  0x50   : > { %v6204_v13 = vpop.eup %6203  ;;  %v744_v17 = vpack.c.bf16 %v716_v14, %v715_v54  ;;  %v624_v21 = vadd.f32 1.0, %v6202_v6  ;;  %v771_v28 = vor.u32 %v769_v60, %v768_v7  ;;  %v6597_v22 = vsel %vm6587_vm4, 0, %v764_v4 }
  0x51   : > { %v6206_v23 = vpop.eup %6205  ;;  %v776_v31 = vrot.slane %v774_v8, 7  ;;  %v718_v10 = vmul.f32 %v6204_v13, %v6521_v40  ;;  %v1579_v38 = vshll.u32 %v6597_v22, 16  ;;  %v1583_v39 = vshrl.u32 %v6597_v22, 16  ;;  %v6136_v8 = vld [vmem:[%s8117_s3 + $0x8] sm:$0xff]  }
  0x52   : > { %v6208_v36 = vpop.eup %6207  ;;  %v782_v41 = vshrl.u32 %v744_v17, 16  ;;  %v785_v42 = vshll.u32 %v744_v17, 16  ;;  %v6603_v29 = vsel %vm757_vm0, %v761_v58, %v771_v28  ;;  %6219 = vrcp.f32 %v624_v21  ;;  %v6135_v13 = vld [vmem:[%s8117_s3 + $0xa8] sm:$0xff]  }
  0x53   : > { %v6210_v52 = vpop.eup %6209  ;;  %v779_v25 = vor.u32 %v777_v12, %v776_v31  ;;  %v745_v43 = vpack.c.bf16 %v718_v10, %v717_v19  ;;  %v1581_v45 = vrot.slane %v1579_v38, 1  ;;  %v1587_v53 = vshll.u32 %v6603_v29, 16 }
  0x54   : > { %v6212_v44 = vpop.eup %6211  ;;  %v1591_v40 = vshrl.u32 %v6603_v29, 16  ;;  %v784_v37 = vrot.slane %v782_v41, 7  ;;  %v625_v49 = vadd.f32 1.0, %v6206_v23  ;;  %v626_v14 = vadd.f32 1.0, %v6208_v36 }
  0x55   : > { %v6608_v46 = vsel %vm757_vm0, %v768_v7, %v779_v25  ;;  %v790_v47 = vshrl.u32 %v745_v43, 16  ;;  %v793_v48 = vshll.u32 %v745_v43, 16  ;;  %v6214_v54 = vpop.eup %6213  ;;  %v1582_v50 = vsel %vm8146_vm2, %v6436_v16, %v1581_v45 }
  0x56   : > { %v1585_v56 = vor.u32 %v1583_v39, %v1581_v45  ;;  %v1589_v58 = vrot.slane %v1587_v53, 1  ;;  %v1595_v59 = vshll.u32 %v6608_v46, 16  ;;  %5488 = vmatprep.mubr.msk.bf16.mxu1 %vm1727_vm3, %v1582_v50  ;;  %v787_v60 = vor.u32 %v785_v42, %v784_v37 }
  0x57   : > { %v1599_v61 = vshrl.u32 %v6608_v46, 16  ;;  %v6615_v1 = vrot.slane %v790_v47, 7  ;;  %v6216_v3 = vpop.eup %6215  ;;  %6221 = vrcp.f32 %v625_v49  ;;  %v627_v19 = vadd.f32 1.0, %v6210_v52 }
  0x58   : > { %v1590_v6 = vsel %vm8146_vm2, %v1585_v56, %v1589_v58  ;;  %v1593_v4 = vor.u32 %v1591_v40, %v1589_v58  ;;  %v1597_v7 = vrot.slane %v1595_v59, 1  ;;  %v6624_v12 = vsel %vm757_vm0, %v776_v31, %v787_v60  ;;  %v5279_v58 = vld [vmem:[%s6413_s20 + $0x50] sm:$0xff]  }
  0x59   : > { %5489 = vmatmul.mubr.msk.bf16.vlgmr.msra.gmra.mrb[0].mxu1 %vm1727_vm3, %v1590_v6  ;;  %5648 = vmatprep.mubr.msk.bf16.mxu0 %vm1727_vm3, %v1590_v6  ;;  %v795_v17 = vor.u32 %v793_v48, %v6615_v1  ;;  %6223 = vrcp.f32 %v626_v14  ;;  %v6218_v21 = vpop.eup %6217  ;;  %v1603_v10 = vshll.u32 %v6624_v12, 16  ;;  %v1607_v31 = vshrl.u32 %v6624_v12, 16 }
  0x5a   : > { %5521 = vmatpush3.bf16.msra.mxu1 %v6441_v24  ;;  %v6632_v23 = vsel %vm8146_vm2, %v1593_v4, %v1597_v7  ;;  %v1601_v28 = vor.u32 %v1599_v61, %v1597_v7  ;;  %v628_v38 = vadd.f32 1.0, %v6212_v44  ;;  %6225 = vrcp.f32 %v627_v19  ;;  %v6139_v24 = vld [vmem:[%s8117_s3 + $0x10] sm:$0xff]  }
  0x5b   : > { %5649 = vmatmul.mubr.msk.bf16.vlgmr.msra.gmra.mrb[0].mxu0 %vm1727_vm3, %v6632_v23  ;;  %5492 = vmatprep.mubr.msk.bf16.mxu1 %vm1727_vm3, %v6632_v23  ;;  %v6641_v36 = vsel %vm757_vm0, %v784_v37, %v795_v17  ;;  %v6647_v39 = vadd.s32 56, %v6427_v9  ;;  %v1605_v41 = vrot.slane %v1603_v10, 1  ;;  %v719_v52 = vmul.f32 %v6218_v21, %v6529_v57  ;;  %v6137_v44 = vld [vmem:[%s8117_s3 + $0xb0] sm:$0xff]   ;;  %v6143_v17 = vld [vmem:[%s8117_s3 + $0x40] sm:$0xff]  }
  0x5c   : > { %5681 = vmatpush3.bf16.msra.mxu0 %v6450_v27  ;;  %v1611_v42 = vshll.u32 %v6641_v36, 16  ;;  %5522 = vmatprep.subr.bf16.mxu1 %v6136_v8  ;;  %v629_v25 = vadd.f32 1.0, %v6214_v54  ;;  %v6220_v43 = vpop.eup %6219  ;;  %6227 = vrcp.f32 %v628_v38  ;;  %v630_v45 = vadd.f32 1.0, %v6216_v3 }
  0x5d   : > { %5682 = vmatprep.subr.bf16.mxu0 %v6135_v13  ;;  %v6657_v53 = vadd.f32 %v6583_v55, %v6574_v51  ;;  %v4846_v27 = vmul.f32 -1.442695, %v6592_v5  ;;  %v6661_v40 = vsel %vm8146_vm2, %v1601_v28, %v1605_v41  ;;  %v1609_v57 = vor.u32 %v1607_v31, %v1605_v41  ;;  %v6712_v28 = vld [vmem:[%s6422_s26 + $0x50] sm:$0xff]  }
  0x5e   : > { %v1613_v37 = vrot.slane %v1611_v42, 1  ;;  %v720_v47 = vmul.f32 %v6220_v43, %v6533_v63  ;;  %5523 = vmatpush3.bf16.msra.mxu1 %v6136_v8  ;;  %5652 = vmatprep.mubr.msk.bf16.mxu0 %vm1727_vm3, %v6661_v40  ;;  %6229 = vrcp.f32 %v629_v25  ;;  %v950_v55 = vand.u32 15, %v6445_v26  ;;  %v6141_v63 = vld [vmem:[%s8117_s3 + $0x18] sm:$0xff]  }
  0x5f   : > { %v4847_v51 = vmul.f32 -1.442695, %v6657_v53  ;;  %5524 = vmatprep.subr.bf16.mxu1 %v6139_v24  ;;  %v964_v49 = vand.u32 15, %v6455_v32  ;;  %v1615_v56 = vshrl.u32 %v6641_v36, 16  ;;  %6231 = vrcp.f32 %v630_v45  ;;  %v6138_v26 = vld [vmem:[%s8117_s3 + $0xb8] sm:$0xff]  }
  0x60   : > { %v6677_v54 = vsel %vm8146_vm2, %v1609_v57, %v1613_v37  ;;  %5683 = vmatpush3.bf16.msra.mxu0 %v6135_v13  ;;  %v746_v50 = vpack.c.bf16 %v720_v47, %v719_v52  ;;  %6233 = vpow2.f32 %v4846_v27  ;;  %v6689_v32 = vsel %vm6664_vm6, 65537, %v8121_v15 }
  0x61   : > { %5493 = vmatmul.mubr.msk.bf16.gmra.mrb[4].mxu1 %vm1727_vm3, %v6661_v40  ;;  %5684 = vmatprep.subr.bf16.mxu0 %v6137_v44  ;;  %vm2170_vm7 = vcmp.lt.s32.totalorder %v950_v55, 15  ;;  %vm6691_vm8 = vcmp.lt.s32.totalorder %v964_v49, 15  ;;  %v6222_v60 = vpop.eup %6221  ;;  %6235 = vpow2.f32 %v4847_v51  ;;  %v978_v3 = vand.u32 15, %v6458_v33 }
  0x62   : > { %5496 = vmatprep.mubr.msk.bf16.mxu1 %vm1727_vm3, %v6677_v54  ;;  %v798_v61 = vshrl.u32 %v746_v50, 16  ;;  %v801_v14 = vshll.u32 %v746_v50, 16  ;;  %vm2266_vm9 = vmpackc.low %vm2170_vm7, %vm2170_vm7  ;;  %5525 = vmatpush3.bf16.msra.mxu1 %v6139_v24  ;;  %v721_v4 = vmul.f32 %v6222_v60, %v6539_v11  ;;  %v5184_v8 = vunpack.c.l.bf16 %v5279_v58  ;;  %v6718_v24 = vld [vmem:[%s8117_s3 + $0xc0] sm:$0xff]  }
  0x63   : > { %v6224_v6 = vpop.eup %6223  ;;  %5653 = vmatmul.mubr.msk.bf16.gmra.mrb[4].mxu0 %vm1727_vm3, %v6677_v54  ;;  %vm2268_vm10 = vmpackc.low %vm6691_vm8, %vm6691_vm8  ;;  %v2298_v7 = vsel %vm2266_vm9, 65537, %v8121_v15  ;;  %v5185_v13 = vunpack.c.h.bf16 %v5279_v58  ;;  %5526 = vmatprep.subr.bf16.mxu1 %v6141_v63  ;;  %v1617_v31 = vor.u32 %v1615_v56, %v1613_v37  ;;  %vm2174_vm11 = vcmp.lt.s32.totalorder %v978_v3, 15 }
  0x64   : > { %v800_v33 = vrot.slane %v798_v61, 7  ;;  %v722_v19 = vmul.f32 %v6224_v6, %v6542_v18  ;;  %5685 = vmatpush3.bf16.msra.mxu0 %v6137_v44  ;;  %v2300_v21 = vsel %vm2268_vm10, 65537, %v8121_v15  ;;  %v4914_v11 = vcombine.low %v6689_v32, %v2298_v7  ;;  %v6226_v10 = vpop.eup %6225  ;;  %vm2270_vm12 = vmpackc.low %vm2174_vm11, %vm2174_vm11 }
  0x65   : > { %5686 = vmatprep.subr.bf16.mxu0 %v6138_v26  ;;  %v4915_v38 = vcombine.low %v6689_v32, %v2300_v21  ;;  %v6721_v18 = vmul.f32 %v5184_v8, %v6461_v34  ;;  %v723_v52 = vmul.f32 %v6226_v10, %v6555_v62  ;;  %v2302_v45 = vsel %vm2270_vm12, 65537, %v8121_v15 }
  0x66   : > { %v803_v41 = vor.u32 %v801_v14, %v800_v33  ;;  %v747_v42 = vpack.c.bf16 %v722_v19, %v721_v4  ;;  %v6724_v25 = vrot.slane %v4914_v11, 7  ;;  %5527 = vmatpush3.bf16.msra.mxu1 %v6141_v63  ;;  %v6228_v43 = vpop.eup %6227  ;;  %v6730_v27 = vmul.f32 %v5185_v13, %v6461_v34 }
  0x67   : > { %v6726_v44 = vrot.slane %v4915_v38, 7  ;;  %v5248_v57 = vunpack.c.l.bf16 %v6712_v28  ;;  %5560 = vmatprep.subr.bf16.mxu1 %v6143_v17  ;;  %v724_v48 = vmul.f32 %v6228_v43, %v6557_v0  ;;  %v5249_v61 = vunpack.c.h.bf16 %v6712_v28  ;;  %v5280_v38 = vld [vmem:[%s6413_s20 + $0x58] sm:$0xff]  }
  0x68   : > { %8179 = vst [vmem:[#allocation5_spill] sm:$0xff] %v6724_v25  ;;  %v6735_v37 = vsel %vm757_vm0, %v6615_v1, %v803_v41  ;;  %v806_v62 = vshrl.u32 %v747_v42, 16  ;;  %v809_v47 = vshll.u32 %v747_v42, 16  ;;  %5687 = vmatpush3.bf16.msra.mxu0 %v6138_v26  ;;  %v6230_v51 = vpop.eup %6229  ;;  %vm8128_vm13 = vcmp.ne.s16.totalorder %v6724_v25, 0 }
  0x69   : > { %v1619_v55 = vshll.u32 %v6735_v37, 16  ;;  %v1623_v49 = vshrl.u32 %v6735_v37, 16  ;;  %v6743_v63 = vsel %vm902_vm1, %v6724_v25, %v6726_v44  ;;  %5720 = vmatprep.subr.bf16.mxu0 %v6718_v24  ;;  %v6232_v1 = vpop.eup %6231  ;;  %v748_v56 = vpack.c.bf16 %v724_v48, %v723_v52 }
  0x6a   : > { %v808_v50 = vrot.slane %v806_v62, 7  ;;  %v725_v0 = vmul.f32 %v6230_v51, %v6565_v20  ;;  %vm8165_vm14 = vcmp.ne.s16.totalorder %v6743_v63, 0  ;;  %v6234_v58 = vpop.eup %6233  ;;  %v726_v59 = vmul.f32 %v6232_v1, %v6568_v30 }
  0x6b   : > { %v1621_v26 = vrot.slane %v1619_v55, 1  ;;  %v3298_v60 = vsel %vm8128_vm13, %v6597_v22, 0  ;;  %v6236_v14 = vpop.eup %6235  ;;  %v814_v6 = vshrl.u32 %v748_v56, 16  ;;  %v817_v4 = vshll.u32 %v748_v56, 16 }
  0x6c   : > { %v811_v3 = vor.u32 %v809_v47, %v808_v50  ;;  %v631_v7 = vadd.f32 1.0, %v6234_v58  ;;  %v749_v8 = vpack.c.bf16 %v726_v59, %v725_v0  ;;  %v632_v13 = vadd.f32 1.0, %v6236_v14 }
  0x6d   : > { %v6755_v20 = vsel %vm8146_vm2, %v1617_v31, %v1621_v26  ;;  %v6760_v30 = vsel %vm8165_vm14, %v6603_v29, 0  ;;  %v1625_v19 = vor.u32 %v1623_v49, %v1621_v26  ;;  %v816_v21 = vrot.slane %v814_v6, 7 }
  0x6e   : > { %5497 = vmatmul.mubr.msk.bf16.gmra.mrb[8].mxu1 %vm1727_vm3, %v6755_v20  ;;  %5656 = vmatprep.mubr.msk.bf16.mxu0 %vm1727_vm3, %v6755_v20  ;;  %v6767_v17 = vsel %vm757_vm0, %v800_v33, %v811_v3  ;;  %6237 = vrcp.f32 %v631_v7  ;;  %v822_v10 = vshrl.u32 %v749_v8, 16  ;;  %v825_v31 = vshll.u32 %v749_v8, 16 }
  0x6f   : > { %v1627_v11 = vshll.u32 %v6767_v17, 16  ;;  %v1631_v28 = vshrl.u32 %v6767_v17, 16  ;;  %v819_v41 = vor.u32 %v817_v4, %v816_v21  ;;  %6239 = vrcp.f32 %v632_v13 }
  0x70   : > { %v3340_v42 = vrot.slane %v3298_v60, 1  ;;  %v4916_v52 = vcombine.low %v6689_v32, %v2302_v45  ;;  %v6773_v62 = vrot.slane %v822_v10, 7  ;;  %v473_v33 = vmul.f32 %v5248_v57, %v6463_v35 }
  0x71   : > { %v1629_v43 = vrot.slane %v1627_v11, 1  ;;  %v474_v47 = vmul.f32 %v5249_v61, %v6463_v35  ;;  %v6778_v48 = vsel %vm757_vm0, %v808_v50, %v819_v41  ;;  %v3341_v51 = vrot.slane %v6760_v30, 1  ;;  %v5281_v11 = vld [vmem:[%s6413_s20 + $0x60] sm:$0xff]  }
  0x72   : > { %v6781_v55 = vrot.slane %v4916_v52, 7  ;;  %v5188_v49 = vunpack.c.l.bf16 %v5280_v38  ;;  %v1635_v45 = vshll.u32 %v6778_v48, 16  ;;  %v827_v0 = vor.u32 %v825_v31, %v6773_v62 }
  0x73   : > { %v6784_v1 = vsel %vm8146_vm2, %v1625_v19, %v1629_v43  ;;  %v1633_v56 = vor.u32 %v1631_v28, %v1629_v43  ;;  %v1639_v57 = vshrl.u32 %v6778_v48, 16  ;;  %v6799_v58 = vadd.f32 %v473_v33, %v6721_v18 }
  0x74   : > { %5657 = vmatmul.mubr.msk.bf16.gmra.mrb[8].mxu0 %vm1727_vm3, %v6784_v1  ;;  %5500 = vmatprep.mubr.msk.bf16.mxu1 %vm1727_vm3, %v6784_v1  ;;  %v6796_v50 = vsel %vm902_vm1, %v6726_v44, %v6781_v55  ;;  %v6802_v26 = vadd.f32 %v474_v47, %v6730_v27  ;;  %v1637_v59 = vrot.slane %v1635_v45, 1  ;;  %v6805_v60 = vsel %vm757_vm0, %v816_v21, %v827_v0  ;;  %v5295_v27 = vld [vmem:[%s6422_s26 + $0x58] sm:$0xff]  }
  0x75   : > { %vm8161_vm5 = vcmp.ne.s16.totalorder %v6796_v50, 0  ;;  %v5189_v61 = vunpack.c.h.bf16 %v5280_v38  ;;  %v1643_v14 = vshll.u32 %v6805_v60, 16  ;;  %v3342_v3 = vsel %vm8164_vm15, %v3340_v42, %v3341_v51  ;;  %v5296_v38 = vld [vmem:[%s6422_s26 + $0x60] sm:$0xff]  }
  0x76   : > { %v6813_v18 = vsel %vm8161_vm5, %v6608_v46, 0  ;;  %v4848_v44 = vmul.f32 -1.442695, %v6799_v58  ;;  %v6818_v6 = vsel %vm8146_vm2, %v1633_v56, %v1637_v59  ;;  %v1641_v4 = vor.u32 %v1639_v57, %v1637_v59 }
  0x77   : > { %v3343_v7 = vrot.slane %v6813_v18, 1  ;;  %v4849_v8 = vmul.f32 -1.442695, %v6802_v26  ;;  %5501 = vmatmul.mubr.msk.bf16.gmra.mrb[12].mxu1 %vm1727_vm3, %v6818_v6  ;;  %5660 = vmatprep.mubr.msk.bf16.mxu0 %vm1727_vm3, %v6818_v6  ;;  %v6826_v30 = vrot.slane %v1643_v14, 1  ;;  %v1647_v19 = vshrl.u32 %v6805_v60, 16 }
  0x78   : > { %v6238_v13 = vpop.eup %6237  ;;  %6241 = vpow2.f32 %v4848_v44  ;;  %v377_v21 = vmul.f32 %v5188_v49, %v6461_v34  ;;  %v378_v10 = vmul.f32 %v5189_v61, %v6461_v34  ;;  %v5252_v31 = vunpack.c.l.bf16 %v5295_v27 }
  0x79   : > { %v727_v28 = vmul.f32 %v6238_v13, %v6592_v5  ;;  %6243 = vpow2.f32 %v4849_v8  ;;  %v6240_v41 = vpop.eup %6239  ;;  %v6836_v42 = vsel %vm8146_vm2, %v1641_v4, %v6826_v30  ;;  %v3344_v52 = vsel %vm8164_vm15, %v3341_v51, %v3343_v7  ;;  %v5282_v4 = vld [vmem:[%s6413_s20 + $0x68] sm:$0xff]  }
  0x7a   : > { %8180 = vst [vmem:[#allocation6_spill] sm:$0xff] %v6836_v42  ;;  %v5253_v43 = vunpack.c.h.bf16 %v5295_v27  ;;  %v992_v33 = vand.u32 15, %v6647_v39  ;;  %5504 = vmatprep.mubr.msk.bf16.mxu1 %vm1727_vm3, %v6836_v42  ;;  %v728_v5 = vmul.f32 %v6240_v41, %v6657_v53  ;;  %v475_v47 = vmul.f32 %v5252_v31, %v6463_v35 }
  0x7b   : > { %v916_v49 = vadd.s32 72, %v6427_v9  ;;  %v5192_v56 = vunpack.c.l.bf16 %v5281_v11  ;;  %v5193_v51 = vunpack.c.h.bf16 %v5281_v11  ;;  %v5256_v0 = vunpack.c.l.bf16 %v5296_v38 }
  0x7c   : > { %5661 = vmatmul.mubr.msk.bf16.gmra.mrb[12].mxu0 %vm1727_vm3, %v6836_v42  ;;  %v476_v45 = vmul.f32 %v5253_v43, %v6463_v35  ;;  %vm2176_vm6 = vcmp.lt.s32.totalorder %v992_v33, 15  ;;  %v750_v39 = vpack.c.bf16 %v728_v5, %v727_v28  ;;  %v6851_v57 = vadd.f32 %v475_v47, %v377_v21  ;;  %v6289_v42 = vld [vmem:[%s8117_s3 + $0x40] sm:$0xff]  }
  0x7d   : > { %5688 = vmatprep.mubr.msk.bf16.mxu0 %vm1727_vm3, %v3342_v3  ;;  %vm2272_vm7 = vmpackc.low %vm2176_vm6, %vm2176_vm6  ;;  %v1006_v53 = vand.u32 15, %v916_v49  ;;  %v379_v59 = vmul.f32 %v5192_v56, %v6461_v34  ;;  %v380_v44 = vmul.f32 %v5193_v51, %v6461_v34  ;;  %v5257_v27 = vunpack.c.h.bf16 %v5296_v38  ;;  %v6142_v49 = vld [vmem:[%s8117_s3 + $0xc8] sm:$0xff]  }
  0x7e   : > { %v6854_v61 = vadd.f32 %v476_v45, %v378_v10  ;;  %v2304_v14 = vsel %vm2272_vm7, 65537, %v8121_v15  ;;  %v830_v8 = vshrl.u32 %v750_v39, 16  ;;  %v833_v13 = vshll.u32 %v750_v39, 16 }
  0x7f   : > { %v4850_v11 = vmul.f32 -1.442695, %v6851_v57  ;;  %v4917_v3 = vcombine.low %v6689_v32, %v2304_v14  ;;  %vm2178_vm8 = vcmp.lt.s32.totalorder %v1006_v53, 15  ;;  %v477_v28 = vmul.f32 %v5256_v0, %v6463_v35 }
  0x80   : > { %v4851_v21 = vmul.f32 -1.442695, %v6854_v61  ;;  %v478_v10 = vmul.f32 %v5257_v27, %v6463_v35  ;;  %v6864_v31 = vrot.slane %v830_v8, 7  ;;  %vm2274_vm9 = vmpackc.low %vm2178_vm8, %vm2178_vm8  ;;  %v5196_v38 = vunpack.c.l.bf16 %v5282_v4 }
  0x81   : > { %6245 = vpow2.f32 %v4850_v11  ;;  %v2382_v41 = vrot.slane %v4917_v3, 7  ;;  %v2306_v33 = vsel %vm2274_vm9, 65537, %v8121_v15  ;;  %v6867_v5 = vadd.f32 %v477_v28, %v379_v59 }
  0x82   : > { %v6242_v43 = vpop.eup %6241  ;;  %6247 = vpow2.f32 %v4851_v21  ;;  %v6869_v47 = vadd.f32 %v478_v10, %v380_v44  ;;  %v835_v45 = vor.u32 %v833_v13, %v6864_v31  ;;  %v4918_v39 = vcombine.low %v6689_v32, %v2306_v33 }
  0x83   : > { %v6244_v56 = vpop.eup %6243  ;;  %v633_v51 = vadd.f32 1.0, %v6242_v43  ;;  %v6877_v0 = vsel %vm902_vm1, %v6781_v55, %v2382_v41  ;;  %v4852_v59 = vmul.f32 -1.442695, %v6867_v5  ;;  %v5197_v3 = vunpack.c.h.bf16 %v5282_v4 }
  0x84   : > { %5689 = vmatmul.mubr.msk.bf16.vlgmr.msra.gmra.mrb[0].mxu0 %vm1727_vm3, %v3344_v52  ;;  %v634_v53 = vadd.f32 1.0, %v6244_v56  ;;  %vm8151_vm10 = vcmp.ne.s16.totalorder %v6877_v0, 0  ;;  %v4853_v14 = vmul.f32 -1.442695, %v6869_v47  ;;  %v6886_v44 = vsel %vm757_vm0, %v6773_v62, %v835_v45  ;;  %v5297_v62 = vld [vmem:[%s6422_s26 + $0x68] sm:$0xff]  }
  0x85   : > { %5721 = vmatpush3.bf16.msra.mxu0 %v6718_v24  ;;  %6249 = vrcp.f32 %v633_v51  ;;  %v3301_v55 = vsel %vm8151_vm10, %v6624_v12, 0  ;;  %v6892_v27 = vrot.slane %v4918_v39, 7  ;;  %v1649_v52 = vor.u32 %v1647_v19, %v6826_v30  ;;  %v6144_v24 = vld [vmem:[%s8117_s3 + $0xd0] sm:$0xff]  }
  0x86   : > { %v1651_v8 = vshll.u32 %v6886_v44, 16  ;;  %6251 = vrcp.f32 %v634_v53  ;;  %v3345_v13 = vrot.slane %v3301_v55, 1  ;;  %5722 = vmatprep.subr.bf16.mxu0 %v6142_v49  ;;  %v381_v21 = vmul.f32 %v5196_v38, %v6461_v34  ;;  %v5283_v19 = vld [vmem:[%s6413_s20 + $0x70] sm:$0xff]   ;;  %v6146_v53 = vld [vmem:[%s8117_s3 + $0xd8] sm:$0xff]  }
  0x87   : > { %v6904_v11 = vsel %vm902_vm1, %v2382_v41, %v6892_v27  ;;  %6253 = vpow2.f32 %v4852_v59  ;;  %v382_v4 = vmul.f32 %v5197_v3, %v6461_v34  ;;  %v5260_v41 = vunpack.c.l.bf16 %v5297_v62 }
  0x88   : > { %v6907_v28 = vrot.slane %v1651_v8, 1  ;;  %v3346_v30 = vsel %vm8164_vm15, %v3343_v7, %v3345_v13  ;;  %vm8142_vm11 = vcmp.ne.s16.totalorder %v6904_v11, 0  ;;  %6255 = vpow2.f32 %v4853_v14 }
  0x89   : > { %5692 = vmatprep.mubr.msk.bf16.mxu0 %vm1727_vm3, %v3346_v30  ;;  %v6918_v10 = vsel %vm8142_vm11, %v6641_v36, 0  ;;  %v5261_v38 = vunpack.c.h.bf16 %v5297_v62  ;;  %5723 = vmatpush3.bf16.msra.mxu0 %v6142_v49  ;;  %v918_v33 = vadd.s32 88, %v6427_v9  ;;  %v479_v45 = vmul.f32 %v5260_v41, %v6463_v35 }
  0x8a   : > { %v6923_v18 = vsel %vm8146_vm2, %v1649_v52, %v6907_v28  ;;  %v8123_v43 = vrot.slane %v6918_v10, 1  ;;  %5724 = vmatprep.subr.bf16.mxu0 %v6144_v24  ;;  %v920_v51 = vadd.s32 104, %v6427_v9  ;;  %v5200_v39 = vunpack.c.l.bf16 %v5283_v19 }
  0x8b   : > { %8181 = vst [vmem:[#allocation7_spill] sm:$0xff] %v6923_v18  ;;  %v6246_v56 = vpop.eup %6245  ;;  %5505 = vmatmul.mubr.msk.bf16.gmra.mrb[16].mxu1 %vm1727_vm3, %v6923_v18  ;;  %v480_v49 = vmul.f32 %v5261_v38, %v6463_v35  ;;  %v1020_v52 = vand.u32 15, %v918_v33  ;;  %v5201_v8 = vunpack.c.h.bf16 %v5283_v19  ;;  %v6940_v3 = vadd.f32 %v479_v45, %v381_v21  ;;  %v5298_v38 = vld [vmem:[%s6422_s26 + $0x70] sm:$0xff]   ;;  %v6952_v21 = vld [vmem:[%s8117_s3 + $0xe0] sm:$0xff]  }
  0x8c   : > { %v6248_v59 = vpop.eup %6247  ;;  %v635_v14 = vadd.f32 1.0, %v6246_v56  ;;  %v3348_v55 = vsel %vm8164_vm15, %v3345_v13, %v8123_v43  ;;  %v1034_v41 = vand.u32 15, %v920_v51  ;;  %v383_v7 = vmul.f32 %v5200_v39, %v6461_v34 }
  0x8d   : > { %v636_v62 = vadd.f32 1.0, %v6248_v59  ;;  %5693 = vmatmul.mubr.msk.bf16.gmra.mrb[4].mxu0 %vm1727_vm3, %v3348_v55  ;;  %v6942_v30 = vadd.f32 %v480_v49, %v382_v4  ;;  %vm2180_vm12 = vcmp.lt.s32.totalorder %v1020_v52, 15  ;;  %v384_v56 = vmul.f32 %v5201_v8, %v6461_v34  ;;  %v5284_v52 = vld [vmem:[%s6413_s20 + $0x78] sm:$0xff]   ;;  %s7977_s20 = scalar_lea.vmem %s8120_s6, %s6404_s15 }
  0x8e   : > { %6257 = vrcp.f32 %v635_v14  ;;  %5725 = vmatpush3.bf16.msra.mxu0 %v6144_v24  ;;  %v4854_v13 = vmul.f32 -1.442695, %v6940_v3  ;;  %vm2276_vm6 = vmpackc.low %vm2180_vm12, %vm2180_vm12  ;;  %vm2182_vm7 = vcmp.lt.s32.totalorder %v1034_v41, 15  ;;  %v8182_v45 = vmov 0  }
  0x8f   : > { %v6250_v15 = vpop.eup %6249  ;;  %6259 = vrcp.f32 %v636_v62  ;;  %v4855_v19 = vmul.f32 -1.442695, %v6942_v30  ;;  %5726 = vmatprep.subr.bf16.mxu0 %v6146_v53  ;;  %v2308_v24 = vsel %vm2276_vm6, 65537, %v8182_v45  ;;  %vm2278_vm8 = vmpackc.low %vm2182_vm7, %vm2182_vm7  ;;  %v5264_v49 = vunpack.c.l.bf16 %v5298_v38 }
  0x90   : > { %v6252_v4 = vpop.eup %6251  ;;  %v729_v33 = vmul.f32 %v6250_v15, %v6799_v58  ;;  %v5265_v51 = vunpack.c.h.bf16 %v5298_v38  ;;  %6261 = vpow2.f32 %v4854_v13  ;;  %v4919_v14 = vcombine.low %v6689_v32, %v2308_v24 }
  0x91   : > { %v6254_v39 = vpop.eup %6253  ;;  %v730_v59 = vmul.f32 %v6252_v4, %v6802_v26  ;;  %v2310_v55 = vsel %vm2278_vm8, 65537, %v8182_v45  ;;  %6263 = vpow2.f32 %v4855_v19  ;;  %v481_v15 = vmul.f32 %v5264_v49, %v6463_v35 }
  0x92   : > { %v6256_v8 = vpop.eup %6255  ;;  %v637_v62 = vadd.f32 1.0, %v6254_v39  ;;  %v4920_v41 = vcombine.low %v6689_v32, %v2310_v55  ;;  %5727 = vmatpush3.bf16.msra.mxu0 %v6146_v53  ;;  %v2386_v38 = vrot.slane %v4919_v14, 7  ;;  %v482_v25 = vmul.f32 %v5265_v51, %v6463_v35 }
  0x93   : > { %v751_v58 = vpack.c.bf16 %v730_v59, %v729_v33  ;;  %v638_v43 = vadd.f32 1.0, %v6256_v8  ;;  %5760 = vmatprep.subr.bf16.mxu0 %v6952_v21  ;;  %v6966_v13 = vadd.f32 %v481_v15, %v383_v7  ;;  %v5204_v4 = vunpack.c.l.bf16 %v5284_v52 }
  0x94   : > { %6265 = vrcp.f32 %v637_v62  ;;  %v6964_v26 = vrot.slane %v4920_v41, 7  ;;  %v6970_v53 = vsel %vm902_vm1, %v6892_v27, %v2386_v38  ;;  %v6977_v49 = vadd.f32 %v482_v25, %v384_v56  ;;  %v5299_v56 = vld [vmem:[%s6422_s26 + $0x78] sm:$0xff]  }
  0x95   : > { %v838_v24 = vshrl.u32 %v751_v58, 16  ;;  %v841_v19 = vshll.u32 %v751_v58, 16  ;;  %6267 = vrcp.f32 %v638_v43  ;;  %vm8141_vm9 = vcmp.ne.s16.totalorder %v6970_v53, 0 }
  0x96   : > { %v6975_v33 = vsel %vm902_vm1, %v2386_v38, %v6964_v26  ;;  %v4856_v7 = vmul.f32 -1.442695, %v6966_v13  ;;  %v3303_v43 = vsel %vm8141_vm9, %v6735_v37, 0  ;;  %v5205_v27 = vunpack.c.h.bf16 %v5284_v52 }
  0x97   : > { %v6980_v51 = vrot.slane %v838_v24, 7  ;;  %vm8130_vm12 = vcmp.ne.s16.totalorder %v6975_v33, 0  ;;  %v3349_v59 = vrot.slane %v3303_v43, 1  ;;  %v4857_v25 = vmul.f32 -1.442695, %v6977_v49 }
  0x98   : > { %v6258_v39 = vpop.eup %6257  ;;  %v6989_v14 = vsel %vm8130_vm12, %v6767_v17, 0  ;;  %6269 = vpow2.f32 %v4856_v7  ;;  %v385_v52 = vmul.f32 %v5204_v4, %v6461_v34  ;;  %v8183_v58 = vrot.slane %v6918_v10, 1 }
  0x99   : > { %v6260_v55 = vpop.eup %6259  ;;  %v843_v8 = vor.u32 %v841_v19, %v6980_v51  ;;  %v731_v62 = vmul.f32 %v6258_v39, %v6851_v57  ;;  %v8125_v41 = vrot.slane %v6989_v14, 1  ;;  %6271 = vpow2.f32 %v4857_v25 }
  0x9a   : > { %v732_v15 = vmul.f32 %v6260_v55, %v6854_v61  ;;  %v3350_v38 = vsel %vm8164_vm15, %v8183_v58, %v3349_v59  ;;  %v386_v24 = vmul.f32 %v5205_v27, %v6461_v34  ;;  %v6262_v7 = vpop.eup %6261  ;;  %v5268_v4 = vunpack.c.l.bf16 %v5299_v56 }
  0x9b   : > { %v7004_v43 = vsel %vm757_vm0, %v6864_v31, %v843_v8  ;;  %5696 = vmatprep.mubr.msk.bf16.mxu0 %vm1727_vm3, %v3350_v38  ;;  %v3352_v57 = vsel %vm8164_vm15, %v3349_v59, %v8125_v41  ;;  %v5269_v61 = vunpack.c.h.bf16 %v5299_v56  ;;  %v6264_v19 = vpop.eup %6263  ;;  %v8184_v10 = vshrl.u32 %v6886_v44, 16 }
  0x9c   : > { %v1659_v34 = vshll.u32 %v7004_v43, 16  ;;  %v752_v27 = vpack.c.bf16 %v732_v15, %v731_v62  ;;  %v639_v25 = vadd.f32 1.0, %v6262_v7  ;;  %5697 = vmatmul.mubr.msk.bf16.gmra.mrb[8].mxu0 %vm1727_vm3, %v3352_v57  ;;  %v640_v31 = vadd.f32 1.0, %v6264_v19 }
  0x9d   : > { %v1657_v39 = vor.u32 %v8184_v10, %v6907_v28  ;;  %v483_v55 = vmul.f32 %v5268_v4, %v6463_v35  ;;  %v484_v8 = vmul.f32 %v5269_v61, %v6463_v35  ;;  %v922_v59 = vadd.s32 120, %v6427_v9 }
  0x9e   : > { %v6266_v58 = vpop.eup %6265  ;;  %v1661_v56 = vrot.slane %v1659_v34, 1  ;;  %v846_v38 = vshrl.u32 %v752_v27, 16  ;;  %v849_v41 = vshll.u32 %v752_v27, 16  ;;  %6273 = vrcp.f32 %v639_v25 }
  0x9f   : > { %v6268_v18 = vpop.eup %6267  ;;  %v733_v28 = vmul.f32 %v6266_v58, %v6867_v5  ;;  %6275 = vrcp.f32 %v640_v31  ;;  %v7019_v62 = vadd.f32 %v483_v55, %v385_v52  ;;  %v7021_v15 = vadd.f32 %v484_v8, %v386_v24 }
  0xa0   : > { %v7024_v7 = vsel %vm8146_vm2, %v1657_v39, %v1661_v56  ;;  %v848_v57 = vrot.slane %v846_v38, 7  ;;  %v1663_v35 = vshrl.u32 %v7004_v43, 16  ;;  %v734_v4 = vmul.f32 %v6268_v18, %v6869_v47 }
  0xa1   : > { %8185 = vst [vmem:[#allocation8_spill] sm:$0xff] %v7024_v7  ;;  %5508 = vmatprep.mubr.msk.bf16.mxu1 %vm1727_vm3, %v7024_v7  ;;  %v4858_v61 = vmul.f32 -1.442695, %v7019_v62  ;;  %v4859_v5 = vmul.f32 -1.442695, %v7021_v15  ;;  %v1048_v19 = vand.u32 15, %v922_v59 }
  0xa2   : > { %v924_v52 = vadd.s32 136, %v6427_v9  ;;  %v6270_v24 = vpop.eup %6269  ;;  %v851_v10 = vor.u32 %v849_v41, %v848_v57  ;;  %v753_v34 = vpack.c.bf16 %v734_v4, %v733_v28  ;;  %v926_v39 = vadd.s32 152, %v6427_v9 }
  0xa3   : > { %v641_v27 = vadd.f32 1.0, %v6270_v24  ;;  %6277 = vpow2.f32 %v4858_v61  ;;  %vm2184_vm6 = vcmp.lt.s32.totalorder %v1048_v19, 15  ;;  %v6272_v47 = vpop.eup %6271  ;;  %v1665_v8 = vor.u32 %v1663_v35, %v1661_v56 }
  0xa4   : > { %v1062_v25 = vand.u32 15, %v924_v52  ;;  %v7036_v18 = vsel %vm757_vm0, %v6980_v51, %v851_v10  ;;  %v854_v31 = vshrl.u32 %v753_v34, 16  ;;  %v857_v55 = vshll.u32 %v753_v34, 16  ;;  %vm2280_vm7 = vmpackc.low %vm2184_vm6, %vm2184_vm6 }
  0xa5   : > { %6279 = vpow2.f32 %v4859_v5  ;;  %v1667_v59 = vshll.u32 %v7036_v18, 16  ;;  %v642_v41 = vadd.f32 1.0, %v6272_v47  ;;  %v2312_v38 = vsel %vm2280_vm7, 65537, %v8182_v45 }
  0xa6   : > { %6281 = vrcp.f32 %v641_v27  ;;  %v856_v58 = vrot.slane %v854_v31, 7  ;;  %vm2186_vm8 = vcmp.lt.s32.totalorder %v1062_v25, 15  ;;  %v1671_v4 = vshrl.u32 %v7036_v18, 16 }
  0xa7   : > { %v1669_v28 = vrot.slane %v1667_v59, 1  ;;  %6283 = vrcp.f32 %v642_v41  ;;  %v4921_v51 = vcombine.low %v6689_v32, %v2312_v38  ;;  %vm2282_vm13 = vmpackc.low %vm2186_vm8, %vm2186_vm8  ;;  %v1076_v56 = vand.u32 15, %v926_v39 }
  0xa8   : > { %v6274_v61 = vpop.eup %6273  ;;  %v859_v19 = vor.u32 %v857_v55, %v856_v58  ;;  %v2314_v5 = vsel %vm2282_vm13, 65537, %v8182_v45  ;;  %v909_v38 = vadd.s32 16, %v6427_v9  ;;  %v943_v7 = vand.u32 15, %v6427_v9 }
  0xa9   : > { %v6276_v35 = vpop.eup %6275  ;;  %v7044_v52 = vsel %vm8146_vm2, %v1665_v8, %v1669_v28  ;;  %v735_v24 = vmul.f32 %v6274_v61, %v6940_v3  ;;  %v2390_v10 = vrot.slane %v4921_v51, 7  ;;  %v4922_v25 = vcombine.low %v6689_v32, %v2314_v5 }
  0xaa   : > { %8186 = vst [vmem:[#allocation9_spill] sm:$0xff] %v7044_v52  ;;  %5509 = vmatmul.mubr.msk.bf16.gmra.mrb[20].mxu1 %vm1727_vm3, %v7044_v52  ;;  %v7050_v34 = vsel %vm757_vm0, %v848_v57, %v859_v19  ;;  %v736_v27 = vmul.f32 %v6276_v35, %v6942_v30  ;;  %v1673_v47 = vor.u32 %v1671_v4, %v1669_v28  ;;  %v928_v3 = vadd.s32 168, %v6427_v9 }
  0xab   : > { %v1675_v39 = vshll.u32 %v7050_v34, 16  ;;  %v7057_v31 = vsel %vm902_vm1, %v6964_v26, %v2390_v10  ;;  %v2392_v8 = vrot.slane %v4922_v25, 7  ;;  %vm7061_vm6 = vcmp.lt.s32.totalorder %v1076_v56, 15 }
  0xac   : > { %v754_v55 = vpack.c.bf16 %v736_v27, %v735_v24  ;;  %vm8129_vm13 = vcmp.ne.s16.totalorder %v7057_v31, 0  ;;  %vm2284_vm7 = vmpackc.low %vm7061_vm6, %vm7061_vm6  ;;  %v1090_v24 = vand.u32 15, %v928_v3  ;;  %v930_v57 = vadd.s32 184, %v6427_v9 }
  0xad   : > { %v6278_v30 = vpop.eup %6277  ;;  %v1677_v59 = vrot.slane %v1675_v39, 1  ;;  %v3305_v41 = vsel %vm8129_vm13, %v6778_v48, 0  ;;  %v7076_v35 = vsel %vm902_vm1, %v2390_v10, %v2392_v8  ;;  %v8190_v39 = vrot.slane %v6989_v14, 1 }
  0xae   : > { %v862_v28 = vshrl.u32 %v754_v55, 16  ;;  %v865_v4 = vshll.u32 %v754_v55, 16  ;;  %v643_v51 = vadd.f32 1.0, %v6278_v30  ;;  %v3353_v61 = vrot.slane %v3305_v41, 1 }
  0xaf   : > { %v6280_v26 = vpop.eup %6279  ;;  %v7073_v5 = vsel %vm8146_vm2, %v1673_v47, %v1677_v59  ;;  %v1679_v47 = vshrl.u32 %v7050_v34, 16  ;;  %vm8132_vm8 = vcmp.ne.s16.totalorder %v7076_v35, 0  ;;  %vm2190_vm13 = vcmp.lt.s32.totalorder %v1090_v24, 15 }
  0xb0   : > { %v6282_v19 = vpop.eup %6281  ;;  %8189 = vst [vmem:[#allocation10_spill] sm:$0xff] %v7073_v5  ;;  %v644_v56 = vadd.f32 1.0, %v6280_v26  ;;  %5512 = vmatprep.mubr.msk.bf16.mxu1 %vm1727_vm3, %v7073_v5  ;;  %v864_v27 = vrot.slane %v862_v28, 7  ;;  %6285 = vrcp.f32 %v643_v51  ;;  %v3354_v55 = vsel %vm8164_vm15, %v8190_v39, %v3353_v61  ;;  %vm2286_vm12 = vmpackc.low %vm2190_vm13, %vm2190_vm13 }
  0xb1   : > { %v737_v25 = vmul.f32 %v6282_v19, %v6966_v13  ;;  %v6284_v30 = vpop.eup %6283  ;;  %5700 = vmatprep.mubr.msk.bf16.mxu0 %vm1727_vm3, %v3354_v55  ;;  %v2316_v13 = vsel %vm2284_vm7, 65537, %v8182_v45  ;;  %v3306_v3 = vsel %vm8132_vm8, %v6805_v60, 0  ;;  %v957_v28 = vand.u32 15, %v909_v38 }
  0xb2   : > { %6287 = vrcp.f32 %v644_v56  ;;  %v867_v10 = vor.u32 %v865_v4, %v864_v27  ;;  %v738_v14 = vmul.f32 %v6284_v30, %v6977_v49  ;;  %v4923_v41 = vcombine.low %v6689_v32, %v2316_v13 }
  0xb3   : > { %v3355_v26 = vrot.slane %v3306_v3, 1  ;;  %v1681_v4 = vor.u32 %v1679_v47, %v1677_v59  ;;  %v2318_v55 = vsel %vm2286_vm12, 65537, %v8182_v45  ;;  %vm7110_vm13 = vcmp.ge.s32.totalorder %v957_v28, 1 }
  0xb4   : > { %v7099_v51 = vsel %vm757_vm0, %v856_v58, %v867_v10  ;;  %v755_v19 = vpack.c.bf16 %v738_v14, %v737_v25  ;;  %v2394_v56 = vrot.slane %v4923_v41, 7  ;;  %v4924_v58 = vcombine.low %v6689_v32, %v2318_v55  ;;  %vm1419_vm7 = vmpackc.low %vm7110_vm13, %vm7110_vm13 }
  0xb5   : > { %v1683_v49 = vshll.u32 %v7099_v51, 16  ;;  %v3356_v39 = vsel %vm8164_vm15, %v3353_v61, %v3355_v26  ;;  %v911_v59 = vadd.s32 32, %v6427_v9  ;;  %v1104_v14 = vand.u32 15, %v930_v57 }
  0xb6   : > { %v870_v30 = vshrl.u32 %v755_v19, 16  ;;  %v873_v13 = vshll.u32 %v755_v19, 16  ;;  %5701 = vmatmul.mubr.msk.bf16.gmra.mrb[12].mxu0 %vm1727_vm3, %v3356_v39  ;;  %v7107_v38 = vsel %vm902_vm1, %v2392_v8, %v2394_v56  ;;  %v2396_v10 = vrot.slane %v4924_v58, 7 }
  0xb7   : > { %v1685_v24 = vrot.slane %v1683_v49, 1  ;;  %vm8131_vm6 = vcmp.ne.s16.totalorder %v7107_v38, 0  ;;  %v1687_v3 = vshrl.u32 %v7099_v51, 16  ;;  %v913_v39 = vadd.s32 48, %v6427_v9 }
  0xb8   : > { %v872_v61 = vrot.slane %v870_v30, 7  ;;  %v3307_v47 = vsel %vm8131_vm6, %v6886_v44, 0  ;;  %v7126_v49 = vsel %vm902_vm1, %v2394_v56, %v2396_v10  ;;  %vm7129_vm12 = vcmp.lt.s32.totalorder %v1104_v14, 15 }
  0xb9   : > { %v7120_v8 = vsel %vm8146_vm2, %v1681_v4, %v1685_v24  ;;  %v3357_v41 = vrot.slane %v3307_v47, 1  ;;  %vm8133_vm6 = vcmp.ne.s16.totalorder %v7126_v49, 0  ;;  %vm2288_vm13 = vmpackc.low %vm7129_vm12, %vm7129_vm12  ;;  %v1689_v25 = vor.u32 %v1687_v3, %v1685_v24 }
  0xba   : > { %8193 = vst [vmem:[#allocation11_spill] sm:$0xff] %v7120_v8  ;;  %v6286_v28 = vpop.eup %6285  ;;  %5513 = vmatmul.mubr.msk.bf16.gmra.mrb[24].mxu1 %vm1727_vm3, %v7120_v8  ;;  %v875_v19 = vor.u32 %v873_v13, %v872_v61  ;;  %v971_v13 = vand.u32 15, %v911_v59  ;;  %v985_v14 = vand.u32 15, %v913_v39  ;;  %v932_v3 = vadd.s32 200, %v6427_v9 }
  0xbb   : > { %v739_v4 = vmul.f32 %v6286_v28, %v7019_v62  ;;  %v3358_v30 = vsel %vm8164_vm15, %v3355_v26, %v3357_v41  ;;  %v3308_v62 = vsel %vm8133_vm6, %v7004_v43, 0 }
  0xbc   : > { %v6288_v57 = vpop.eup %6287  ;;  %v7140_v56 = vsel %vm757_vm0, %v864_v27, %v875_v19  ;;  %5704 = vmatprep.mubr.msk.bf16.mxu0 %vm1727_vm3, %v3358_v30  ;;  %v3359_v47 = vrot.slane %v3308_v62, 1  ;;  %v1449_v27 = vsel %vm1419_vm7, 65537, %v8182_v45  ;;  %vm7154_vm8 = vcmp.ge.s32.totalorder %v971_v13, 1 }
  0xbd   : > { %v740_v58 = vmul.f32 %v6288_v57, %v7021_v15  ;;  %v1691_v26 = vshll.u32 %v7140_v56, 16  ;;  %v2320_v15 = vsel %vm2288_vm13, 65537, %v8182_v45  ;;  %v4860_v39 = vcombine.low %v1449_v27, %v6689_v32  ;;  %vm1421_vm12 = vmpackc.low %vm7154_vm8, %vm7154_vm8 }
  0xbe   : > { %v3360_v19 = vsel %vm8164_vm15, %v3357_v41, %v3359_v47  ;;  %v4925_v55 = vcombine.low %v6689_v32, %v2320_v15  ;;  %v1695_v13 = vshrl.u32 %v7140_v56, 16  ;;  %v1118_v62 = vand.u32 15, %v932_v3 }
  0xbf   : > { %v756_v59 = vpack.c.bf16 %v740_v58, %v739_v4  ;;  %v1693_v28 = vrot.slane %v1691_v26, 1  ;;  %5705 = vmatmul.mubr.msk.bf16.gmra.mrb[16].mxu0 %vm1727_vm3, %v3360_v19  ;;  %v915_v26 = vadd.s32 64, %v6427_v9  ;;  %vm7174_vm7 = vcmp.ge.s32.totalorder %v985_v14, 1 }
  0xc0   : > { %v2398_v58 = vrot.slane %v4925_v55, 7  ;;  %v934_v27 = vadd.s32 216, %v6427_v9  ;;  %v936_v15 = vadd.s32 232, %v6427_v9  ;;  %vm2194_vm6 = vcmp.lt.s32.totalorder %v1118_v62, 15 }
  0xc1   : > { %v878_v30 = vshrl.u32 %v756_v59, 16  ;;  %v881_v24 = vshll.u32 %v756_v59, 16  ;;  %v7162_v4 = vsel %vm8146_vm2, %v1689_v25, %v1693_v28  ;;  %v999_v57 = vand.u32 15, %v915_v26  ;;  %vm2290_vm8 = vmpackc.low %vm2194_vm6, %vm2194_vm6 }
  0xc2   : > { %8198 = vst [vmem:[#allocation12_spill] sm:$0xff] %v7162_v4  ;;  %5516 = vmatprep.mubr.msk.bf16.mxu1 %vm1727_vm3, %v7162_v4  ;;  %v7179_v59 = vsel %vm902_vm1, %v2396_v10, %v2398_v58  ;;  %v1451_v55 = vsel %vm1421_vm12, 65537, %v8182_v45  ;;  %v1146_v10 = vand.u32 15, %v936_v15  ;;  %v1697_v4 = vor.u32 %v1695_v13, %v1693_v28  ;;  %vm1423_vm6 = vmpackc.low %vm7174_vm7, %vm7174_vm7 }
  0xc3   : > { %v7167_v41 = vrot.slane %v878_v30, 7  ;;  %vm8140_vm13 = vcmp.ne.s16.totalorder %v7179_v59, 0  ;;  %v1132_v30 = vand.u32 15, %v934_v27  ;;  %v917_v26 = vadd.s32 80, %v6427_v9 }
  0xc4   : > { %v3309_v14 = vsel %vm8140_vm13, %v7036_v18, 0  ;;  %vm7200_vm13 = vcmp.ge.s32.totalorder %v999_v57, 1  ;;  %v919_v13 = vadd.s32 96, %v6427_v9  ;;  %vm7212_vm9 = vcmp.ne.s16.totalorder %v4860_v39, 0 }
  0xc5   : > { %v883_v19 = vor.u32 %v881_v24, %v7167_v41  ;;  %v3361_v8 = vrot.slane %v3309_v14, 1  ;;  %v2322_v24 = vsel %vm2290_vm8, 65537, %v8182_v45  ;;  %vm2196_vm12 = vcmp.lt.s32.totalorder %v1132_v30, 15 }
  0xc6   : > { %v4926_v62 = vcombine.low %v6689_v32, %v2322_v24  ;;  %vm2292_vm8 = vmpackc.low %vm2196_vm12, %vm2196_vm12  ;;  %v8206_v14 = vmov 0  ;;  %v1013_v39 = vand.u32 15, %v917_v26  ;;  %v1539_v24 = vsel %vm7212_vm9, %v6597_v22, 0 }
  0xc7   : > { %v7190_v3 = vsel %vm757_vm0, %v872_v61, %v883_v19  ;;  %v3362_v27 = vsel %vm8164_vm15, %v3359_v47, %v3361_v8  ;;  %vm7204_vm0 = vcmp.lt.s32.totalorder %v1146_v10, 15  ;;  %v8207_v14 = vsel %vm7212_vm9, 4294967295, %v8206_v14  ;;  %vm1425_vm12 = vmpackc.low %vm7200_vm13, %vm7200_vm13 }
  0xc8   : > { %v1699_v5 = vshll.u32 %v7190_v3, 16  ;;  %5708 = vmatprep.mubr.msk.bf16.mxu0 %vm1727_vm3, %v3362_v27  ;;  %v2400_v19 = vrot.slane %v4926_v62, 7  ;;  %8208 = vst [vmem:[#allocation14_spill] sm:$0xff] %v8207_v14  ;;  %v4861_v47 = vcombine.low %v1451_v55, %v6689_v32  ;;  %v2324_v57 = vsel %vm2292_vm8, 65537, %v8182_v45  ;;  %vm2294_vm11 = vmpackc.low %vm7204_vm0, %vm7204_vm0  ;;  %v6152_v14 = vld [vmem:[%s8117_s3 + $0xf0] sm:$0xff]  }
  0xc9   : > { %v4927_v55 = vcombine.low %v6689_v32, %v2324_v57  ;;  %v1027_v10 = vand.u32 15, %v919_v13  ;;  %v8210_v27 = vmov 0  ;;  %v1455_v28 = vsel %vm1425_vm12, 65537, %v8182_v45 }
  0xca   : > { %v7209_v15 = vrot.slane %v1699_v5, 1  ;;  %v7226_v30 = vsel %vm902_vm1, %v2398_v58, %v2400_v19  ;;  %v2326_v58 = vsel %vm2294_vm11, 65537, %v8182_v45  ;;  %vm7250_vm7 = vcmp.ne.s16.totalorder %v4861_v47, 0 }
  0xcb   : > { %vm8148_vm0 = vcmp.ne.s16.totalorder %v7226_v30, 0  ;;  %v2402_v26 = vrot.slane %v4927_v55, 7  ;;  %v4928_v25 = vcombine.low %v6689_v32, %v2326_v58  ;;  %v8211_v27 = vsel %vm7250_vm7, 4294967295, %v8210_v27 }
  0xcc   : > { %8205 = vst [vmem:[#allocation13_spill] sm:$0xff] %v7209_v15  ;;  %v7223_v5 = vsel %vm8146_vm2, %v1697_v4, %v7209_v15  ;;  %v1453_v4 = vsel %vm1423_vm6, 65537, %v8182_v45  ;;  %v3310_v62 = vsel %vm8148_vm0, %v7050_v34, 0  ;;  %8212 = vst [vmem:[#allocation16_spill] sm:$0xff] %v8211_v27  ;;  %v938_v13 = vadd.s32 248, %v6427_v9 }
  0xcd   : > { %8209 = vst [vmem:[#allocation15_spill] sm:$0xff] %v7223_v5  ;;  %5517 = vmatmul.mubr.msk.bf16.gmra.mrb[28].mxu1 %vm1727_vm3, %v7223_v5  ;;  %v3363_v61 = vrot.slane %v3310_v62, 1  ;;  %v4862_v57 = vcombine.low %v1453_v4, %v6689_v32  ;;  %vm7257_vm11 = vcmp.ge.s32.totalorder %v1013_v39, 1  ;;  %v7262_v15 = vsel %vm902_vm1, %v2400_v19, %v2402_v26 }
  0xce   : > { %5528 = vmatprep.mubr.bf16.mxu1 %v8182_v45  ;;  %v2404_v55 = vrot.slane %v4928_v25, 7  ;;  %vm8147_vm13 = vcmp.ne.s16.totalorder %v7262_v15, 0  ;;  %vm7266_vm6 = vcmp.ge.s32.totalorder %v1027_v10, 1  ;;  %v1160_v62 = vand.u32 15, %v938_v13  ;;  %vm1427_vm8 = vmpackc.low %vm7257_vm11, %vm7257_vm11  ;;  %v6145_v25 = vld [vmem:[%s8117_s3 + $0x48] sm:$0xff]  }
  0xcf   : > { %v3364_v47 = vsel %vm8164_vm15, %v3361_v8, %v3363_v61  ;;  %v4863_v39 = vcombine.low %v1455_v28, %v6689_v32  ;;  %v3311_v4 = vsel %vm8147_vm13, %v7099_v51, 0  ;;  %v921_v8 = vadd.s32 112, %v6427_v9  ;;  %vm1429_vm2 = vmpackc.low %vm7266_vm6, %vm7266_vm6 }
  0xd0   : > { %5709 = vmatmul.mubr.msk.bf16.gmra.mrb[20].mxu0 %vm1727_vm3, %v3364_v47  ;;  %v7276_v19 = vsel %vm902_vm1, %v2402_v26, %v2404_v55  ;;  %v1540_v10 = vsel %vm7250_vm7, %v6603_v29, 0  ;;  %v3365_v28 = vrot.slane %v3311_v4, 1  ;;  %v923_v26 = vadd.s32 128, %v6427_v9 }
  0xd1   : > { %8217 = vst [vmem:[#allocation17_spill] sm:$0xff] %v7276_v19  ;;  %vm8155_vm12 = vcmp.ne.s16.totalorder %v7276_v19, 0  ;;  %vm2200_vm13 = vcmp.lt.s32.totalorder %v1160_v62, 15  ;;  %vm7299_vm0 = vcmp.ne.s16.totalorder %v4862_v57, 0  ;;  %v8218_v47 = vmov 0 }
  0xd2   : > { %v7293_v13 = vsel %vm8155_vm12, %v7140_v56, 0  ;;  %v8219_v47 = vsel %vm7299_vm0, 4294967295, %v8218_v47  ;;  %v3366_v4 = vsel %vm8164_vm15, %v3363_v61, %v3365_v28  ;;  %vm2296_vm10 = vmpackc.low %vm2200_vm13, %vm2200_vm13  ;;  %vm7310_vm12 = vcmp.ne.s16.totalorder %v4863_v39, 0 }
  0xd3   : > { %v3367_v52 = vrot.slane %v7293_v13, 1  ;;  %v1457_v61 = vsel %vm1427_vm8, 65537, %v8182_v45  ;;  %v1041_v57 = vand.u32 15, %v921_v8  ;;  %v2328_v62 = vsel %vm2296_vm10, 65537, %v8182_v45  ;;  %5712 = vmatprep.mubr.msk.bf16.mxu0 %vm1727_vm3, %v3366_v4  ;;  %v6147_v8 = vld [vmem:[%s8117_s3 + $0x50] sm:$0xff]  }
  0xd4   : > { %v1459_v39 = vsel %vm1429_vm2, 65537, %v8182_v45  ;;  %v1055_v5 = vand.u32 15, %v923_v26  ;;  %v1541_v13 = vsel %vm7299_vm0, %v6608_v46, 0  ;;  %vm1323_vm10 = vcmp.ge.s32.totalorder %v943_v7, 1 }
  0xd5   : > { %5529 = vmatmul.mubr.msk.bf16.vlgmr.msra.gmra.mrb[0].mxu1 %vm1727_vm3, %v1539_v24  ;;  %v8220_v24 = vmov 0  ;;  %v4864_v58 = vcombine.low %v1457_v61, %v6689_v32  ;;  %v7345_v26 = vsel %vm6587_vm4, %v7167_v41, 0  ;;  %vm2764_vm2 = vmpackc.low %vm1323_vm10, %vm1323_vm10  ;;  %vm7349_vm11 = vcmp.ge.s32.totalorder %v1041_v57, 1 }
  0xd6   : > { %5561 = vmatpush3.bf16.msra.mxu1 %v6289_v42  ;;  %5532 = vmatprep.mubr.msk.bf16.mxu1 %vm1727_vm3, %v1540_v10  ;;  %v8221_v24 = vsel %vm7310_vm12, 4294967295, %v8220_v24  ;;  %v3368_v42 = vsel %vm8164_vm15, %v3365_v28, %v3367_v52  ;;  %v4929_v10 = vcombine.low %v6689_v32, %v2328_v62  ;;  %v1542_v28 = vsel %vm7310_vm12, %v6624_v12, 0 }
  0xd7   : > { %8222 = vst [vmem:[#allocation18_spill] sm:$0xff] %v8221_v24  ;;  %5562 = vmatprep.subr.bf16.mxu1 %v6145_v25  ;;  %v4865_v62 = vcombine.low %v1459_v39, %v6689_v32  ;;  %v925_v19 = vadd.s32 144, %v6427_v9  ;;  %v2766_v61 = vsel %vm2764_vm2, 65537, %v8182_v45  ;;  %vm7360_vm13 = vcmp.ge.s32.totalorder %v1055_v5, 1 }
  0xd8   : > { %v7340_v4 = vrot.slane %v4929_v10, 7  ;;  %5713 = vmatmul.mubr.msk.bf16.gmra.mrb[24].mxu0 %vm1727_vm3, %v3368_v42  ;;  %v927_v41 = vadd.s32 160, %v6427_v9  ;;  %v4950_v39 = vcombine.low %v2766_v61, %v6689_v32  ;;  %vm1433_vm8 = vmpackc.low %vm7360_vm13, %vm7360_vm13  ;;  %vm7384_vm10 = vcmp.ne.s16.totalorder %v4864_v58, 0  ;;  %v7399_v61 = vld [vmem:[%s8117_s3 + $0x60] sm:$0xff]  }
  0xd9   : > { %vm7388_vm2 = vcmp.ne.s16.totalorder %v4865_v62, 0  ;;  %v1463_v2 = vsel %vm1433_vm8, 65537, %v8182_v45  ;;  %v3642_v27 = vsel %vm7310_vm12, %v6735_v37, 0 }
  0xda   : > { %8223 = vst [vmem:[#allocation19_spill] sm:$0xff] %v7340_v4  ;;  %5563 = vmatpush3.bf16.msra.mxu1 %v6145_v25  ;;  %v7357_v10 = vsel %vm902_vm1, %v2404_v55, %v7340_v4  ;;  %vm8159_vm4 = vcmp.ne.s16.totalorder %v7340_v4, 0  ;;  %v6149_v25 = vld [vmem:[%s8117_s3 + $0x58] sm:$0xff]   ;;  %vm1431_vm1 = vmpackc.low %vm7349_vm11, %vm7349_vm11  ;;  %v1069_v4 = vand.u32 15, %v925_v19  ;;  %vm7392_vm11 = vcmp.ne.s16.totalorder %v4950_v39, 0 }
  0xdb   : > { %5564 = vmatprep.subr.bf16.mxu1 %v6147_v8  ;;  %vm8160_vm6 = vcmp.ne.s16.totalorder %v7357_v10, 0  ;;  %v3314_v55 = vsel %vm8159_vm4, %v7345_v26, 0  ;;  %v1461_v19 = vsel %vm1431_vm1, 65537, %v8182_v45  ;;  %v3638_v62 = vsel %vm7392_vm11, %v6603_v29, 0 }
  0xdc   : > { %v3313_v57 = vsel %vm8160_vm6, %v7190_v3, 0  ;;  %v3371_v42 = vrot.slane %v3314_v55, 1  ;;  %vm7413_vm13 = vcmp.ge.s32.totalorder %v1069_v4, 1  ;;  %v4866_v39 = vcombine.low %v1461_v19, %v6689_v32 }
  0xdd   : > { %5533 = vmatmul.mubr.msk.bf16.gmra.mrb[4].mxu1 %vm1727_vm3, %v1541_v13  ;;  %v3369_v5 = vrot.slane %v3313_v57, 1  ;;  %v931_v4 = vadd.s32 192, %v6427_v9  ;;  %vm1435_vm8 = vmpackc.low %vm7413_vm13, %vm7413_vm13  ;;  %v3639_v19 = vsel %vm7212_vm9, %v6608_v46, 0  ;;  %v6150_v57 = vld [vmem:[%s8117_s3 + $0xe8] sm:$0xff]   ;;  %v3644_v24 = vsel %vm7388_vm2, %v6778_v48, 0 }
  0xde   : > { %5536 = vmatprep.mubr.msk.bf16.mxu1 %vm1727_vm3, %v1542_v28  ;;  %5565 = vmatpush3.bf16.msra.mxu1 %v6147_v8  ;;  %v1083_v28 = vand.u32 15, %v927_v41  ;;  %v1543_v41 = vsel %vm7384_vm10, %v6641_v36, 0  ;;  %vm7438_vm6 = vcmp.ne.s16.totalorder %v4866_v39, 0  ;;  %v6154_v39 = vld [vmem:[%s8117_s3 + $0xf8] sm:$0xff]   ;;  %v2774_v55 = vsel %vm7250_vm7, %v6608_v46, 0 }
  0xdf   : > { %5566 = vmatprep.subr.bf16.mxu1 %v6149_v25  ;;  %v3370_v8 = vsel %vm8164_vm15, %v3367_v52, %v3369_v5  ;;  %v3372_v58 = vsel %vm8164_vm15, %v3369_v5, %v3371_v42  ;;  %v929_v52 = vadd.s32 176, %v6427_v9  ;;  %v1544_v42 = vsel %vm7388_vm2, %v6735_v37, 0 }
  0xe0   : > { %5716 = vmatprep.mubr.msk.bf16.mxu0 %vm1727_vm3, %v3370_v8  ;;  %vm7423_vm1 = vcmp.ge.s32.totalorder %v1083_v28, 1  ;;  %v4867_v8 = vcombine.low %v1463_v2, %v6689_v32  ;;  %v1465_v2 = vsel %vm1435_vm8, 65537, %v8182_v45  ;;  %v933_v5 = vadd.s32 208, %v6427_v9 }
  0xe1   : > { %5717 = vmatmul.mubr.msk.bf16.gmra.mrb[28].mxu0 %vm1727_vm3, %v3372_v58  ;;  %vm1437_vm4 = vmpackc.low %vm7423_vm1, %vm7423_vm1  ;;  %v1111_v58 = vand.u32 15, %v931_v4  ;;  %v2779_v7 = vsel %vm7438_vm6, %v6778_v48, 0 }
  0xe2   : > { %5567 = vmatpush3.bf16.msra.mxu1 %v6149_v25  ;;  %5728 = vmatprep.mubr.msk.bf16.mxu0 %vm1727_vm3, %v3638_v62  ;;  %v1097_v25 = vand.u32 15, %v929_v52  ;;  %vm7445_vm5 = vcmp.ne.s16.totalorder %v4867_v8, 0  ;;  %v8240_v62 = vmov 0  ;;  %v1467_v52 = vsel %vm1437_vm4, 65537, %v8182_v45 }
  0xe3   : > { %5600 = vmatprep.subr.bf16.mxu1 %v7399_v61  ;;  %v8241_v62 = vsel %vm7445_vm5, 4294967295, %v8240_v62  ;;  %v1546_v4 = vsel %vm7445_vm5, %v6778_v48, 0  ;;  %v4868_v8 = vcombine.low %v1465_v2, %v6689_v32  ;;  %vm7472_vm4 = vcmp.ge.s32.totalorder %v1111_v58, 1 }
  0xe4   : > { %vm7461_vm13 = vcmp.ge.s32.totalorder %v1097_v25, 1  ;;  %v935_v25 = vadd.s32 224, %v6427_v9  ;;  %vm1441_vm8 = vmpackc.low %vm7472_vm4, %vm7472_vm4  ;;  %v8246_v58 = vmov 0  ;;  %v3641_v2 = vsel %vm7299_vm0, %v6641_v36, 0 }
  0xe5   : > { %5537 = vmatmul.mubr.msk.bf16.gmra.mrb[8].mxu1 %vm1727_vm3, %v1543_v41  ;;  %v3640_v41 = vsel %vm7250_vm7, %v6624_v12, 0  ;;  %vm1439_vm1 = vmpackc.low %vm7461_vm13, %vm7461_vm13  ;;  %vm7489_vm15 = vcmp.ne.s16.totalorder %v4868_v8, 0  ;;  %v937_v8 = vadd.s32 240, %v6427_v9  ;;  %v7530_v9 = vld [vmem:[%s8117_s3 + $0x100] sm:$0xff]  }
  0xe6   : > { %5540 = vmatprep.mubr.msk.bf16.mxu1 %vm1727_vm3, %v1544_v42  ;;  %v1545_v42 = vsel %vm7438_vm6, %v6767_v17, 0  ;;  %v8247_v58 = vsel %vm7489_vm15, 4294967295, %v8246_v58 }
  0xe9   : > { %5729 = vmatmul.mubr.msk.bf16.vlgmr.msra.gmra.mrb[0].mxu0 %vm1727_vm3, %v3639_v19  ;;  %v4869_v19 = vcombine.low %v1467_v52, %v6689_v32 }
  0xea   : > { %5761 = vmatpush3.bf16.msra.mxu0 %v6952_v21  ;;  %5732 = vmatprep.mubr.msk.bf16.mxu0 %vm1727_vm3, %v3640_v41  ;;  %v1125_v21 = vand.u32 15, %v933_v5  ;;  %v1139_v41 = vand.u32 15, %v935_v25  ;;  %v1471_v5 = vsel %vm1441_vm8, 65537, %v8182_v45 }
  0xeb   : > { %5762 = vmatprep.subr.bf16.mxu0 %v6150_v57  ;;  %vm7496_vm14 = vcmp.ne.s16.totalorder %v4869_v19, 0 }
  0xec   : > { %vm7512_vm13 = vcmp.ge.s32.totalorder %v1125_v21, 1  ;;  %v1548_v25 = vsel %vm7496_vm14, %v6886_v44, 0  ;;  %vm7522_vm4 = vcmp.ge.s32.totalorder %v1139_v41, 1  ;;  %v4871_v21 = vcombine.low %v1471_v5, %v6689_v32 }
  0xed   : > { %5541 = vmatmul.mubr.msk.bf16.gmra.mrb[12].mxu1 %vm1727_vm3, %v1545_v42  ;;  %v1469_v42 = vsel %vm1439_vm1, 65537, %v8182_v45  ;;  %vm1443_vm1 = vmpackc.low %vm7512_vm13, %vm7512_vm13  ;;  %v3643_v41 = vsel %vm7384_vm10, %v6767_v17, 0 }
  0xee   : > { %5544 = vmatprep.mubr.msk.bf16.mxu1 %vm1727_vm3, %v1546_v4  ;;  %5763 = vmatpush3.bf16.msra.mxu0 %v6150_v57  ;;  %v1547_v57 = vsel %vm7489_vm15, %v6805_v60, 0  ;;  %v4870_v19 = vcombine.low %v1469_v42, %v6689_v32  ;;  %vm1445_vm8 = vmpackc.low %vm7522_vm4, %vm7522_vm4  ;;  %vm7547_vm0 = vcmp.ne.s16.totalorder %v4871_v21, 0 }
  0xef   : > { %5764 = vmatprep.subr.bf16.mxu0 %v6152_v14  ;;  %v1475_v5 = vsel %vm1445_vm8, 65537, %v8182_v45  ;;  %v2784_v52 = vsel %vm7547_vm0, %v7050_v34, 0 }
  0xf0   : > { %vm7540_vm12 = vcmp.ne.s16.totalorder %v4870_v19, 0  ;;  %v3645_v19 = vsel %vm7438_vm6, %v6805_v60, 0  ;;  %vm8320_vm6 = vcmp.ne.s16.totalorder %v6975_v33, 0 }
  0xf1   : > { %5733 = vmatmul.mubr.msk.bf16.gmra.mrb[4].mxu0 %vm1727_vm3, %v3641_v2  ;;  %v8254_v2 = vmov 0 }
  0xf2   : > { %5736 = vmatprep.mubr.msk.bf16.mxu0 %vm1727_vm3, %v3642_v27  ;;  %5765 = vmatpush3.bf16.msra.mxu0 %v6152_v14  ;;  %v1153_v14 = vand.u32 15, %v937_v8  ;;  %v8255_v2 = vsel %vm7540_vm12, 4294967295, %v8254_v2  ;;  %v1473_v27 = vsel %vm1443_vm1, 65537, %v8182_v45  ;;  %v4873_v8 = vcombine.low %v1475_v5, %v6689_v32 }
  0xf3   : > { %5766 = vmatprep.subr.bf16.mxu0 %v6154_v39  ;;  %v4872_v4 = vcombine.low %v1473_v27, %v6689_v32 }
  0xf4   : > { %vm1353_vm13 = vcmp.ge.s32.totalorder %v1153_v14, 1  ;;  %vm7576_vm8 = vcmp.ne.s16.totalorder %v4873_v8, 0 }
  0xf5   : > { %5545 = vmatmul.mubr.msk.bf16.gmra.mrb[16].mxu1 %vm1727_vm3, %v1547_v57  ;;  %v1549_v57 = vsel %vm7540_vm12, %v7004_v43, 0  ;;  %vm1447_vm4 = vmpackc.low %vm1353_vm13, %vm1353_vm13  ;;  %vm7569_vm1 = vcmp.ne.s16.totalorder %v4872_v4, 0  ;;  %vm8262_vm13 = vcmp.ne.s16.totalorder %v6743_v63, 0  ;;  %v3647_v4 = vsel %vm7489_vm15, %v7004_v43, 0 }
  0xf6   : > { %5548 = vmatprep.mubr.msk.bf16.mxu1 %vm1727_vm3, %v1548_v25  ;;  %5767 = vmatpush3.bf16.msra.mxu0 %v6154_v39  ;;  %v1550_v39 = vsel %vm7547_vm0, %v7036_v18, 0  ;;  %v1477_v14 = vsel %vm1447_vm4, 65537, %v8182_v45  ;;  %v1551_v27 = vsel %vm7569_vm1, %v7050_v34, 0  ;;  %v2424_v45 = vsel %vm8262_vm13, %v6597_v22, 0 }
  0xf7   : > { %5800 = vmatprep.subr.bf16.mxu0 %v7530_v9  ;;  %v4874_v5 = vcombine.low %v1477_v14, %v6689_v32  ;;  %v3648_v32 = vsel %vm7496_vm14, %v7036_v18, 0  ;;  %vm8265_vm13 = vcmask 1046528   ;;  %vm8267_vm15 = vcmp.ne.s16.totalorder %v6877_v0, 0 }
  0xf8   : > { %v2786_v42 = vsel %vm7576_vm8, %v7140_v56, 0 }
  0xf9   : > { %5737 = vmatmul.mubr.msk.bf16.gmra.mrb[8].mxu0 %vm1727_vm3, %v3643_v41  ;;  %v3646_v41 = vsel %vm7445_vm5, %v6886_v44, 0  ;;  %vm7598_vm4 = vcmp.ne.s16.totalorder %v4874_v5, 0  ;;  %vm8266_vm5 = vcmp.ne.s16.totalorder %v6796_v50, 0  ;;  %v3649_v5 = vsel %vm7540_vm12, %v7050_v34, 0 }
  0xfa   : > { %5740 = vmatprep.mubr.msk.bf16.mxu0 %vm1727_vm3, %v3644_v24  ;;  %v1552_v24 = vsel %vm7576_vm8, %v7099_v51, 0  ;;  %v1553_v8 = vsel %vm7598_vm4, %v7140_v56, 0  ;;  %v2425_v14 = vsel %vm8266_vm5, %v6603_v29, 0  ;;  %vm8268_vm5 = vmmov %vm8265_vm13  ;;  %vm8271_vm12 = vcmp.ne.s16.totalorder %v6970_v53, 0 }
  0xfb   : > { %v2787_v25 = vsel %vm7598_vm4, %v7190_v3, 0 }
  0xfd   : > { %5549 = vmatmul.mubr.msk.bf16.gmra.mrb[20].mxu1 %vm1727_vm3, %v1549_v57 }
  0xfe   : > { %5552 = vmatprep.mubr.msk.bf16.mxu1 %vm1727_vm3, %v1550_v39  ;;  %v2467_v39 = vrot.slane %v2424_v45, 1  ;;  %v3650_v45 = vsel %vm7547_vm0, %v7099_v51, 0 }
 0x101   : > { %5741 = vmatmul.mubr.msk.bf16.gmra.mrb[12].mxu0 %vm1727_vm3, %v3645_v19  ;;  %v2468_v19 = vsel %vm8265_vm13, %v6436_v16, %v2467_v39  ;;  %vm8269_vm13 = vmmov %vm8268_vm5 }
 0x102   : > { %5744 = vmatprep.mubr.msk.bf16.mxu0 %vm1727_vm3, %v3646_v41  ;;  %v2426_v41 = vsel %vm8267_vm15, %v6608_v46, 0  ;;  %vm8270_vm15 = vcmp.ne.s16.totalorder %v6904_v11, 0 }
 0x105   : > { %5553 = vmatmul.mubr.msk.bf16.gmra.mrb[24].mxu1 %vm1727_vm3, %v1551_v27  ;;  %v2469_v27 = vrot.slane %v2425_v14, 1  ;;  %v2428_v14 = vsel %vm8271_vm12, %v6641_v36, 0  ;;  %vm8272_vm12 = vmmov %vm8268_vm5 }
 0x106   : > { %5556 = vmatprep.mubr.msk.bf16.mxu1 %vm1727_vm3, %v1552_v24  ;;  %v2471_v24 = vrot.slane %v2426_v41, 1  ;;  %v2475_v41 = vrot.slane %v2428_v14, 1 }
 0x109   : > { %5745 = vmatmul.mubr.msk.bf16.gmra.mrb[16].mxu0 %vm1727_vm3, %v3647_v4  ;;  %v2470_v4 = vsel %vm8268_vm5, %v2467_v39, %v2469_v27 }
 0x10a   : > { %5748 = vmatprep.mubr.msk.bf16.mxu0 %vm1727_vm3, %v3648_v32  ;;  %v2472_v32 = vsel %vm8269_vm13, %v2469_v27, %v2471_v24  ;;  %v3651_v27 = vsel %vm7569_vm1, %v7140_v56, 0  ;;  %vm8273_vm13 = vcmp.ne.s16.totalorder %v6975_v33, 0 }
 0x10d   : > { %5557 = vmatmul.mubr.msk.bf16.gmra.mrb[28].mxu1 %vm1727_vm3, %v1553_v8  ;;  %v2427_v8 = vsel %vm8270_vm15, %v6624_v12, 0  ;;  %vm8274_vm15 = vcmp.ne.s16.totalorder %v7057_v31, 0 }
 0x10e   : > { %5568 = vmatprep.mubr.msk.bf16.mxu1 %vm1727_vm3, %v2468_v19  ;;  %v6153_v19 = vld [vmem:[%s8117_s3 + $0x68] sm:$0xff]   ;;  %v2473_v39 = vrot.slane %v2427_v8, 1  ;;  %v6157_v8 = vld [vmem:[%s8117_s3 + $0x78] sm:$0xff]  }
 0x111   : > { %5749 = vmatmul.mubr.msk.bf16.gmra.mrb[20].mxu0 %vm1727_vm3, %v3649_v5  ;;  %v6155_v5 = vld [vmem:[%s8117_s3 + $0x70] sm:$0xff]  }
 0x112   : > { %5752 = vmatprep.mubr.msk.bf16.mxu0 %vm1727_vm3, %v3650_v45  ;;  %v3652_v45 = vsel %vm7576_vm8, %v7190_v3, 0 }
 0x115   : > { %5569 = vmatmul.mubr.msk.bf16.vlgmr.msra.gmra.mrb[0].mxu1 %vm1727_vm3, %v2470_v4  ;;  %v2474_v4 = vsel %vm8272_vm12, %v2471_v24, %v2473_v39  ;;  %v2430_v24 = vsel %vm8274_vm15, %v6767_v17, 0  ;;  %vm8275_vm12 = vmmov %vm8268_vm5  ;;  %vm8277_vm15 = vcmp.ne.s16.totalorder %v7107_v38, 0 }
 0x116   : > { %5601 = vmatpush3.bf16.msra.mxu1 %v7399_v61  ;;  %5572 = vmatprep.mubr.msk.bf16.mxu1 %vm1727_vm3, %v2472_v32  ;;  %v2476_v61 = vsel %vm8268_vm5, %v2473_v39, %v2475_v41  ;;  %v2429_v32 = vsel %vm8273_vm13, %v6735_v37, 0  ;;  %v2479_v14 = vrot.slane %v2430_v24, 1  ;;  %v3653_v39 = vsel %vm7598_vm4, %v7345_v26, 0 }
 0x117   : > { %5602 = vmatprep.subr.bf16.mxu1 %v6153_v19  ;;  %vm8276_vm13 = vcmp.ne.s16.totalorder %v7076_v35, 0  ;;  %vm8338_vm4 = vcmp.ne.s16.totalorder %v7357_v10, 0 }
 0x119   : > { %5753 = vmatmul.mubr.msk.bf16.gmra.mrb[24].mxu0 %vm1727_vm3, %v3651_v27 }
 0x11a   : > { %5603 = vmatpush3.bf16.msra.mxu1 %v6153_v19  ;;  %5756 = vmatprep.mubr.msk.bf16.mxu0 %vm1727_vm3, %v3652_v45  ;;  %v2477_v19 = vrot.slane %v2429_v32, 1 }
 0x11b   : > { %5604 = vmatprep.subr.bf16.mxu1 %v6155_v5 }
 0x11c   : > { %v2478_v27 = vsel %vm8275_vm12, %v2475_v41, %v2477_v19  ;;  %v2480_v45 = vsel %vm8268_vm5, %v2477_v19, %v2479_v14  ;;  %v2432_v41 = vsel %vm8277_vm15, %v6805_v60, 0  ;;  %vm8278_vm12 = vmmov %vm8268_vm5  ;;  %vm8280_vm15 = vcmp.ne.s16.totalorder %v7179_v59, 0 }
 0x11d   : > { %5573 = vmatmul.mubr.msk.bf16.gmra.mrb[4].mxu1 %vm1727_vm3, %v2474_v4  ;;  %v2431_v4 = vsel %vm8276_vm13, %v6778_v48, 0  ;;  %v2483_v32 = vrot.slane %v2432_v41, 1  ;;  %vm8279_vm13 = vcmp.ne.s16.totalorder %v7126_v49, 0 }
 0x11e   : > { %5576 = vmatprep.mubr.msk.bf16.mxu1 %vm1727_vm3, %v2476_v61  ;;  %5605 = vmatpush3.bf16.msra.mxu1 %v6155_v5  ;;  %v7683_v5 = vld [vmem:[%s8117_s3 + $0x80] sm:$0xff]   ;;  %v2481_v61 = vrot.slane %v2431_v4, 1  ;;  %v2433_v19 = vsel %vm8279_vm13, %v6886_v44, 0  ;;  %vm8282_vm13 = vcmp.ne.s16.totalorder %v7226_v30, 0 }
 0x11f   : > { %5606 = vmatprep.subr.bf16.mxu1 %v6157_v8  ;;  %v2435_v4 = vsel %vm8282_vm13, %v7036_v18, 0 }
 0x120   : > { %v2484_v24 = vsel %vm8268_vm5, %v2481_v61, %v2483_v32 }
 0x121   : > { %5757 = vmatmul.mubr.msk.bf16.gmra.mrb[28].mxu0 %vm1727_vm3, %v3653_v39  ;;  %v2434_v39 = vsel %vm8280_vm15, %v7004_v43, 0  ;;  %vm8283_vm15 = vcmp.ne.s16.totalorder %v7262_v15, 0 }
 0x122   : > { %5607 = vmatpush3.bf16.msra.mxu1 %v6157_v8  ;;  %5768 = vmatprep.mubr.msk.bf16.mxu0 %vm1727_vm3, %v6632_v23  ;;  %v6158_v23 = vld [vmem:[%s8117_s3 + $0x108] sm:$0xff]   ;;  %v2482_v8 = vsel %vm8278_vm12, %v2479_v14, %v2481_v61  ;;  %v2485_v14 = vrot.slane %v2433_v19, 1  ;;  %vm8281_vm12 = vmmov %vm8268_vm5  ;;  %v2436_v41 = vsel %vm8283_vm15, %v7050_v34, 0  ;;  %vm8288_vm15 = vcmp.ne.s16.totalorder %v7357_v10, 0 }
 0x123   : > { %5840 = vmatprep.subr.bf16.mxu1 %v7683_v5  ;;  %v2491_v61 = vrot.slane %v2436_v41, 1  ;;  %v2438_v19 = vsel %vm8288_vm15, %v7140_v56, 0  ;;  %vm8294_vm15 = vmmov %vm8268_vm5 }
 0x125   : > { %5577 = vmatmul.mubr.msk.bf16.gmra.mrb[8].mxu1 %vm1727_vm3, %v2478_v27  ;;  %v2487_v27 = vrot.slane %v2434_v39, 1 }
 0x126   : > { %5580 = vmatprep.mubr.msk.bf16.mxu1 %vm1727_vm3, %v2480_v45 }
 0x127   : > { %v2488_v45 = vsel %vm8268_vm5, %v2485_v14, %v2487_v27 }
 0x129   : > { %5769 = vmatmul.mubr.msk.bf16.vlgmr.msra.gmra.mrb[0].mxu0 %vm1727_vm3, %v6661_v40  ;;  %v6159_v40 = vld [vmem:[%s8117_s3 + $0x110] sm:$0xff]  }
 0x12a   : > { %5801 = vmatpush3.bf16.msra.mxu0 %v7530_v9  ;;  %5772 = vmatprep.mubr.msk.bf16.mxu0 %vm1727_vm3, %v6677_v54  ;;  %v6160_v54 = vld [vmem:[%s8117_s3 + $0x118] sm:$0xff]   ;;  %v2486_v9 = vsel %vm8281_vm12, %v2483_v32, %v2485_v14  ;;  %vm8284_vm12 = vmmov %vm8268_vm5  ;;  %v8290_v14 = vld [vmem:[#allocation7_spill] sm:$0xff] }
 0x12b   : > { %5802 = vmatprep.subr.bf16.mxu0 %v6158_v23 }
 0x12d   : > { %5581 = vmatmul.mubr.msk.bf16.gmra.mrb[12].mxu1 %vm1727_vm3, %v2482_v8 }
 0x12e   : > { %5584 = vmatprep.mubr.msk.bf16.mxu1 %vm1727_vm3, %v2484_v24  ;;  %5803 = vmatpush3.bf16.msra.mxu0 %v6158_v23  ;;  %v8285_v23 = vld [vmem:[#allocation17_spill] sm:$0xff]  ;;  %v8287_v24 = vld [vmem:[#allocation6_spill] sm:$0xff] }
 0x12f   : > { %5804 = vmatprep.subr.bf16.mxu0 %v6159_v40  ;;  %vm8286_vm13 = vcmp.ne.s16.totalorder %v8285_v23, 0 }
 0x130   : > { %v2437_v8 = vsel %vm8286_vm13, %v7099_v51, 0 }
 0x131   : > { %5773 = vmatmul.mubr.msk.bf16.gmra.mrb[4].mxu0 %vm1727_vm3, %v6755_v20  ;;  %v2489_v20 = vrot.slane %v2435_v4, 1  ;;  %v2493_v39 = vrot.slane %v2437_v8, 1  ;;  %v3073_v8 = vshll.u32 %v7345_v26, 16 }
 0x132   : > { %5776 = vmatprep.mubr.msk.bf16.mxu0 %vm1727_vm3, %v6784_v1  ;;  %5805 = vmatpush3.bf16.msra.mxu0 %v6159_v40  ;;  %v2495_v40 = vrot.slane %v2438_v19, 1  ;;  %v2773_v19 = vsel %vm7212_vm9, %v6603_v29, 0  ;;  %vm8302_vm9 = vsmask.f32 7424 }
 0x133   : > { %5806 = vmatprep.subr.bf16.mxu0 %v6160_v54  ;;  %v2490_v32 = vsel %vm8284_vm12, %v2487_v27, %v2489_v20  ;;  %v2492_v1 = vsel %vm8268_vm5, %v2489_v20, %v2491_v61  ;;  %vm8289_vm12 = vmmov %vm8268_vm5  ;;  %v8295_v20 = vld [vmem:[#allocation9_spill] sm:$0xff] }
 0x134   : > { %v2496_v27 = vsel %vm8268_vm5, %v2493_v39, %v2495_v40 }
 0x135   : > { %5585 = vmatmul.mubr.msk.bf16.gmra.mrb[16].mxu1 %vm1727_vm3, %v2486_v9 }
 0x136   : > { %5588 = vmatprep.mubr.msk.bf16.mxu1 %vm1727_vm3, %v2488_v45  ;;  %5807 = vmatpush3.bf16.msra.mxu0 %v6160_v54  ;;  %v8291_v54 = vld [vmem:[#allocation19_spill] sm:$0xff]  ;;  %v8293_v45 = vld [vmem:[#allocation8_spill] sm:$0xff] }
 0x137   : > { %vm8292_vm13 = vcmp.ne.s16.totalorder %v8291_v54, 0  ;;  %v3075_v54 = vrot.slane %v3073_v8, 1 }
 0x138   : > { %v2439_v9 = vsel %vm8292_vm13, %v7190_v3, 0  ;;  %vm8310_vm13 = vmmov %vm8302_vm9 }
 0x139   : > { %5777 = vmatmul.mubr.msk.bf16.gmra.mrb[8].mxu0 %vm1727_vm3, %v6818_v6  ;;  %v2494_v6 = vsel %vm8289_vm12, %v2491_v61, %v2493_v39  ;;  %v2497_v4 = vrot.slane %v2439_v9, 1  ;;  %v2772_v61 = vsel %vm7392_vm11, %v6597_v22, 0  ;;  %v8298_v39 = vld [vmem:[#allocation11_spill] sm:$0xff]  ;;  %v6291_v9 = vld [vmem:[%s8117_s3 + $0x88] sm:$0xff]   ;;  %vm8305_vm11 = vcmp.ne.s16.totalorder %v6743_v63, 0 }
 0x13a   : > { %5780 = vmatprep.mubr.msk.bf16.mxu0 %vm1727_vm3, %v8287_v24  ;;  %vm8306_vm12 = vnez %v8219_v47  ;;  %v8307_v24 = vld [vmem:[#allocation15_spill] sm:$0xff] }
 0x13b   : > { %v2498_v41 = vsel %vm8294_vm15, %v2495_v40, %v2497_v4  ;;  %v8300_v40 = vld [vmem:[#allocation12_spill] sm:$0xff]  ;;  %v3935_v4 = vshrl.u32 %v7345_v26, 16  ;;  %v2775_v8 = vsel %vm8306_vm12, %v6624_v12, 0 }
 0x13d   : > { %5589 = vmatmul.mubr.msk.bf16.gmra.mrb[20].mxu1 %vm1727_vm3, %v2490_v32  ;;  %v8296_v32 = vld [vmem:[#allocation10_spill] sm:$0xff] }
 0x13e   : > { %5592 = vmatprep.mubr.msk.bf16.mxu1 %vm1727_vm3, %v2492_v1  ;;  %v3069_v1 = vshrl.u32 %v7190_v3, 16 }
 0x141   : > { %5781 = vmatmul.mubr.msk.bf16.gmra.mrb[12].mxu0 %vm1727_vm3, %v8290_v14 }
 0x142   : > { %5784 = vmatprep.mubr.msk.bf16.mxu0 %vm1727_vm3, %v8293_v45 }
 0x145   : > { %5593 = vmatmul.mubr.msk.bf16.gmra.mrb[24].mxu1 %vm1727_vm3, %v2494_v6  ;;  %v8301_v6 = vld [vmem:[#allocation13_spill] sm:$0xff] }
 0x146   : > { %5596 = vmatprep.mubr.msk.bf16.mxu1 %vm1727_vm3, %v2496_v27  ;;  %v3071_v27 = vor.u32 %v3069_v1, %v8301_v6  ;;  %v6293_v6 = vld [vmem:[%s8117_s3 + $0x98] sm:$0xff]  }
 0x149   : > { %5785 = vmatmul.mubr.msk.bf16.gmra.mrb[16].mxu0 %vm1727_vm3, %v8295_v20 }
 0x14a   : > { %5788 = vmatprep.mubr.msk.bf16.mxu0 %vm1727_vm3, %v8296_v32 }
 0x14d   : > { %5597 = vmatmul.mubr.msk.bf16.gmra.mrb[28].mxu1 %vm1727_vm3, %v2498_v41  ;;  %v7785_v41 = vsel %vm8302_vm9, %v3071_v27, %v3075_v54  ;;  %vm8311_vm9 = vcmp.ne.s16.totalorder %v6796_v50, 0 }
 0x14e   : > { %5608 = vmatprep.mubr.msk.bf16.mxu1 %vm1727_vm3, %v2772_v61  ;;  %v8303_v61 = vld [vmem:[#allocation5_spill] sm:$0xff] }
 0x14f   : > { %vm8304_vm7 = vcmp.ne.s16.totalorder %v8303_v61, 0  ;;  %v2778_v61 = vsel %vm7388_vm2, %v6767_v17, 0  ;;  %vm8317_vm2 = vnez %v8241_v62  ;;  %v2782_v62 = vsel %vm7496_vm14, %v7004_v43, 0 }
 0x150   : > { %v4159_v1 = vsel %vm8304_vm7, %v6603_v29, 0  ;;  %v3937_v29 = vor.u32 %v3935_v4, %v3075_v54  ;;  %v4161_v54 = vsel %vm8311_vm9, %v6624_v12, 0  ;;  %vm8312_vm7 = vcmp.ne.s16.totalorder %v6877_v0, 0 }
 0x151   : > { %5789 = vmatmul.mubr.msk.bf16.gmra.mrb[20].mxu0 %vm1727_vm3, %v8298_v39  ;;  %v4199_v63 = vrot.slane %v4159_v1, 1  ;;  %v2777_v4 = vsel %vm7384_vm10, %v6735_v37, 0  ;;  %v4202_v1 = vrot.slane %v4161_v54, 1  ;;  %vm8315_vm10 = vcmp.ne.s16.totalorder %v6904_v11, 0 }
 0x152   : > { %5792 = vmatprep.mubr.msk.bf16.mxu0 %vm1727_vm3, %v8300_v40  ;;  %v4163_v0 = vsel %vm8315_vm10, %v6735_v37, 0  ;;  %v4165_v11 = vsel %vm8320_vm6, %v6778_v48, 0  ;;  %vm8321_vm9 = vcmp.ne.s16.totalorder %v7057_v31, 0  ;;  %vm8324_vm10 = vcmp.ne.s16.totalorder %v7076_v35, 0 }
 0x153   : > { %v4167_v33 = vsel %vm8324_vm10, %v6886_v44, 0  ;;  %vm8326_vm14 = vnez %v8255_v2  ;;  %vm8330_vm6 = vcmp.ne.s16.totalorder %v7179_v59, 0  ;;  %v2785_v2 = vsel %vm7569_vm1, %v7099_v51, 0 }
 0x154   : > { %vm8333_vm1 = vcmp.ne.s16.totalorder %v7226_v30, 0  ;;  %v4174_v30 = vsel %vm8338_vm4, %v7345_v26, 0 }
 0x155   : > { %5609 = vmatmul.mubr.msk.bf16.vlgmr.msra.gmra.mrb[0].mxu1 %vm1727_vm3, %v2773_v19  ;;  %v8308_v19 = vld [vmem:[#allocation18_spill] sm:$0xff] }
 0x156   : > { %5844 = vmatpush3.bf16.msra.mxu1 %v7683_v5  ;;  %5612 = vmatprep.mubr.msk.bf16.mxu1 %vm1727_vm3, %v2774_v55  ;;  %v4160_v5 = vsel %vm8305_vm11, %v6608_v46, 0  ;;  %vm8309_vm5 = vnez %v8308_v19  ;;  %v6292_v46 = vld [vmem:[%s8117_s3 + $0x90] sm:$0xff]   ;;  %v3938_v55 = vsel %vm8310_vm13, %v3937_v29, %v6436_v16  ;;  %vm8313_vm11 = vmmov %vm8294_vm15 }
 0x157   : > { %5841 = vmatprep.subr.bf16.mxu1 %v6291_v9  ;;  %v2776_v22 = vsel %vm8309_vm5, %v6641_v36, 0  ;;  %v4200_v47 = vrot.slane %v4160_v5, 1  ;;  %vm8314_vm12 = vmmov %vm8313_vm11  ;;  %vm8316_vm5 = vcmp.ne.s16.totalorder %v6970_v53, 0  ;;  %v2780_v5 = vsel %vm8317_vm2, %v6805_v60, 0 }
 0x158   : > { %v4164_v13 = vsel %vm8316_vm5, %v6767_v17, 0  ;;  %vm8318_vm13 = vmmov %vm8313_vm11  ;;  %v4166_v53 = vsel %vm8321_vm9, %v6805_v60, 0  ;;  %vm8325_vm5 = vcmp.ne.s16.totalorder %v7107_v38, 0  ;;  %v4170_v38 = vsel %vm8330_vm6, %v7050_v34, 0 }
 0x159   : > { %5793 = vmatmul.mubr.msk.bf16.gmra.mrb[24].mxu0 %vm1727_vm3, %v8307_v24  ;;  %v4201_v27 = vsel %vm8294_vm15, %v4199_v63, %v4200_v47  ;;  %v4203_v12 = vsel %vm8313_vm11, %v4200_v47, %v4202_v1  ;;  %v4208_v19 = vrot.slane %v4164_v13, 1  ;;  %vm8319_vm15 = vmmov %vm8313_vm11  ;;  %v4212_v29 = vrot.slane %v4166_v53, 1 }
 0x15a   : > { %5845 = vmatpush3.bf16.msra.mxu1 %v6291_v9  ;;  %5796 = vmatprep.mubr.msk.bf16.mxu0 %vm1727_vm3, %v7785_v41  ;;  %v4162_v9 = vsel %vm8312_vm7, %v6641_v36, 0  ;;  %vm8322_vm7 = vnez %v8247_v58  ;;  %v4168_v31 = vsel %vm8325_vm5, %v7004_v43, 0  ;;  %v2783_v58 = vsel %vm8326_vm14, %v7036_v18, 0  ;;  %vm8327_vm2 = vmmov %vm8313_vm11 }
 0x15b   : > { %5842 = vmatprep.subr.bf16.mxu1 %v6292_v46  ;;  %v4204_v50 = vrot.slane %v4162_v9, 1  ;;  %v2781_v28 = vsel %vm8322_vm7, %v6886_v44, 0  ;;  %v4216_v63 = vrot.slane %v4168_v31, 1  ;;  %vm8331_vm0 = vmmov %vm8327_vm2  ;;  %vm8334_vm7 = vcmp.ne.s16.totalorder %v7262_v15, 0 }
 0x15c   : > { %vm8332_vm9 = vmmov %vm8331_vm0  ;;  %v4172_v59 = vsel %vm8334_vm7, %v7140_v56, 0 }
 0x15d   : > { %5613 = vmatmul.mubr.msk.bf16.gmra.mrb[4].mxu1 %vm1727_vm3, %v2775_v8  ;;  %v4205_v36 = vsel %vm8314_vm12, %v4202_v1, %v4204_v50  ;;  %v4206_v8 = vrot.slane %v4163_v0, 1  ;;  %vm8323_vm12 = vmmov %vm8313_vm11 }
 0x15e   : > { %5616 = vmatprep.mubr.msk.bf16.mxu1 %vm1727_vm3, %v2776_v22  ;;  %5846 = vmatpush3.bf16.msra.mxu1 %v6292_v46  ;;  %v4210_v22 = vrot.slane %v4165_v11, 1  ;;  %v4214_v46 = vrot.slane %v4167_v33, 1  ;;  %vm8335_vm8 = vmmov %vm8331_vm0 }
 0x15f   : > { %5843 = vmatprep.subr.bf16.mxu1 %v6293_v6  ;;  %v4207_v37 = vsel %vm8318_vm13, %v4204_v50, %v4206_v8  ;;  %v4209_v17 = vsel %vm8319_vm15, %v4206_v8, %v4208_v19  ;;  %vm8328_vm13 = vmmov %vm8327_vm2  ;;  %vm8329_vm15 = vcmp.ne.s16.totalorder %v7126_v49, 0  ;;  %v4171_v49 = vsel %vm8333_vm1, %v7099_v51, 0 }
 0x160   : > { %v4211_v48 = vsel %vm8313_vm11, %v4208_v19, %v4210_v22  ;;  %v4213_v60 = vsel %vm8323_vm12, %v4210_v22, %v4212_v29  ;;  %v4215_v44 = vsel %vm8327_vm2, %v4212_v29, %v4214_v46  ;;  %v4217_v43 = vsel %vm8328_vm13, %v4214_v46, %v4216_v63  ;;  %vm8336_vm11 = vmmov %vm8331_vm0 }
 0x161   : > { %5797 = vmatmul.mubr.msk.bf16.gmra.mrb[28].mxu0 %vm1727_vm3, %v3938_v55  ;;  %v4169_v35 = vsel %vm8329_vm15, %v7036_v18, 0  ;;  %v4220_v55 = vrot.slane %v4170_v38, 1  ;;  %v4222_v21 = vrot.slane %v4171_v49, 1  ;;  %vm8337_vm12 = vcmp.ne.s16.totalorder %v8285_v23, 0  ;;  %vm8339_vm10 = vmmov %vm8331_vm0 }
 0x162   : > { %5847 = vmatpush3.bf16.msra.mxu1 %v6293_v6  ;;  %5808 = vmatprep.mubr.msk.bf16.mxu0 %vm1727_vm3, %v4201_v27  ;;  %v4218_v47 = vrot.slane %v4169_v35, 1  ;;  %v4224_v6 = vrot.slane %v4172_v59, 1  ;;  %v4173_v56 = vsel %vm8337_vm12, %v7190_v3, 0  ;;  %v4228_v27 = vrot.slane %v4174_v30, 1  ;;  %vm8340_vm5 = vmmov %vm8331_vm0 }
 0x163   : > { %v4223_v51 = vsel %vm8335_vm8, %v4220_v55, %v4222_v21  ;;  %v4226_v57 = vrot.slane %v4173_v56, 1  ;;  %vm8341_vm14 = vmmov %vm8331_vm0 }
 0x164   : > { %v4219_v18 = vsel %vm8331_vm0, %v4216_v63, %v4218_v47  ;;  %v4221_v34 = vsel %vm8332_vm9, %v4218_v47, %v4220_v55  ;;  %v4225_v15 = vsel %vm8336_vm11, %v4222_v21, %v4224_v6  ;;  %v4230_v26 = vsel %vm8341_vm14, %v4228_v27, %v6436_v16 }
 0x165   : > { %5617 = vmatmul.mubr.msk.bf16.gmra.mrb[8].mxu1 %vm1727_vm3, %v2777_v4  ;;  %v4229_v3 = vsel %vm8340_vm5, %v4226_v57, %v4228_v27 }
 0x166   : > { %5620 = vmatprep.mubr.msk.bf16.mxu1 %vm1727_vm3, %v2778_v61 }
 0x169   : > { %5809 = vmatmul.mubr.msk.bf16.vlgmr.msra.gmra.mrb[0].mxu0 %vm1727_vm3, %v4203_v12  ;;  %v7961_v12 = vld [vmem:[%s8119_s5] ss:$0 sm:$0xff] }
 0x16a   : > { %5812 = vmatprep.mubr.msk.bf16.mxu0 %vm1727_vm3, %v4205_v36 }
 0x16d   : > { %5621 = vmatmul.mubr.msk.bf16.gmra.mrb[12].mxu1 %vm1727_vm3, %v2779_v7 }
 0x16e   : > { %5624 = vmatprep.mubr.msk.bf16.mxu1 %vm1727_vm3, %v2780_v5 }
 0x171   : > { %5813 = vmatmul.mubr.msk.bf16.gmra.mrb[4].mxu0 %vm1727_vm3, %v4207_v37 }
 0x172   : > { %5816 = vmatprep.mubr.msk.bf16.mxu0 %vm1727_vm3, %v4209_v17 }
 0x175   : > { %5625 = vmatmul.mubr.msk.bf16.gmra.mrb[16].mxu1 %vm1727_vm3, %v2781_v28 }
 0x176   : > { %5628 = vmatprep.mubr.msk.bf16.mxu1 %vm1727_vm3, %v2782_v62 }
 0x179   : > { %5817 = vmatmul.mubr.msk.bf16.gmra.mrb[8].mxu0 %vm1727_vm3, %v4211_v48 }
 0x17a   : > { %5820 = vmatprep.mubr.msk.bf16.mxu0 %vm1727_vm3, %v4213_v60 }
 0x17d   : > { %5629 = vmatmul.mubr.msk.bf16.gmra.mrb[20].mxu1 %vm1727_vm3, %v2783_v58 }
 0x17e   : > { %5632 = vmatprep.mubr.msk.bf16.mxu1 %vm1727_vm3, %v2784_v52 }
 0x181   : > { %5821 = vmatmul.mubr.msk.bf16.gmra.mrb[12].mxu0 %vm1727_vm3, %v4215_v44 }
 0x182   : > { %5824 = vmatprep.mubr.msk.bf16.mxu0 %vm1727_vm3, %v4217_v43 }
 0x185   : > { %5633 = vmatmul.mubr.msk.bf16.gmra.mrb[24].mxu1 %vm1727_vm3, %v2785_v2 }
 0x186   : > { %5636 = vmatprep.mubr.msk.bf16.mxu1 %vm1727_vm3, %v2786_v42 }
 0x189   : > { %5825 = vmatmul.mubr.msk.bf16.gmra.mrb[16].mxu0 %vm1727_vm3, %v4219_v18 }
 0x18a   : > { %5828 = vmatprep.mubr.msk.bf16.mxu0 %vm1727_vm3, %v4221_v34 }
 0x18d   : > { %5637 = vmatmul.mubr.msk.bf16.gmra.mrb[28].mxu1 %vm1727_vm3, %v2787_v25 }
 0x18e   : > { %5664 = vmatprep.mubr.msk.bf16.mxu1 %vm1727_vm3, %v8290_v14  ;;  %v4227_v14 = vsel %vm8339_vm10, %v4224_v6, %v4226_v57 }
 0x191   : > { %5829 = vmatmul.mubr.msk.bf16.gmra.mrb[20].mxu0 %vm1727_vm3, %v4223_v51 }
 0x192   : > { %5832 = vmatprep.mubr.msk.bf16.mxu0 %vm1727_vm3, %v4225_v15 }
 0x195   : > { %5665 = vmatmul.mubr.msk.bf16.vlgmr.msra.gmra.mrb[16].mxu1 %vm1727_vm3, %v8293_v45 }
 0x196   : > { %5668 = vmatprep.mubr.msk.bf16.mxu1 %vm1727_vm3, %v8295_v20 }
 0x199   : > { %5833 = vmatmul.mubr.msk.bf16.gmra.mrb[24].mxu0 %vm1727_vm3, %v4227_v14 }
 0x19a   : > { %5836 = vmatprep.mubr.msk.bf16.mxu0 %vm1727_vm3, %v4229_v3 }
 0x19d   : > { %5669 = vmatmul.mubr.msk.bf16.gmra.mrb[20].mxu1 %vm1727_vm3, %v8296_v32 }
 0x19e   : > { %5672 = vmatprep.mubr.msk.bf16.mxu1 %vm1727_vm3, %v8298_v39 }
 0x1a1   : > { %5837 = vmatmul.mubr.msk.bf16.gmra.mrb[28].mxu0 %vm1727_vm3, %v4230_v26 }
 0x1a5   : > { %5673 = vmatmul.mubr.msk.bf16.gmra.mrb[24].mxu1 %vm1727_vm3, %v8300_v40 }
 0x1a6   : > { %5676 = vmatprep.mubr.msk.bf16.mxu1 %vm1727_vm3, %v8307_v24  ;;  %v7956_v24 = vld [vmem:[%s8118_s4] ss:$0 sm:$0xff] }
 0x1ad   : > { %5677 = vmatmul.mubr.msk.bf16.gmra.mrb[28].mxu1 %vm1727_vm3, %v7785_v41  ;;  %vm4702_vm3 = vcmask 519168  }
 0x228   : > { %v5610_v10 = vpop.f32.mrb[0].mxu1 }
 0x229   : > { %v2902_v23 = vpop.f32.mrb[1].mxu1 }
 0x22a   : > { %v5611_v45 = vpop.f32.mrb[2].mxu1 }
 0x22b   : > { %v2905_v20 = vpop.f32.mrb[3].mxu1 }
 0x230   : > { %v5614_v32 = vpop.f32.mrb[4].mxu1 }
 0x231   : > { %v2918_v39 = vpop.f32.mrb[5].mxu1 }
 0x232   : > { %v5615_v54 = vpop.f32.mrb[6].mxu1 }
 0x233   : > { %v2921_v9 = vpop.f32.mrb[7].mxu1 }
 0x238   : > { %v5618_v16 = vpop.f32.mrb[8].mxu1 }
 0x239   : > { %v2934_v4 = vpop.f32.mrb[9].mxu1 }
 0x23a   : > { %v7949_v61 = vpop.f32.mrb[10].mxu1 }
 0x23b   : > { %v7951_v1 = vpop.f32.mrb[11].mxu1 }
 0x23c   : > { %v5810_v40 = vpop.f32.mrb[0].mxu0 }
 0x23d   : > { %v5848_v41 = vadd.f32 %v5810_v40, %v5610_v10  ;;  %v4337_v50 = vpop.f32.mrb[1].mxu0 }
 0x23e   : > { %v5849_v36 = vadd.f32 %v4337_v50, %v2902_v23  ;;  %v5811_v0 = vpop.f32.mrb[2].mxu0 }
 0x23f   : > { %v4505_v7 = vmul.f32 %v5848_v41, %v7956_v24  ;;  %v5850_v5 = vadd.f32 %v5811_v0, %v5611_v45  ;;  %v4340_v8 = vpop.f32.mrb[3].mxu0 }
 0x240   : > { %v7963_v13 = vpop.f32.mrb[12].mxu1  ;;  %v4503_v37 = vmul.f32 %v5849_v36, %v7956_v24  ;;  %v5851_v17 = vadd.f32 %v4340_v8, %v2905_v20 }
 0x241   : > { %v7966_v19 = vpop.f32.mrb[13].mxu1  ;;  %v4544_v53 = vadd.f32 %v7961_v12, %v4505_v7  ;;  %v4506_v28 = vmul.f32 %v5850_v5, %v7956_v24 }
 0x242   : > { %v7969_v11 = vpop.f32.mrb[14].mxu1  ;;  %v4542_v22 = vadd.f32 %v7961_v12, %v4503_v37  ;;  %v4504_v29 = vmul.f32 %v5851_v17, %v7956_v24 }
 0x243   : > { %v7979_v62 = vpop.f32.mrb[15].mxu1  ;;  %v5112_v48 = vpack.c.bf16 %v4544_v53, %v4544_v53  ;;  %v4545_v60 = vadd.f32 %v7961_v12, %v4506_v28 }
 0x244   : > { %v5110_v33 = vpack.c.bf16 %v4542_v22, %v4542_v22  ;;  %v4543_v31 = vadd.f32 %v7961_v12, %v4504_v29  ;;  %v5814_v58 = vpop.f32.mrb[4].mxu0 }
 0x245   : > { %4705 = vst.msk [vmem:[%s7977_s20 + $0x8] sm:$0xf] %vm4702_vm3, %v5112_v48  ;;  %v5113_v52 = vpack.c.bf16 %v4545_v60, %v4545_v60  ;;  %v5852_v46 = vadd.f32 %v5814_v58, %v5614_v32  ;;  %v4353_v63 = vpop.f32.mrb[5].mxu0 }
 0x246   : > { %4703 = vst.msk [vmem:[%s7977_s20] sm:$0xf] %vm4702_vm3, %v5110_v33  ;;  %v5111_v44 = vpack.c.bf16 %v4543_v31, %v4543_v31  ;;  %v5853_v43 = vadd.f32 %v4353_v63, %v2918_v39  ;;  %v5815_v35 = vpop.f32.mrb[6].mxu0 }
 0x247   : > { %4706 = vst.msk [vmem:[%s7977_s20 + $0xc] sm:$0xf] %vm4702_vm3, %v5113_v52  ;;  %v4509_v38 = vmul.f32 %v5852_v46, %v7956_v24  ;;  %v5854_v2 = vadd.f32 %v5815_v35, %v5615_v54  ;;  %v4356_v42 = vpop.f32.mrb[7].mxu0 }
 0x248   : > { %4704 = vst.msk [vmem:[%s7977_s20 + $0x4] sm:$0xf] %vm4702_vm3, %v5111_v44  ;;  %v4507_v47 = vmul.f32 %v5853_v43, %v7956_v24  ;;  %v5855_v55 = vadd.f32 %v4356_v42, %v2921_v9 }
 0x249   : > { %v4548_v18 = vadd.f32 %v7961_v12, %v4509_v38  ;;  %v4510_v34 = vmul.f32 %v5854_v2, %v7956_v24 }
 0x24a   : > { %v4546_v49 = vadd.f32 %v7961_v12, %v4507_v47  ;;  %v4508_v59 = vmul.f32 %v5855_v55, %v7956_v24 }
 0x24b   : > { %v5116_v25 = vpack.c.bf16 %v4548_v18, %v4548_v18  ;;  %v4549_v21 = vadd.f32 %v7961_v12, %v4510_v34 }
 0x24c   : > { %v5114_v6 = vpack.c.bf16 %v4546_v49, %v4546_v49  ;;  %v4547_v51 = vadd.f32 %v7961_v12, %v4508_v59  ;;  %v5818_v15 = vpop.f32.mrb[8].mxu0 }
 0x24d   : > { %4709 = vst.msk [vmem:[%s7977_s20 + $0x18] sm:$0xf] %vm4702_vm3, %v5116_v25  ;;  %v5117_v56 = vpack.c.bf16 %v4549_v21, %v4549_v21  ;;  %v5856_v30 = vadd.f32 %v5818_v15, %v5618_v16  ;;  %v4369_v57 = vpop.f32.mrb[9].mxu0 }
 0x24e   : > { %4707 = vst.msk [vmem:[%s7977_s20 + $0x10] sm:$0xf] %vm4702_vm3, %v5114_v6  ;;  %v5115_v27 = vpack.c.bf16 %v4547_v51, %v4547_v51  ;;  %v5857_v14 = vadd.f32 %v4369_v57, %v2934_v4  ;;  %v5819_v3 = vpop.f32.mrb[10].mxu0 }
 0x24f   : > { %4710 = vst.msk [vmem:[%s7977_s20 + $0x1c] sm:$0xf] %vm4702_vm3, %v5117_v56  ;;  %v4513_v26 = vmul.f32 %v5856_v30, %v7956_v24  ;;  %v5858_v10 = vadd.f32 %v5819_v3, %v7949_v61  ;;  %v4372_v23 = vpop.f32.mrb[11].mxu0 }
 0x250   : > { %4708 = vst.msk [vmem:[%s7977_s20 + $0x14] sm:$0xf] %vm4702_vm3, %v5115_v27  ;;  %v4511_v45 = vmul.f32 %v5857_v14, %v7956_v24  ;;  %v5859_v20 = vadd.f32 %v4372_v23, %v7951_v1 }
 0x251   : > { %v4552_v32 = vadd.f32 %v7961_v12, %v4513_v26  ;;  %v4514_v39 = vmul.f32 %v5858_v10, %v7956_v24 }
 0x252   : > { %v4550_v54 = vadd.f32 %v7961_v12, %v4511_v45  ;;  %v4512_v9 = vmul.f32 %v5859_v20, %v7956_v24 }
 0x253   : > { %v5120_v16 = vpack.c.bf16 %v4552_v32, %v4552_v32  ;;  %v4553_v4 = vadd.f32 %v7961_v12, %v4514_v39 }
 0x254   : > { %v5118_v61 = vpack.c.bf16 %v4550_v54, %v4550_v54  ;;  %v4551_v40 = vadd.f32 %v7961_v12, %v4512_v9  ;;  %v5822_v41 = vpop.f32.mrb[12].mxu0 }
 0x255   : > { %4713 = vst.msk [vmem:[%s7977_s20 + $0x28] sm:$0xf] %vm4702_vm3, %v5120_v16  ;;  %v5121_v1 = vpack.c.bf16 %v4553_v4, %v4553_v4  ;;  %v5860_v50 = vadd.f32 %v5822_v41, %v7963_v13  ;;  %v4385_v36 = vpop.f32.mrb[13].mxu0 }
 0x256   : > { %4711 = vst.msk [vmem:[%s7977_s20 + $0x20] sm:$0xf] %vm4702_vm3, %v5118_v61  ;;  %v5119_v0 = vpack.c.bf16 %v4551_v40, %v4551_v40  ;;  %v5861_v7 = vadd.f32 %v4385_v36, %v7966_v19  ;;  %v5823_v5 = vpop.f32.mrb[14].mxu0 }
 0x257   : > { %4714 = vst.msk [vmem:[%s7977_s20 + $0x2c] sm:$0xf] %vm4702_vm3, %v5121_v1  ;;  %v4517_v8 = vmul.f32 %v5860_v50, %v7956_v24  ;;  %v5862_v37 = vadd.f32 %v5823_v5, %v7969_v11  ;;  %v4388_v17 = vpop.f32.mrb[15].mxu0 }
 0x258   : > { %4712 = vst.msk [vmem:[%s7977_s20 + $0x24] sm:$0xf] %vm4702_vm3, %v5119_v0  ;;  %v4515_v13 = vmul.f32 %v5861_v7, %v7956_v24  ;;  %v5863_v53 = vadd.f32 %v4388_v17, %v7979_v62 }
 0x259   : > { %v4556_v28 = vadd.f32 %v7961_v12, %v4517_v8  ;;  %v4518_v19 = vmul.f32 %v5862_v37, %v7956_v24 }
 0x25a   : > { %v4554_v22 = vadd.f32 %v7961_v12, %v4515_v13  ;;  %v4516_v29 = vmul.f32 %v5863_v53, %v7956_v24 }
 0x25b   : > { %v5124_v48 = vpack.c.bf16 %v4556_v28, %v4556_v28  ;;  %v4557_v11 = vadd.f32 %v7961_v12, %v4518_v19 }
 0x25c   : > { %v5122_v60 = vpack.c.bf16 %v4554_v22, %v4554_v22  ;;  %v4555_v33 = vadd.f32 %v7961_v12, %v4516_v29  ;;  %v5826_v31 = vpop.f32.mrb[16].mxu0 }
 0x25d   : > { %4717 = vst.msk [vmem:[%s7977_s20 + $0x38] sm:$0xf] %vm4702_vm3, %v5124_v48  ;;  %v5125_v62 = vpack.c.bf16 %v4557_v11, %v4557_v11  ;;  %v4401_v58 = vpop.f32.mrb[17].mxu0 }
 0x25e   : > { %4715 = vst.msk [vmem:[%s7977_s20 + $0x30] sm:$0xf] %vm4702_vm3, %v5122_v60  ;;  %v5123_v52 = vpack.c.bf16 %v4555_v33, %v4555_v33  ;;  %v5827_v46 = vpop.f32.mrb[18].mxu0 }
 0x25f   : > { %4718 = vst.msk [vmem:[%s7977_s20 + $0x3c] sm:$0xf] %vm4702_vm3, %v5125_v62  ;;  %v4404_v63 = vpop.f32.mrb[19].mxu0 }
 0x260   : > { %4716 = vst.msk [vmem:[%s7977_s20 + $0x34] sm:$0xf] %vm4702_vm3, %v5123_v52 }
 0x264   : > { %v5830_v44 = vpop.f32.mrb[20].mxu0 }
 0x265   : > { %v4417_v43 = vpop.f32.mrb[21].mxu0 }
 0x266   : > { %v5831_v35 = vpop.f32.mrb[22].mxu0 }
 0x267   : > { %v4420_v2 = vpop.f32.mrb[23].mxu0 }
 0x268   : > { %v5666_v38 = vpop.f32.mrb[16].mxu1 }
 0x269   : > { %v3202_v42 = vpop.f32.mrb[17].mxu1  ;;  %v5864_v47 = vadd.f32 %v5826_v31, %v5666_v38 }
 0x26a   : > { %v5667_v55 = vpop.f32.mrb[18].mxu1  ;;  %v5865_v18 = vadd.f32 %v4401_v58, %v3202_v42 }
 0x26b   : > { %v4521_v34 = vmul.f32 %v5864_v47, %v7956_v24  ;;  %v3205_v49 = vpop.f32.mrb[19].mxu1  ;;  %v5866_v59 = vadd.f32 %v5827_v46, %v5667_v55 }
 0x26c   : > { %v4519_v25 = vmul.f32 %v5865_v18, %v7956_v24  ;;  %v5867_v21 = vadd.f32 %v4404_v63, %v3205_v49  ;;  %v5834_v15 = vpop.f32.mrb[24].mxu0 }
 0x26d   : > { %v4560_v6 = vadd.f32 %v7961_v12, %v4521_v34  ;;  %v4522_v51 = vmul.f32 %v5866_v59, %v7956_v24  ;;  %v4433_v57 = vpop.f32.mrb[25].mxu0 }
 0x26e   : > { %v4558_v56 = vadd.f32 %v7961_v12, %v4519_v25  ;;  %v4520_v30 = vmul.f32 %v5867_v21, %v7956_v24  ;;  %v5835_v3 = vpop.f32.mrb[26].mxu0 }
 0x26f   : > { %v5128_v27 = vpack.c.bf16 %v4560_v6, %v4560_v6  ;;  %v4561_v14 = vadd.f32 %v7961_v12, %v4522_v51  ;;  %v4436_v45 = vpop.f32.mrb[27].mxu0 }
 0x270   : > { %v5126_v26 = vpack.c.bf16 %v4558_v56, %v4558_v56  ;;  %v4559_v10 = vadd.f32 %v7961_v12, %v4520_v30  ;;  %v5670_v23 = vpop.f32.mrb[20].mxu1 }
 0x271   : > { %4721 = vst.msk [vmem:[%s7977_s20 + $0x48] sm:$0xf] %vm4702_vm3, %v5128_v27  ;;  %v5129_v20 = vpack.c.bf16 %v4561_v14, %v4561_v14  ;;  %v3218_v32 = vpop.f32.mrb[21].mxu1  ;;  %v5868_v39 = vadd.f32 %v5830_v44, %v5670_v23 }
 0x272   : > { %4719 = vst.msk [vmem:[%s7977_s20 + $0x40] sm:$0xf] %vm4702_vm3, %v5126_v26  ;;  %v5127_v54 = vpack.c.bf16 %v4559_v10, %v4559_v10  ;;  %v5671_v9 = vpop.f32.mrb[22].mxu1  ;;  %v5869_v16 = vadd.f32 %v4417_v43, %v3218_v32 }
 0x273   : > { %4722 = vst.msk [vmem:[%s7977_s20 + $0x4c] sm:$0xf] %vm4702_vm3, %v5129_v20  ;;  %v4525_v4 = vmul.f32 %v5868_v39, %v7956_v24  ;;  %v3221_v61 = vpop.f32.mrb[23].mxu1  ;;  %v5870_v40 = vadd.f32 %v5831_v35, %v5671_v9 }
 0x274   : > { %4720 = vst.msk [vmem:[%s7977_s20 + $0x44] sm:$0xf] %vm4702_vm3, %v5127_v54  ;;  %v4523_v41 = vmul.f32 %v5869_v16, %v7956_v24  ;;  %v5871_v1 = vadd.f32 %v4420_v2, %v3221_v61  ;;  %v5838_v0 = vpop.f32.mrb[28].mxu0 }
 0x275   : > { %v4564_v50 = vadd.f32 %v7961_v12, %v4525_v4  ;;  %v4526_v36 = vmul.f32 %v5870_v40, %v7956_v24  ;;  %v4449_v8 = vpop.f32.mrb[29].mxu0 }
 0x276   : > { %v4562_v7 = vadd.f32 %v7961_v12, %v4523_v41  ;;  %v4524_v5 = vmul.f32 %v5871_v1, %v7956_v24  ;;  %v5839_v13 = vpop.f32.mrb[30].mxu0 }
 0x277   : > { %v5132_v37 = vpack.c.bf16 %v4564_v50, %v4564_v50  ;;  %v4565_v17 = vadd.f32 %v7961_v12, %v4526_v36  ;;  %v4452_v22 = vpop.f32.mrb[31].mxu0 }
 0x278   : > { %v5130_v53 = vpack.c.bf16 %v4562_v7, %v4562_v7  ;;  %v4563_v28 = vadd.f32 %v7961_v12, %v4524_v5  ;;  %v5674_v19 = vpop.f32.mrb[24].mxu1 }
 0x279   : > { %4725 = vst.msk [vmem:[%s7977_s20 + $0x58] sm:$0xf] %vm4702_vm3, %v5132_v37  ;;  %v5133_v29 = vpack.c.bf16 %v4565_v17, %v4565_v17  ;;  %v3234_v48 = vpop.f32.mrb[25].mxu1  ;;  %v5872_v11 = vadd.f32 %v5834_v15, %v5674_v19 }
 0x27a   : > { %4723 = vst.msk [vmem:[%s7977_s20 + $0x50] sm:$0xf] %vm4702_vm3, %v5130_v53  ;;  %v5131_v60 = vpack.c.bf16 %v4563_v28, %v4563_v28  ;;  %v5675_v33 = vpop.f32.mrb[26].mxu1  ;;  %v5873_v31 = vadd.f32 %v4433_v57, %v3234_v48 }
 0x27b   : > { %4726 = vst.msk [vmem:[%s7977_s20 + $0x5c] sm:$0xf] %vm4702_vm3, %v5133_v29  ;;  %v4529_v62 = vmul.f32 %v5872_v11, %v7956_v24  ;;  %v3237_v58 = vpop.f32.mrb[27].mxu1  ;;  %v5874_v52 = vadd.f32 %v5835_v3, %v5675_v33 }
 0x27c   : > { %4724 = vst.msk [vmem:[%s7977_s20 + $0x54] sm:$0xf] %vm4702_vm3, %v5131_v60  ;;  %v4527_v46 = vmul.f32 %v5873_v31, %v7956_v24  ;;  %v5875_v63 = vadd.f32 %v4436_v45, %v3237_v58 }
 0x27d   : > { %v4568_v44 = vadd.f32 %v7961_v12, %v4529_v62  ;;  %v4530_v43 = vmul.f32 %v5874_v52, %v7956_v24 }
 0x27e   : > { %v4566_v35 = vadd.f32 %v7961_v12, %v4527_v46  ;;  %v4528_v38 = vmul.f32 %v5875_v63, %v7956_v24 }
 0x27f   : > { %v5136_v2 = vpack.c.bf16 %v4568_v44, %v4568_v44  ;;  %v4569_v42 = vadd.f32 %v7961_v12, %v4530_v43 }
 0x280   : > { %v5134_v47 = vpack.c.bf16 %v4566_v35, %v4566_v35  ;;  %v4567_v55 = vadd.f32 %v7961_v12, %v4528_v38  ;;  %v5678_v18 = vpop.f32.mrb[28].mxu1 }
 0x281   : > { %4729 = vst.msk [vmem:[%s7977_s20 + $0x68] sm:$0xf] %vm4702_vm3, %v5136_v2  ;;  %v5137_v34 = vpack.c.bf16 %v4569_v42, %v4569_v42  ;;  %v3250_v49 = vpop.f32.mrb[29].mxu1  ;;  %v5876_v59 = vadd.f32 %v5838_v0, %v5678_v18 }
 0x282   : > { %4727 = vst.msk [vmem:[%s7977_s20 + $0x60] sm:$0xf] %vm4702_vm3, %v5134_v47  ;;  %v5135_v25 = vpack.c.bf16 %v4567_v55, %v4567_v55  ;;  %v5679_v21 = vpop.f32.mrb[30].mxu1  ;;  %v5877_v6 = vadd.f32 %v4449_v8, %v3250_v49 }
 0x283   : > { %4730 = vst.msk [vmem:[%s7977_s20 + $0x6c] sm:$0xf] %vm4702_vm3, %v5137_v34  ;;  %v4533_v51 = vmul.f32 %v5876_v59, %v7956_v24  ;;  %v3253_v15 = vpop.f32.mrb[31].mxu1  ;;  %v5878_v56 = vadd.f32 %v5839_v13, %v5679_v21 }
 0x284   : > { %4728 = vst.msk [vmem:[%s7977_s20 + $0x64] sm:$0xf] %vm4702_vm3, %v5135_v25  ;;  %v4531_v30 = vmul.f32 %v5877_v6, %v7956_v24  ;;  %v5879_v57 = vadd.f32 %v4452_v22, %v3253_v15 }
 0x285   : > { %v4572_v27 = vadd.f32 %v7961_v12, %v4533_v51  ;;  %v4534_v14 = vmul.f32 %v5878_v56, %v7956_v24 }
 0x286   : > { %v4570_v3 = vadd.f32 %v7961_v12, %v4531_v30  ;;  %v4532_v26 = vmul.f32 %v5879_v57, %v7956_v24 }
 0x287   : > { %v5140_v10 = vpack.c.bf16 %v4572_v27, %v4572_v27  ;;  %v4573_v23 = vadd.f32 %v7961_v12, %v4534_v14 }
 0x288   : > { %v5138_v45 = vpack.c.bf16 %v4570_v3, %v4570_v3  ;;  %v4571_v20 = vadd.f32 %v7961_v12, %v4532_v26 }
 0x289   : > { %4733 = vst.msk [vmem:[%s7977_s20 + $0x78] sm:$0xf] %vm4702_vm3, %v5140_v10  ;;  %v5141_v32 = vpack.c.bf16 %v4573_v23, %v4573_v23 }
 0x28a   : > { %4731 = vst.msk [vmem:[%s7977_s20 + $0x70] sm:$0xf] %vm4702_vm3, %v5138_v45  ;;  %v5139_v39 = vpack.c.bf16 %v4571_v20, %v4571_v20 }
 0x28b   : > { %4734 = vst.msk [vmem:[%s7977_s20 + $0x7c] sm:$0xf] %vm4702_vm3, %v5141_v32 }
 0x28c   : > { %4732 = vst.msk [vmem:[%s7977_s20 + $0x74] sm:$0xf] %vm4702_vm3, %v5139_v39 }
 0x28d PF: > { %s17_s21 = sadd.s32 1, %s6319_s21  }
 0x28e   : > { %p14_p1 = scmp.ge.s32.totalorder %s17_s21, 4  }
 0x290   :  { %16 = sbr.rel (!%p14_p1) target bundleno = 1 (0x1), region = 82 }
 0x297   :  { %4756 = vsyncpa [#allocation3], 1 }
 0x298   :  { %4758 = vsyncpa [#allocation3 + $0x1], 1 }

</bundles_post_ra>
